<compile_context>
chip_gen: v6e
topology: v6e:2x2x1
jax: 0.10.0
libtpu: 0.0.40
codegen_flags: <defaults>
</compile_context>

<pallas_src>
import functools

import jax
import jax.numpy as jnp
from jax import lax
from jax.experimental import pallas as pl
from jax.experimental.pallas import tpu as pltpu

EPS = 1e-5
LANE = 128     # TPU lane width
CHUNK = 8      # WKV time-step slab = one full sublane group


def _round_up(x, m):
    return (x + m - 1) // m * m


def rwkv_layer_kernel(
    x_ref,
    ln0_g_ref, ln0_b_ref,
    ln1_g_ref, ln1_b_ref,
    ln2_g_ref, ln2_b_ref,
    w_att_ref, adecay_ref, afirst_ref, awo_ref,
    w_ffn_ref, fwv_ref,
    o_ref,
    k_s, v_s, wkv_s,
    *, c_real, cp, hdp,
):
    T = x_ref.shape[1]
    inv_c = 1.0 / c_real

    # Lane mask for the real (unpadded) channels — hoisted, reused by every LN.
    lane_ids = lax.broadcasted_iota(jnp.int32, (1, cp), 1)
    cmask = (lane_ids < c_real).astype(jnp.float32)
    # Row-0 mask for the token shift — hoisted (used twice).
    row_ids = lax.broadcasted_iota(jnp.int32, (T, cp), 0)
    is_first_row = row_ids == 0

    def layernorm(x, g, b):
        # statistics over the real channels only (padded lanes of x are 0)
        mu = jnp.sum(x, axis=-1, keepdims=True) * inv_c
        d = (x - mu) * cmask
        var = jnp.sum(d * d, axis=-1, keepdims=True) * inv_c
        return d * lax.rsqrt(var + EPS) * g + b

    def token_shift(x):
        # xx[t] = x[t-1], xx[0] = 0  (XLU sublane roll, no (T,T) matmul)
        y = pltpu.roll(x, shift=1, axis=0)
        return jnp.where(is_first_row, 0.0, y)

    x_in = x_ref[0]                                            # (T, Cp)
    x_norm = layernorm(x_in, ln0_g_ref[...], ln0_b_ref[...])   # outer self.norm

    # ---------------------------- time-mix (WKV) ----------------------------
    xa = layernorm(x_norm, ln1_g_ref[...], ln1_b_ref[...])
    xx = token_shift(xa)
    # One fused projection: [k | v | r_pre] = [xa | xx] @ w_att   (mix folded
    # into pre-scaled weights in the wrapper).
    kvr = jnp.dot(jnp.concatenate([xa, xx], axis=-1), w_att_ref[...],
                  preferred_element_type=jnp.float32)          # (T, 3*Cp)
    k_s[...] = kvr[:, :cp]
    v_s[...] = kvr[:, cp:2 * cp]
    r = jax.nn.sigmoid(kvr[:, 2 * cp:])

    w = -jnp.exp(adecay_ref[...])                              # (1, Cp) decay
    u = afirst_ref[...]                                        # (1, Cp) bonus

    def chunk_body(c, carry):
        aa, bb, pp = carry                                     # vreg-resident state
        start = pl.multiple_of(c * CHUNK, CHUNK)
        k_slab = k_s[pl.ds(start, CHUNK), :]                   # (CHUNK, Cp) full vld
        v_slab = v_s[pl.ds(start, CHUNK), :]
        outs = []
        for j in range(CHUNK):                                 # fully unrolled
            kt = k_slab[j:j + 1, :]
            vt = v_slab[j:j + 1, :]
            ww = u + kt
            p = jnp.maximum(pp, ww)
            e1 = jnp.exp(pp - p)
            e2 = jnp.exp(ww - p)
            outs.append((e1 * aa + e2 * vt) / (e1 * bb + e2))
            ww2 = pp + w
            p2 = jnp.maximum(ww2, kt)
            e1b = jnp.exp(ww2 - p2)
            e2b = jnp.exp(kt - p2)
            aa = e1b * aa + e2b * vt
            bb = e1b * bb + e2b
            pp = p2
        wkv_s[pl.ds(start, CHUNK), :] = jnp.concatenate(outs, axis=0)
        return aa, bb, pp

    init = (jnp.zeros((1, cp), jnp.float32),
            jnp.zeros((1, cp), jnp.float32),
            jnp.full((1, cp), -1e38, jnp.float32))
    lax.fori_loop(0, T // CHUNK, chunk_body, init)

    att = jnp.dot(r * wkv_s[...], awo_ref[...],
                  preferred_element_type=jnp.float32)
    x1 = x_norm + att

    # ---------------------------- channel-mix (FFN) --------------------------
    xb = layernorm(x1, ln2_g_ref[...], ln2_b_ref[...])
    xx2 = token_shift(xb)
    # One fused projection: [k_path | r_path] = [xb | xx2] @ w_ffn
    proj = jnp.dot(jnp.concatenate([xb, xx2], axis=-1), w_ffn_ref[...],
                   preferred_element_type=jnp.float32)         # (T, Hdp + Cp)
    kk = jnp.square(jnp.maximum(proj[:, :hdp], 0.0))
    r2 = jax.nn.sigmoid(proj[:, hdp:])
    kv = jnp.dot(kk, fwv_ref[...], preferred_element_type=jnp.float32)
    x2 = x1 + r2 * kv

    # ---------------------------- RWKVLayer skip -----------------------------
    o_ref[0] = x2 + x_in


def rwkv_layer_forward(x_nchw, params):
    B, C, H, W = x_nchw.shape
    T = H * W
    Hd = params["fwk"].shape[1]

    Cp = _round_up(C, LANE)      # lane-dense channel dim
    Hdp = _round_up(Hd, LANE)
    Tp = _round_up(T, CHUNK)     # whole-chunk time dim

    f32 = jnp.float32
    x_btc = jnp.transpose(x_nchw.reshape(B, C, T), (0, 2, 1)).astype(f32)
    x_p = jnp.pad(x_btc, ((0, 0), (0, Tp - T), (0, Cp - C)))

    def pad_vec(v):                        # (1, C) -> (1, Cp), zero pad
        return jnp.pad(v.astype(f32), ((0, 0), (0, Cp - v.shape[1])))

    def pad_mat(m, rows, cols):
        return jnp.pad(m.astype(f32),
                       ((0, rows - m.shape[0]), (0, cols - m.shape[1])))

    # ---- fold the time-mix interpolation into pre-scaled, fused weights ----
    #   k = (mk*xa + (1-mk)*xx) @ awk = xa @ (mk^T * awk) + xx @ ((1-mk)^T * awk)
    mk, mv, mr = params["amk"], params["amv"], params["amr"]
    awk, awv, awr = params["awk"], params["awv"], params["awr"]
    w_att = jnp.concatenate([
        jnp.concatenate([pad_mat(mk.T * awk, Cp, Cp),
                         pad_mat(mv.T * awv, Cp, Cp),
                         pad_mat(mr.T * awr, Cp, Cp)], axis=1),
        jnp.concatenate([pad_mat((1.0 - mk).T * awk, Cp, Cp),
                         pad_mat((1.0 - mv).T * awv, Cp, Cp),
                         pad_mat((1.0 - mr).T * awr, Cp, Cp)], axis=1),
    ], axis=0)                                                  # (2Cp, 3Cp)

    fmk, fmr = params["fmk"], params["fmr"]
    fwk, fwv, fwr = params["fwk"], params["fwv"], params["fwr"]
    w_ffn = jnp.concatenate([
        jnp.concatenate([pad_mat(fmk.T * fwk, Cp, Hdp),
                         pad_mat(fmr.T * fwr, Cp, Cp)], axis=1),
        jnp.concatenate([pad_mat((1.0 - fmk).T * fwk, Cp, Hdp),
                         pad_mat((1.0 - fmr).T * fwr, Cp, Cp)], axis=1),
    ], axis=0)                                                  # (2Cp, Hdp+Cp)

    inputs = [
        x_p,
        pad_vec(params["ln0_g"]), pad_vec(params["ln0_b"]),
        pad_vec(params["ln1_g"]), pad_vec(params["ln1_b"]),
        pad_vec(params["ln2_g"]), pad_vec(params["ln2_b"]),
        w_att,
        pad_vec(params["adecay"]), pad_vec(params["afirst"]),
        pad_mat(params["awo"], Cp, Cp),
        w_ffn,
        pad_mat(fwv, Hdp, Cp),
    ]

    def rep_spec(shape):
        # replicated parameter: same block for every grid step (no re-DMA)
        return pl.BlockSpec(shape, lambda b: (0,) * len(shape))

    in_specs = [pl.BlockSpec((1, Tp, Cp), lambda b: (b, 0, 0))]
    in_specs += [rep_spec(a.shape) for a in inputs[1:]]

    kernel = functools.partial(rwkv_layer_kernel, c_real=C, cp=Cp, hdp=Hdp)

    out_p = pl.pallas_call(
        kernel,
        out_shape=jax.ShapeDtypeStruct((B, Tp, Cp), jnp.float32),
        grid_spec=pltpu.PrefetchScalarGridSpec(
            num_scalar_prefetch=0,
            grid=(B,),
            in_specs=in_specs,
            out_specs=pl.BlockSpec((1, Tp, Cp), lambda b: (b, 0, 0)),
            scratch_shapes=[
                pltpu.VMEM((Tp, Cp), jnp.float32),   # k
                pltpu.VMEM((Tp, Cp), jnp.float32),   # v
                pltpu.VMEM((Tp, Cp), jnp.float32),   # wkv
            ],
        ),
        compiler_params=pltpu.CompilerParams(
            # batch elements are independent -> shard across TensorCores
            dimension_semantics=("parallel",),
        ),
    )(*inputs)

    out = out_p[:, :T, :C]
    return jnp.transpose(out, (0, 2, 1)).reshape(B, C, H, W)


# ------------------- pure-JAX reference for verification -------------------
def _ln_ref(x, g, b):
    mu = x.mean(-1, keepdims=True)
    var = ((x - mu) ** 2).mean(-1, keepdims=True)
    return (x - mu) / jnp.sqrt(var + EPS) * g + b


def _wkv_ref(k, v, w, u):
    B, T, C = k.shape

    def step(carry, kv_t):
        aa, bb, pp = carry
        kt, vt = kv_t
        ww = u[0] + kt
        p = jnp.maximum(pp, ww)
        e1 = jnp.exp(pp - p)
        e2 = jnp.exp(ww - p)
        out = (e1 * aa + e2 * vt) / (e1 * bb + e2)
        ww2 = pp + w[0]
        p2 = jnp.maximum(ww2, kt)
        e1b = jnp.exp(ww2 - p2)
        e2b = jnp.exp(kt - p2)
        return (e1b * aa + e2b * vt, e1b * bb + e2b, p2), out

    init = (jnp.zeros((B, C)), jnp.zeros((B, C)), jnp.full((B, C), -1e38))
    _, outs = jax.lax.scan(step, init,
                           (jnp.transpose(k, (1, 0, 2)), jnp.transpose(v, (1, 0, 2))))
    return jnp.transpose(outs, (1, 0, 2))


def reference_forward(x_nchw, p):
    B, C, H, W = x_nchw.shape
    T = H * W
    x = jnp.transpose(x_nchw.reshape(B, C, T), (0, 2, 1)).astype(jnp.float32)

    xn = _ln_ref(x, p["ln0_g"], p["ln0_b"])

    xa = _ln_ref(xn, p["ln1_g"], p["ln1_b"])
    xx = jnp.concatenate([jnp.zeros_like(xa[:, :1]), xa[:, :-1]], axis=1)
    xk = xa * p["amk"] + xx * (1.0 - p["amk"])
    xv = xa * p["amv"] + xx * (1.0 - p["amv"])
    xr = xa * p["amr"] + xx * (1.0 - p["amr"])
    k = jnp.dot(xk, p["awk"])
    v = jnp.dot(xv, p["awv"])
    r = jax.nn.sigmoid(jnp.dot(xr, p["awr"]))
    wkv = _wkv_ref(k, v, -jnp.exp(p["adecay"]), p["afirst"])
    x1 = xn + jnp.dot(r * wkv, p["awo"])

    xb = _ln_ref(x1, p["ln2_g"], p["ln2_b"])
    xx2 = jnp.concatenate([jnp.zeros_like(xb[:, :1]), xb[:, :-1]], axis=1)
    xk2 = xb * p["fmk"] + xx2 * (1.0 - p["fmk"])
    xr2 = xb * p["fmr"] + xx2 * (1.0 - p["fmr"])
    kk = jnp.square(jnp.maximum(jnp.dot(xk2, p["fwk"]), 0.0))
    ffn = jax.nn.sigmoid(jnp.dot(xr2, p["fwr"])) * jnp.dot(kk, p["fwv"])
    x2 = x1 + ffn

    out = x2 + x
    return jnp.transpose(out, (0, 2, 1)).reshape(B, C, H, W)


def init_params(key, C, hidden):
    ks = jax.random.split(key, 12)
    p = {}
    p["ln0_g"] = jnp.ones((1, C), jnp.float32)
    p["ln0_b"] = jnp.zeros((1, C), jnp.float32)
    p["ln1_g"] = jnp.ones((1, C), jnp.float32)
    p["ln1_b"] = jnp.zeros((1, C), jnp.float32)
    p["ln2_g"] = jnp.ones((1, C), jnp.float32)
    p["ln2_b"] = jnp.zeros((1, C), jnp.float32)
    p["amk"] = jax.random.uniform(ks[0], (1, C), jnp.float32)
    p["amv"] = jax.random.uniform(ks[1], (1, C), jnp.float32)
    p["amr"] = jax.random.uniform(ks[2], (1, C), jnp.float32)
    p["adecay"] = -1.0 + 0.5 * jax.random.normal(ks[3], (1, C), jnp.float32)
    p["afirst"] = 0.3 * jax.random.normal(ks[4], (1, C), jnp.float32)
    p["awk"] = 0.02 * jax.random.normal(ks[5], (C, C), jnp.float32)
    p["awv"] = 0.02 * jax.random.normal(ks[6], (C, C), jnp.float32)
    p["awr"] = 0.02 * jax.random.normal(ks[7], (C, C), jnp.float32)
    p["awo"] = 0.02 * jax.random.normal(ks[8], (C, C), jnp.float32)
    p["fmk"] = jax.random.uniform(ks[9], (1, C), jnp.float32)
    p["fmr"] = jax.random.uniform(ks[10], (1, C), jnp.float32)
    kf = jax.random.split(ks[11], 3)
    p["fwk"] = 0.02 * jax.random.normal(kf[0], (C, hidden), jnp.float32)
    p["fwv"] = 0.02 * jax.random.normal(kf[1], (hidden, C), jnp.float32)
    p["fwr"] = 0.02 * jax.random.normal(kf[2], (C, C), jnp.float32)
    return p


if __name__ == "__main__":
    B, C, H, W = 2, 32, 8, 8          # n_embd = 32, T = 64 tokens
    HIDDEN = 4 * C

    key = jax.random.PRNGKey(0)
    k_x, k_p = jax.random.split(key)
    x = jax.random.normal(k_x, (B, C, H, W), jnp.float32)
    params = init_params(k_p, C, HIDDEN)

    out = rwkv_layer_forward(x, params)
    out = jax.block_until_ready(out)

    ref = jax.block_until_ready(reference_forward(x, params))
    assert out.shape == (B, C, H, W)
    assert jnp.allclose(out, ref, atol=1e-4, rtol=1e-3), (
        float(jnp.max(jnp.abs(out - ref))))

    print("KERNEL_OK")
</pallas_src>

<mosaic_0001>
module attributes {stable_mosaic.version = 11 : i64} {
  func.func @rwkv_layer_kernel(%arg0: i32, %arg1: memref<1x64x128xf32, #tpu.memory_space<vmem>>, %arg2: memref<1x128xf32, #tpu.memory_space<vmem>>, %arg3: memref<1x128xf32, #tpu.memory_space<vmem>>, %arg4: memref<1x128xf32, #tpu.memory_space<vmem>>, %arg5: memref<1x128xf32, #tpu.memory_space<vmem>>, %arg6: memref<1x128xf32, #tpu.memory_space<vmem>>, %arg7: memref<1x128xf32, #tpu.memory_space<vmem>>, %arg8: memref<256x384xf32, #tpu.memory_space<vmem>>, %arg9: memref<1x128xf32, #tpu.memory_space<vmem>>, %arg10: memref<1x128xf32, #tpu.memory_space<vmem>>, %arg11: memref<128x128xf32, #tpu.memory_space<vmem>>, %arg12: memref<256x256xf32, #tpu.memory_space<vmem>>, %arg13: memref<128x128xf32, #tpu.memory_space<vmem>>, %arg14: memref<1x64x128xf32, #tpu.memory_space<vmem>>, %arg15: memref<64x128xf32, #tpu.memory_space<vmem>>, %arg16: memref<64x128xf32, #tpu.memory_space<vmem>>, %arg17: memref<64x128xf32, #tpu.memory_space<vmem>>) attributes {dimension_semantics = [#tpu.dimension_semantics<parallel>], iteration_bounds = array<i64: 2>, scalar_prefetch = 0 : i64, scratch_operands = 3 : i64, tpu.core_type = #tpu.core_type<tc>, window_params = [{transform_indices = @transform_0, window_bounds = array<i64: 1, 64, 128>}, {pipeline_mode = #tpu.pipeline_mode<synchronous>, transform_indices = @transform_1, window_bounds = array<i64: 1, 128>}, {pipeline_mode = #tpu.pipeline_mode<synchronous>, transform_indices = @transform_2, window_bounds = array<i64: 1, 128>}, {pipeline_mode = #tpu.pipeline_mode<synchronous>, transform_indices = @transform_3, window_bounds = array<i64: 1, 128>}, {pipeline_mode = #tpu.pipeline_mode<synchronous>, transform_indices = @transform_4, window_bounds = array<i64: 1, 128>}, {pipeline_mode = #tpu.pipeline_mode<synchronous>, transform_indices = @transform_5, window_bounds = array<i64: 1, 128>}, {pipeline_mode = #tpu.pipeline_mode<synchronous>, transform_indices = @transform_6, window_bounds = array<i64: 1, 128>}, {pipeline_mode = #tpu.pipeline_mode<synchronous>, transform_indices = @transform_7, window_bounds = array<i64: 256, 384>}, {pipeline_mode = #tpu.pipeline_mode<synchronous>, transform_indices = @transform_8, window_bounds = array<i64: 1, 128>}, {pipeline_mode = #tpu.pipeline_mode<synchronous>, transform_indices = @transform_9, window_bounds = array<i64: 1, 128>}, {pipeline_mode = #tpu.pipeline_mode<synchronous>, transform_indices = @transform_10, window_bounds = array<i64: 128, 128>}, {pipeline_mode = #tpu.pipeline_mode<synchronous>, transform_indices = @transform_11, window_bounds = array<i64: 256, 256>}, {pipeline_mode = #tpu.pipeline_mode<synchronous>, transform_indices = @transform_12, window_bounds = array<i64: 128, 128>}, {transform_indices = @transform_13, window_bounds = array<i64: 1, 64, 128>}]} {
    %0 = tpu.iota {dimensions = array<i32: 1>} : vector<1x128xi32>
    %c32_i32 = arith.constant 32 : i32
    %1 = vector.broadcast %c32_i32 : i32 to vector<1x128xi32>
    %2 = arith.cmpi slt, %0, %1 : vector<1x128xi32>
    %3 = arith.extui %2 : vector<1x128xi1> to vector<1x128xi32>
    %4 = arith.sitofp %3 : vector<1x128xi32> to vector<1x128xf32>
    %5 = tpu.iota {dimensions = array<i32: 0>} : vector<64x128xi32>
    %c0_i32 = arith.constant 0 : i32
    %6 = vector.broadcast %c0_i32 : i32 to vector<64x128xi32>
    %7 = arith.cmpi eq, %5, %6 : vector<64x128xi32>
    %c0 = arith.constant 0 : index
    %c0_0 = arith.constant 0 : index
    %c0_1 = arith.constant 0 : index
    %8 = vector.load %arg1[%c0, %c0_0, %c0_1] : memref<1x64x128xf32, #tpu.memory_space<vmem>>, vector<1x64x128xf32>
    %9 = vector.shape_cast %8 : vector<1x64x128xf32> to vector<64x128xf32>
    %c0_2 = arith.constant 0 : index
    %c0_3 = arith.constant 0 : index
    %10 = vector.load %arg2[%c0_2, %c0_3] : memref<1x128xf32, #tpu.memory_space<vmem>>, vector<1x128xf32>
    %c0_4 = arith.constant 0 : index
    %c0_5 = arith.constant 0 : index
    %11 = vector.load %arg3[%c0_4, %c0_5] : memref<1x128xf32, #tpu.memory_space<vmem>>, vector<1x128xf32>
    %cst = arith.constant dense<0.000000e+00> : vector<64xf32>
    %12 = vector.multi_reduction <add>, %9, %cst [1] : vector<64x128xf32> to vector<64xf32>
    %13 = vector.shape_cast %12 : vector<64xf32> to vector<64x1xf32>
    %cst_6 = arith.constant 3.125000e-02 : f32
    %14 = vector.broadcast %cst_6 : f32 to vector<64x1xf32>
    %15 = arith.mulf %13, %14 : vector<64x1xf32>
    %16 = vector.broadcast %15 : vector<64x1xf32> to vector<64x128xf32>
    %17 = arith.subf %9, %16 : vector<64x128xf32>
    %18 = vector.broadcast %4 : vector<1x128xf32> to vector<64x128xf32>
    %19 = arith.mulf %17, %18 : vector<64x128xf32>
    %20 = arith.mulf %19, %19 : vector<64x128xf32>
    %cst_7 = arith.constant dense<0.000000e+00> : vector<64xf32>
    %21 = vector.multi_reduction <add>, %20, %cst_7 [1] : vector<64x128xf32> to vector<64xf32>
    %22 = vector.shape_cast %21 : vector<64xf32> to vector<64x1xf32>
    %cst_8 = arith.constant 3.125000e-02 : f32
    %23 = vector.broadcast %cst_8 : f32 to vector<64x1xf32>
    %24 = arith.mulf %22, %23 : vector<64x1xf32>
    %cst_9 = arith.constant 9.99999974E-6 : f32
    %25 = vector.broadcast %cst_9 : f32 to vector<64x1xf32>
    %26 = arith.addf %24, %25 : vector<64x1xf32>
    %27 = math.rsqrt %26 : vector<64x1xf32>
    %28 = vector.broadcast %27 : vector<64x1xf32> to vector<64x128xf32>
    %29 = arith.mulf %19, %28 : vector<64x128xf32>
    %30 = vector.broadcast %10 : vector<1x128xf32> to vector<64x128xf32>
    %31 = arith.mulf %29, %30 : vector<64x128xf32>
    %32 = vector.broadcast %11 : vector<1x128xf32> to vector<64x128xf32>
    %33 = arith.addf %31, %32 : vector<64x128xf32>
    %c0_10 = arith.constant 0 : index
    %c0_11 = arith.constant 0 : index
    %34 = vector.load %arg4[%c0_10, %c0_11] : memref<1x128xf32, #tpu.memory_space<vmem>>, vector<1x128xf32>
    %c0_12 = arith.constant 0 : index
    %c0_13 = arith.constant 0 : index
    %35 = vector.load %arg5[%c0_12, %c0_13] : memref<1x128xf32, #tpu.memory_space<vmem>>, vector<1x128xf32>
    %cst_14 = arith.constant dense<0.000000e+00> : vector<64xf32>
    %36 = vector.multi_reduction <add>, %33, %cst_14 [1] : vector<64x128xf32> to vector<64xf32>
    %37 = vector.shape_cast %36 : vector<64xf32> to vector<64x1xf32>
    %cst_15 = arith.constant 3.125000e-02 : f32
    %38 = vector.broadcast %cst_15 : f32 to vector<64x1xf32>
    %39 = arith.mulf %37, %38 : vector<64x1xf32>
    %40 = vector.broadcast %39 : vector<64x1xf32> to vector<64x128xf32>
    %41 = arith.subf %33, %40 : vector<64x128xf32>
    %42 = vector.broadcast %4 : vector<1x128xf32> to vector<64x128xf32>
    %43 = arith.mulf %41, %42 : vector<64x128xf32>
    %44 = arith.mulf %43, %43 : vector<64x128xf32>
    %cst_16 = arith.constant dense<0.000000e+00> : vector<64xf32>
    %45 = vector.multi_reduction <add>, %44, %cst_16 [1] : vector<64x128xf32> to vector<64xf32>
    %46 = vector.shape_cast %45 : vector<64xf32> to vector<64x1xf32>
    %cst_17 = arith.constant 3.125000e-02 : f32
    %47 = vector.broadcast %cst_17 : f32 to vector<64x1xf32>
    %48 = arith.mulf %46, %47 : vector<64x1xf32>
    %cst_18 = arith.constant 9.99999974E-6 : f32
    %49 = vector.broadcast %cst_18 : f32 to vector<64x1xf32>
    %50 = arith.addf %48, %49 : vector<64x1xf32>
    %51 = math.rsqrt %50 : vector<64x1xf32>
    %52 = vector.broadcast %51 : vector<64x1xf32> to vector<64x128xf32>
    %53 = arith.mulf %43, %52 : vector<64x128xf32>
    %54 = vector.broadcast %34 : vector<1x128xf32> to vector<64x128xf32>
    %55 = arith.mulf %53, %54 : vector<64x128xf32>
    %56 = vector.broadcast %35 : vector<1x128xf32> to vector<64x128xf32>
    %57 = arith.addf %55, %56 : vector<64x128xf32>
    %c1_i32 = arith.constant 1 : i32
    %58 = tpu.dynamic_rotate %57 by %c1_i32 dim 0 : vector<64x128xf32>, i32 -> vector<64x128xf32>
    %cst_19 = arith.constant 0.000000e+00 : f32
    %59 = vector.broadcast %cst_19 : f32 to vector<64x128xf32>
    %60 = arith.select %7, %59, %58 : vector<64x128xi1>, vector<64x128xf32>
    %61 = tpu.concatenate %57, %60 in 1 : vector<64x128xf32>, vector<64x128xf32> -> vector<64x256xf32>
    %c0_20 = arith.constant 0 : index
    %c0_21 = arith.constant 0 : index
    %62 = vector.load %arg8[%c0_20, %c0_21] : memref<256x384xf32, #tpu.memory_space<vmem>>, vector<256x384xf32>
    %cst_22 = arith.constant dense<0.000000e+00> : vector<64x384xf32>
    %63 = tpu.matmul %61, %62, %cst_22 {dimension_numbers = #tpu.dot_dimension_numbers<[1], [0], [0], [1], [0, 0, 1, 1], [], []>} : vector<64x256xf32>, vector<256x384xf32>, vector<64x384xf32> -> vector<64x384xf32>
    %64 = vector.extract_strided_slice %63 {offsets = [0, 0], sizes = [64, 128], strides = [1, 1]} : vector<64x384xf32> to vector<64x128xf32>
    %c0_23 = arith.constant 0 : index
    %c0_24 = arith.constant 0 : index
    %65 = vector.load %arg15[%c0_23, %c0_24] : memref<64x128xf32, #tpu.memory_space<vmem>>, vector<64x128xf32>
    tpu.vector_store %arg15[%c0_23, %c0_24], %64 {strides = array<i32>} : memref<64x128xf32, #tpu.memory_space<vmem>>, vector<64x128xf32>,
    %66 = vector.extract_strided_slice %63 {offsets = [0, 128], sizes = [64, 128], strides = [1, 1]} : vector<64x384xf32> to vector<64x128xf32>
    %c0_25 = arith.constant 0 : index
    %c0_26 = arith.constant 0 : index
    %67 = vector.load %arg16[%c0_25, %c0_26] : memref<64x128xf32, #tpu.memory_space<vmem>>, vector<64x128xf32>
    tpu.vector_store %arg16[%c0_25, %c0_26], %66 {strides = array<i32>} : memref<64x128xf32, #tpu.memory_space<vmem>>, vector<64x128xf32>,
    %68 = vector.extract_strided_slice %63 {offsets = [0, 256], sizes = [64, 128], strides = [1, 1]} : vector<64x384xf32> to vector<64x128xf32>
    %69 = arith.negf %68 : vector<64x128xf32>
    %70 = math.exp %69 : vector<64x128xf32>
    %cst_27 = arith.constant 1.000000e+00 : f32
    %71 = vector.broadcast %cst_27 : f32 to vector<64x128xf32>
    %72 = arith.addf %71, %70 : vector<64x128xf32>
    %73 = arith.divf %71, %72 : vector<64x128xf32>
    %c0_28 = arith.constant 0 : index
    %c0_29 = arith.constant 0 : index
    %74 = vector.load %arg9[%c0_28, %c0_29] : memref<1x128xf32, #tpu.memory_space<vmem>>, vector<1x128xf32>
    %75 = math.exp %74 : vector<1x128xf32>
    %cst_30 = arith.constant 0.000000e+00 : f32
    %76 = vector.broadcast %cst_30 : f32 to vector<1x128xf32>
    %77 = arith.subf %76, %75 : vector<1x128xf32>
    %c0_31 = arith.constant 0 : index
    %c0_32 = arith.constant 0 : index
    %78 = vector.load %arg10[%c0_31, %c0_32] : memref<1x128xf32, #tpu.memory_space<vmem>>, vector<1x128xf32>
    %cst_33 = arith.constant 0.000000e+00 : f32
    %79 = vector.broadcast %cst_33 : f32 to vector<1x128xf32>
    %cst_34 = arith.constant 0.000000e+00 : f32
    %80 = vector.broadcast %cst_34 : f32 to vector<1x128xf32>
    %cst_35 = arith.constant -9.99999968E+37 : f32
    %81 = vector.broadcast %cst_35 : f32 to vector<1x128xf32>
    %c0_i32_36 = arith.constant 0 : i32
    %c8_i32 = arith.constant 8 : i32
    %82 = arith.addi %c0_i32_36, %c8_i32 : i32
    %c1_i32_37 = arith.constant 1 : i32
    %83:3 = scf.for %arg18 = %c0_i32_36 to %82 step %c1_i32_37 iter_args(%arg19 = %79, %arg20 = %80, %arg21 = %81) -> (vector<1x128xf32>, vector<1x128xf32>, vector<1x128xf32>)  : i32 {
      %c8_i32_66 = arith.constant 8 : i32
      %137 = arith.muli %arg18, %c8_i32_66 : i32
      %138 = tpu.assume_multiple %137, 8 : i32
      %139 = arith.index_cast %138 : i32 to index
      %c0_67 = arith.constant 0 : index
      %140 = vector.load %arg15[%139, %c0_67] : memref<64x128xf32, #tpu.memory_space<vmem>>, vector<8x128xf32>
      %141 = arith.index_cast %138 : i32 to index
      %c0_68 = arith.constant 0 : index
      %142 = vector.load %arg16[%141, %c0_68] : memref<64x128xf32, #tpu.memory_space<vmem>>, vector<8x128xf32>
      %143 = vector.extract_strided_slice %140 {offsets = [0, 0], sizes = [1, 128], strides = [1, 1]} : vector<8x128xf32> to vector<1x128xf32>
      %144 = vector.extract_strided_slice %142 {offsets = [0, 0], sizes = [1, 128], strides = [1, 1]} : vector<8x128xf32> to vector<1x128xf32>
      %145 = arith.addf %78, %143 : vector<1x128xf32>
      %146 = arith.maximumf %arg21, %145 : vector<1x128xf32>
      %147 = arith.subf %arg21, %146 : vector<1x128xf32>
      %148 = math.exp %147 : vector<1x128xf32>
      %149 = arith.subf %145, %146 : vector<1x128xf32>
      %150 = math.exp %149 : vector<1x128xf32>
      %151 = arith.mulf %148, %arg19 : vector<1x128xf32>
      %152 = arith.mulf %150, %144 : vector<1x128xf32>
      %153 = arith.addf %151, %152 : vector<1x128xf32>
      %154 = arith.mulf %148, %arg20 : vector<1x128xf32>
      %155 = arith.addf %154, %150 : vector<1x128xf32>
      %156 = arith.divf %153, %155 : vector<1x128xf32>
      %157 = arith.addf %arg21, %77 : vector<1x128xf32>
      %158 = arith.maximumf %157, %143 : vector<1x128xf32>
      %159 = arith.subf %157, %158 : vector<1x128xf32>
      %160 = math.exp %159 : vector<1x128xf32>
      %161 = arith.subf %143, %158 : vector<1x128xf32>
      %162 = math.exp %161 : vector<1x128xf32>
      %163 = arith.mulf %160, %arg19 : vector<1x128xf32>
      %164 = arith.mulf %162, %144 : vector<1x128xf32>
      %165 = arith.addf %163, %164 : vector<1x128xf32>
      %166 = arith.mulf %160, %arg20 : vector<1x128xf32>
      %167 = arith.addf %166, %162 : vector<1x128xf32>
      %168 = vector.extract_strided_slice %140 {offsets = [1, 0], sizes = [1, 128], strides = [1, 1]} : vector<8x128xf32> to vector<1x128xf32>
      %169 = vector.extract_strided_slice %142 {offsets = [1, 0], sizes = [1, 128], strides = [1, 1]} : vector<8x128xf32> to vector<1x128xf32>
      %170 = arith.addf %78, %168 : vector<1x128xf32>
      %171 = arith.maximumf %158, %170 : vector<1x128xf32>
      %172 = arith.subf %158, %171 : vector<1x128xf32>
      %173 = math.exp %172 : vector<1x128xf32>
      %174 = arith.subf %170, %171 : vector<1x128xf32>
      %175 = math.exp %174 : vector<1x128xf32>
      %176 = arith.mulf %173, %165 : vector<1x128xf32>
      %177 = arith.mulf %175, %169 : vector<1x128xf32>
      %178 = arith.addf %176, %177 : vector<1x128xf32>
      %179 = arith.mulf %173, %167 : vector<1x128xf32>
      %180 = arith.addf %179, %175 : vector<1x128xf32>
      %181 = arith.divf %178, %180 : vector<1x128xf32>
      %182 = arith.addf %158, %77 : vector<1x128xf32>
      %183 = arith.maximumf %182, %168 : vector<1x128xf32>
      %184 = arith.subf %182, %183 : vector<1x128xf32>
      %185 = math.exp %184 : vector<1x128xf32>
      %186 = arith.subf %168, %183 : vector<1x128xf32>
      %187 = math.exp %186 : vector<1x128xf32>
      %188 = arith.mulf %185, %165 : vector<1x128xf32>
      %189 = arith.mulf %187, %169 : vector<1x128xf32>
      %190 = arith.addf %188, %189 : vector<1x128xf32>
      %191 = arith.mulf %185, %167 : vector<1x128xf32>
      %192 = arith.addf %191, %187 : vector<1x128xf32>
      %193 = vector.extract_strided_slice %140 {offsets = [2, 0], sizes = [1, 128], strides = [1, 1]} : vector<8x128xf32> to vector<1x128xf32>
      %194 = vector.extract_strided_slice %142 {offsets = [2, 0], sizes = [1, 128], strides = [1, 1]} : vector<8x128xf32> to vector<1x128xf32>
      %195 = arith.addf %78, %193 : vector<1x128xf32>
      %196 = arith.maximumf %183, %195 : vector<1x128xf32>
      %197 = arith.subf %183, %196 : vector<1x128xf32>
      %198 = math.exp %197 : vector<1x128xf32>
      %199 = arith.subf %195, %196 : vector<1x128xf32>
      %200 = math.exp %199 : vector<1x128xf32>
      %201 = arith.mulf %198, %190 : vector<1x128xf32>
      %202 = arith.mulf %200, %194 : vector<1x128xf32>
      %203 = arith.addf %201, %202 : vector<1x128xf32>
      %204 = arith.mulf %198, %192 : vector<1x128xf32>
      %205 = arith.addf %204, %200 : vector<1x128xf32>
      %206 = arith.divf %203, %205 : vector<1x128xf32>
      %207 = arith.addf %183, %77 : vector<1x128xf32>
      %208 = arith.maximumf %207, %193 : vector<1x128xf32>
      %209 = arith.subf %207, %208 : vector<1x128xf32>
      %210 = math.exp %209 : vector<1x128xf32>
      %211 = arith.subf %193, %208 : vector<1x128xf32>
      %212 = math.exp %211 : vector<1x128xf32>
      %213 = arith.mulf %210, %190 : vector<1x128xf32>
      %214 = arith.mulf %212, %194 : vector<1x128xf32>
      %215 = arith.addf %213, %214 : vector<1x128xf32>
      %216 = arith.mulf %210, %192 : vector<1x128xf32>
      %217 = arith.addf %216, %212 : vector<1x128xf32>
      %218 = vector.extract_strided_slice %140 {offsets = [3, 0], sizes = [1, 128], strides = [1, 1]} : vector<8x128xf32> to vector<1x128xf32>
      %219 = vector.extract_strided_slice %142 {offsets = [3, 0], sizes = [1, 128], strides = [1, 1]} : vector<8x128xf32> to vector<1x128xf32>
      %220 = arith.addf %78, %218 : vector<1x128xf32>
      %221 = arith.maximumf %208, %220 : vector<1x128xf32>
      %222 = arith.subf %208, %221 : vector<1x128xf32>
      %223 = math.exp %222 : vector<1x128xf32>
      %224 = arith.subf %220, %221 : vector<1x128xf32>
      %225 = math.exp %224 : vector<1x128xf32>
      %226 = arith.mulf %223, %215 : vector<1x128xf32>
      %227 = arith.mulf %225, %219 : vector<1x128xf32>
      %228 = arith.addf %226, %227 : vector<1x128xf32>
      %229 = arith.mulf %223, %217 : vector<1x128xf32>
      %230 = arith.addf %229, %225 : vector<1x128xf32>
      %231 = arith.divf %228, %230 : vector<1x128xf32>
      %232 = arith.addf %208, %77 : vector<1x128xf32>
      %233 = arith.maximumf %232, %218 : vector<1x128xf32>
      %234 = arith.subf %232, %233 : vector<1x128xf32>
      %235 = math.exp %234 : vector<1x128xf32>
      %236 = arith.subf %218, %233 : vector<1x128xf32>
      %237 = math.exp %236 : vector<1x128xf32>
      %238 = arith.mulf %235, %215 : vector<1x128xf32>
      %239 = arith.mulf %237, %219 : vector<1x128xf32>
      %240 = arith.addf %238, %239 : vector<1x128xf32>
      %241 = arith.mulf %235, %217 : vector<1x128xf32>
      %242 = arith.addf %241, %237 : vector<1x128xf32>
      %243 = vector.extract_strided_slice %140 {offsets = [4, 0], sizes = [1, 128], strides = [1, 1]} : vector<8x128xf32> to vector<1x128xf32>
      %244 = vector.extract_strided_slice %142 {offsets = [4, 0], sizes = [1, 128], strides = [1, 1]} : vector<8x128xf32> to vector<1x128xf32>
      %245 = arith.addf %78, %243 : vector<1x128xf32>
      %246 = arith.maximumf %233, %245 : vector<1x128xf32>
      %247 = arith.subf %233, %246 : vector<1x128xf32>
      %248 = math.exp %247 : vector<1x128xf32>
      %249 = arith.subf %245, %246 : vector<1x128xf32>
      %250 = math.exp %249 : vector<1x128xf32>
      %251 = arith.mulf %248, %240 : vector<1x128xf32>
      %252 = arith.mulf %250, %244 : vector<1x128xf32>
      %253 = arith.addf %251, %252 : vector<1x128xf32>
      %254 = arith.mulf %248, %242 : vector<1x128xf32>
      %255 = arith.addf %254, %250 : vector<1x128xf32>
      %256 = arith.divf %253, %255 : vector<1x128xf32>
      %257 = arith.addf %233, %77 : vector<1x128xf32>
      %258 = arith.maximumf %257, %243 : vector<1x128xf32>
      %259 = arith.subf %257, %258 : vector<1x128xf32>
      %260 = math.exp %259 : vector<1x128xf32>
      %261 = arith.subf %243, %258 : vector<1x128xf32>
      %262 = math.exp %261 : vector<1x128xf32>
      %263 = arith.mulf %260, %240 : vector<1x128xf32>
      %264 = arith.mulf %262, %244 : vector<1x128xf32>
      %265 = arith.addf %263, %264 : vector<1x128xf32>
      %266 = arith.mulf %260, %242 : vector<1x128xf32>
      %267 = arith.addf %266, %262 : vector<1x128xf32>
      %268 = vector.extract_strided_slice %140 {offsets = [5, 0], sizes = [1, 128], strides = [1, 1]} : vector<8x128xf32> to vector<1x128xf32>
      %269 = vector.extract_strided_slice %142 {offsets = [5, 0], sizes = [1, 128], strides = [1, 1]} : vector<8x128xf32> to vector<1x128xf32>
      %270 = arith.addf %78, %268 : vector<1x128xf32>
      %271 = arith.maximumf %258, %270 : vector<1x128xf32>
      %272 = arith.subf %258, %271 : vector<1x128xf32>
      %273 = math.exp %272 : vector<1x128xf32>
      %274 = arith.subf %270, %271 : vector<1x128xf32>
      %275 = math.exp %274 : vector<1x128xf32>
      %276 = arith.mulf %273, %265 : vector<1x128xf32>
      %277 = arith.mulf %275, %269 : vector<1x128xf32>
      %278 = arith.addf %276, %277 : vector<1x128xf32>
      %279 = arith.mulf %273, %267 : vector<1x128xf32>
      %280 = arith.addf %279, %275 : vector<1x128xf32>
      %281 = arith.divf %278, %280 : vector<1x128xf32>
      %282 = arith.addf %258, %77 : vector<1x128xf32>
      %283 = arith.maximumf %282, %268 : vector<1x128xf32>
      %284 = arith.subf %282, %283 : vector<1x128xf32>
      %285 = math.exp %284 : vector<1x128xf32>
      %286 = arith.subf %268, %283 : vector<1x128xf32>
      %287 = math.exp %286 : vector<1x128xf32>
      %288 = arith.mulf %285, %265 : vector<1x128xf32>
      %289 = arith.mulf %287, %269 : vector<1x128xf32>
      %290 = arith.addf %288, %289 : vector<1x128xf32>
      %291 = arith.mulf %285, %267 : vector<1x128xf32>
      %292 = arith.addf %291, %287 : vector<1x128xf32>
      %293 = vector.extract_strided_slice %140 {offsets = [6, 0], sizes = [1, 128], strides = [1, 1]} : vector<8x128xf32> to vector<1x128xf32>
      %294 = vector.extract_strided_slice %142 {offsets = [6, 0], sizes = [1, 128], strides = [1, 1]} : vector<8x128xf32> to vector<1x128xf32>
      %295 = arith.addf %78, %293 : vector<1x128xf32>
      %296 = arith.maximumf %283, %295 : vector<1x128xf32>
      %297 = arith.subf %283, %296 : vector<1x128xf32>
      %298 = math.exp %297 : vector<1x128xf32>
      %299 = arith.subf %295, %296 : vector<1x128xf32>
      %300 = math.exp %299 : vector<1x128xf32>
      %301 = arith.mulf %298, %290 : vector<1x128xf32>
      %302 = arith.mulf %300, %294 : vector<1x128xf32>
      %303 = arith.addf %301, %302 : vector<1x128xf32>
      %304 = arith.mulf %298, %292 : vector<1x128xf32>
      %305 = arith.addf %304, %300 : vector<1x128xf32>
      %306 = arith.divf %303, %305 : vector<1x128xf32>
      %307 = arith.addf %283, %77 : vector<1x128xf32>
      %308 = arith.maximumf %307, %293 : vector<1x128xf32>
      %309 = arith.subf %307, %308 : vector<1x128xf32>
      %310 = math.exp %309 : vector<1x128xf32>
      %311 = arith.subf %293, %308 : vector<1x128xf32>
      %312 = math.exp %311 : vector<1x128xf32>
      %313 = arith.mulf %310, %290 : vector<1x128xf32>
      %314 = arith.mulf %312, %294 : vector<1x128xf32>
      %315 = arith.addf %313, %314 : vector<1x128xf32>
      %316 = arith.mulf %310, %292 : vector<1x128xf32>
      %317 = arith.addf %316, %312 : vector<1x128xf32>
      %318 = vector.extract_strided_slice %140 {offsets = [7, 0], sizes = [1, 128], strides = [1, 1]} : vector<8x128xf32> to vector<1x128xf32>
      %319 = vector.extract_strided_slice %142 {offsets = [7, 0], sizes = [1, 128], strides = [1, 1]} : vector<8x128xf32> to vector<1x128xf32>
      %320 = arith.addf %78, %318 : vector<1x128xf32>
      %321 = arith.maximumf %308, %320 : vector<1x128xf32>
      %322 = arith.subf %308, %321 : vector<1x128xf32>
      %323 = math.exp %322 : vector<1x128xf32>
      %324 = arith.subf %320, %321 : vector<1x128xf32>
      %325 = math.exp %324 : vector<1x128xf32>
      %326 = arith.mulf %323, %315 : vector<1x128xf32>
      %327 = arith.mulf %325, %319 : vector<1x128xf32>
      %328 = arith.addf %326, %327 : vector<1x128xf32>
      %329 = arith.mulf %323, %317 : vector<1x128xf32>
      %330 = arith.addf %329, %325 : vector<1x128xf32>
      %331 = arith.divf %328, %330 : vector<1x128xf32>
      %332 = arith.addf %308, %77 : vector<1x128xf32>
      %333 = arith.maximumf %332, %318 : vector<1x128xf32>
      %334 = arith.subf %332, %333 : vector<1x128xf32>
      %335 = math.exp %334 : vector<1x128xf32>
      %336 = arith.subf %318, %333 : vector<1x128xf32>
      %337 = math.exp %336 : vector<1x128xf32>
      %338 = arith.mulf %335, %315 : vector<1x128xf32>
      %339 = arith.mulf %337, %319 : vector<1x128xf32>
      %340 = arith.addf %338, %339 : vector<1x128xf32>
      %341 = arith.mulf %335, %317 : vector<1x128xf32>
      %342 = arith.addf %341, %337 : vector<1x128xf32>
      %343 = tpu.concatenate %156, %181, %206, %231, %256, %281, %306, %331 in 0 : vector<1x128xf32>, vector<1x128xf32>, vector<1x128xf32>, vector<1x128xf32>, vector<1x128xf32>, vector<1x128xf32>, vector<1x128xf32>, vector<1x128xf32> -> vector<8x128xf32>
      %344 = arith.index_cast %138 : i32 to index
      %c0_69 = arith.constant 0 : index
      %345 = vector.load %arg17[%344, %c0_69] : memref<64x128xf32, #tpu.memory_space<vmem>>, vector<8x128xf32>
      tpu.vector_store %arg17[%344, %c0_69], %343 {strides = array<i32>} : memref<64x128xf32, #tpu.memory_space<vmem>>, vector<8x128xf32>,
      scf.yield %340, %342, %333 : vector<1x128xf32>, vector<1x128xf32>, vector<1x128xf32>
    }
    %c8_i32_38 = arith.constant 8 : i32
    %c0_39 = arith.constant 0 : index
    %c0_40 = arith.constant 0 : index
    %84 = vector.load %arg17[%c0_39, %c0_40] : memref<64x128xf32, #tpu.memory_space<vmem>>, vector<64x128xf32>
    %85 = arith.mulf %73, %84 : vector<64x128xf32>
    %c0_41 = arith.constant 0 : index
    %c0_42 = arith.constant 0 : index
    %86 = vector.load %arg11[%c0_41, %c0_42] : memref<128x128xf32, #tpu.memory_space<vmem>>, vector<128x128xf32>
    %cst_43 = arith.constant dense<0.000000e+00> : vector<64x128xf32>
    %87 = tpu.matmul %85, %86, %cst_43 {dimension_numbers = #tpu.dot_dimension_numbers<[1], [0], [0], [1], [0, 0, 1, 1], [], []>} : vector<64x128xf32>, vector<128x128xf32>, vector<64x128xf32> -> vector<64x128xf32>
    %88 = arith.addf %33, %87 : vector<64x128xf32>
    %c0_44 = arith.constant 0 : index
    %c0_45 = arith.constant 0 : index
    %89 = vector.load %arg6[%c0_44, %c0_45] : memref<1x128xf32, #tpu.memory_space<vmem>>, vector<1x128xf32>
    %c0_46 = arith.constant 0 : index
    %c0_47 = arith.constant 0 : index
    %90 = vector.load %arg7[%c0_46, %c0_47] : memref<1x128xf32, #tpu.memory_space<vmem>>, vector<1x128xf32>
    %cst_48 = arith.constant dense<0.000000e+00> : vector<64xf32>
    %91 = vector.multi_reduction <add>, %88, %cst_48 [1] : vector<64x128xf32> to vector<64xf32>
    %92 = vector.shape_cast %91 : vector<64xf32> to vector<64x1xf32>
    %cst_49 = arith.constant 3.125000e-02 : f32
    %93 = vector.broadcast %cst_49 : f32 to vector<64x1xf32>
    %94 = arith.mulf %92, %93 : vector<64x1xf32>
    %95 = vector.broadcast %94 : vector<64x1xf32> to vector<64x128xf32>
    %96 = arith.subf %88, %95 : vector<64x128xf32>
    %97 = vector.broadcast %4 : vector<1x128xf32> to vector<64x128xf32>
    %98 = arith.mulf %96, %97 : vector<64x128xf32>
    %99 = arith.mulf %98, %98 : vector<64x128xf32>
    %cst_50 = arith.constant dense<0.000000e+00> : vector<64xf32>
    %100 = vector.multi_reduction <add>, %99, %cst_50 [1] : vector<64x128xf32> to vector<64xf32>
    %101 = vector.shape_cast %100 : vector<64xf32> to vector<64x1xf32>
    %cst_51 = arith.constant 3.125000e-02 : f32
    %102 = vector.broadcast %cst_51 : f32 to vector<64x1xf32>
    %103 = arith.mulf %101, %102 : vector<64x1xf32>
    %cst_52 = arith.constant 9.99999974E-6 : f32
    %104 = vector.broadcast %cst_52 : f32 to vector<64x1xf32>
    %105 = arith.addf %103, %104 : vector<64x1xf32>
    %106 = math.rsqrt %105 : vector<64x1xf32>
    %107 = vector.broadcast %106 : vector<64x1xf32> to vector<64x128xf32>
    %108 = arith.mulf %98, %107 : vector<64x128xf32>
    %109 = vector.broadcast %89 : vector<1x128xf32> to vector<64x128xf32>
    %110 = arith.mulf %108, %109 : vector<64x128xf32>
    %111 = vector.broadcast %90 : vector<1x128xf32> to vector<64x128xf32>
    %112 = arith.addf %110, %111 : vector<64x128xf32>
    %c1_i32_53 = arith.constant 1 : i32
    %113 = tpu.dynamic_rotate %112 by %c1_i32_53 dim 0 : vector<64x128xf32>, i32 -> vector<64x128xf32>
    %cst_54 = arith.constant 0.000000e+00 : f32
    %114 = vector.broadcast %cst_54 : f32 to vector<64x128xf32>
    %115 = arith.select %7, %114, %113 : vector<64x128xi1>, vector<64x128xf32>
    %116 = tpu.concatenate %112, %115 in 1 : vector<64x128xf32>, vector<64x128xf32> -> vector<64x256xf32>
    %c0_55 = arith.constant 0 : index
    %c0_56 = arith.constant 0 : index
    %117 = vector.load %arg12[%c0_55, %c0_56] : memref<256x256xf32, #tpu.memory_space<vmem>>, vector<256x256xf32>
    %cst_57 = arith.constant dense<0.000000e+00> : vector<64x256xf32>
    %118 = tpu.matmul %116, %117, %cst_57 {dimension_numbers = #tpu.dot_dimension_numbers<[1], [0], [0], [1], [0, 0, 1, 1], [], []>} : vector<64x256xf32>, vector<256x256xf32>, vector<64x256xf32> -> vector<64x256xf32>
    %119 = vector.extract_strided_slice %118 {offsets = [0, 0], sizes = [64, 128], strides = [1, 1]} : vector<64x256xf32> to vector<64x128xf32>
    %cst_58 = arith.constant 0.000000e+00 : f32
    %120 = vector.broadcast %cst_58 : f32 to vector<64x128xf32>
    %121 = arith.maximumf %119, %120 : vector<64x128xf32>
    %122 = arith.mulf %121, %121 : vector<64x128xf32>
    %123 = vector.extract_strided_slice %118 {offsets = [0, 128], sizes = [64, 128], strides = [1, 1]} : vector<64x256xf32> to vector<64x128xf32>
    %124 = arith.negf %123 : vector<64x128xf32>
    %125 = math.exp %124 : vector<64x128xf32>
    %cst_59 = arith.constant 1.000000e+00 : f32
    %126 = vector.broadcast %cst_59 : f32 to vector<64x128xf32>
    %127 = arith.addf %126, %125 : vector<64x128xf32>
    %128 = arith.divf %126, %127 : vector<64x128xf32>
    %c0_60 = arith.constant 0 : index
    %c0_61 = arith.constant 0 : index
    %129 = vector.load %arg13[%c0_60, %c0_61] : memref<128x128xf32, #tpu.memory_space<vmem>>, vector<128x128xf32>
    %cst_62 = arith.constant dense<0.000000e+00> : vector<64x128xf32>
    %130 = tpu.matmul %122, %129, %cst_62 {dimension_numbers = #tpu.dot_dimension_numbers<[1], [0], [0], [1], [0, 0, 1, 1], [], []>} : vector<64x128xf32>, vector<128x128xf32>, vector<64x128xf32> -> vector<64x128xf32>
    %131 = arith.mulf %128, %130 : vector<64x128xf32>
    %132 = arith.addf %88, %131 : vector<64x128xf32>
    %133 = arith.addf %132, %9 : vector<64x128xf32>
    %c0_63 = arith.constant 0 : index
    %c0_64 = arith.constant 0 : index
    %c0_65 = arith.constant 0 : index
    %134 = vector.load %arg14[%c0_63, %c0_64, %c0_65] : memref<1x64x128xf32, #tpu.memory_space<vmem>>, vector<1x64x128xf32>
    %135 = vector.shape_cast %134 : vector<1x64x128xf32> to vector<64x128xf32>
    %136 = vector.shape_cast %133 : vector<64x128xf32> to vector<1x64x128xf32>
    tpu.vector_store %arg14[%c0_63, %c0_64, %c0_65], %136 {strides = array<i32>} : memref<1x64x128xf32, #tpu.memory_space<vmem>>, vector<1x64x128xf32>,
    return
  }
  func.func @transform_0(%arg0: i32) -> (i32, i32, i32) {
    %c0_i32 = arith.constant 0 : i32
    %c0_i32_0 = arith.constant 0 : i32
    %c0_i32_1 = arith.constant 0 : i32
    return %arg0, %c0_i32, %c0_i32_0 : i32, i32, i32
  }
  func.func @transform_1(%arg0: i32) -> (i32, i32) {
    %c0_i32 = arith.constant 0 : i32
    %c0_i32_0 = arith.constant 0 : i32
    %c0_i32_1 = arith.constant 0 : i32
    return %c0_i32, %c0_i32_0 : i32, i32
  }
  func.func @transform_2(%arg0: i32) -> (i32, i32) {
    %c0_i32 = arith.constant 0 : i32
    %c0_i32_0 = arith.constant 0 : i32
    %c0_i32_1 = arith.constant 0 : i32
    return %c0_i32, %c0_i32_0 : i32, i32
  }
  func.func @transform_3(%arg0: i32) -> (i32, i32) {
    %c0_i32 = arith.constant 0 : i32
    %c0_i32_0 = arith.constant 0 : i32
    %c0_i32_1 = arith.constant 0 : i32
    return %c0_i32, %c0_i32_0 : i32, i32
  }
  func.func @transform_4(%arg0: i32) -> (i32, i32) {
    %c0_i32 = arith.constant 0 : i32
    %c0_i32_0 = arith.constant 0 : i32
    %c0_i32_1 = arith.constant 0 : i32
    return %c0_i32, %c0_i32_0 : i32, i32
  }
  func.func @transform_5(%arg0: i32) -> (i32, i32) {
    %c0_i32 = arith.constant 0 : i32
    %c0_i32_0 = arith.constant 0 : i32
    %c0_i32_1 = arith.constant 0 : i32
    return %c0_i32, %c0_i32_0 : i32, i32
  }
  func.func @transform_6(%arg0: i32) -> (i32, i32) {
    %c0_i32 = arith.constant 0 : i32
    %c0_i32_0 = arith.constant 0 : i32
    %c0_i32_1 = arith.constant 0 : i32
    return %c0_i32, %c0_i32_0 : i32, i32
  }
  func.func @transform_7(%arg0: i32) -> (i32, i32) {
    %c0_i32 = arith.constant 0 : i32
    %c0_i32_0 = arith.constant 0 : i32
    %c0_i32_1 = arith.constant 0 : i32
    return %c0_i32, %c0_i32_0 : i32, i32
  }
  func.func @transform_8(%arg0: i32) -> (i32, i32) {
    %c0_i32 = arith.constant 0 : i32
    %c0_i32_0 = arith.constant 0 : i32
    %c0_i32_1 = arith.constant 0 : i32
    return %c0_i32, %c0_i32_0 : i32, i32
  }
  func.func @transform_9(%arg0: i32) -> (i32, i32) {
    %c0_i32 = arith.constant 0 : i32
    %c0_i32_0 = arith.constant 0 : i32
    %c0_i32_1 = arith.constant 0 : i32
    return %c0_i32, %c0_i32_0 : i32, i32
  }
  func.func @transform_10(%arg0: i32) -> (i32, i32) {
    %c0_i32 = arith.constant 0 : i32
    %c0_i32_0 = arith.constant 0 : i32
    %c0_i32_1 = arith.constant 0 : i32
    return %c0_i32, %c0_i32_0 : i32, i32
  }
  func.func @transform_11(%arg0: i32) -> (i32, i32) {
    %c0_i32 = arith.constant 0 : i32
    %c0_i32_0 = arith.constant 0 : i32
    %c0_i32_1 = arith.constant 0 : i32
    return %c0_i32, %c0_i32_0 : i32, i32
  }
  func.func @transform_12(%arg0: i32) -> (i32, i32) {
    %c0_i32 = arith.constant 0 : i32
    %c0_i32_0 = arith.constant 0 : i32
    %c0_i32_1 = arith.constant 0 : i32
    return %c0_i32, %c0_i32_0 : i32, i32
  }
  func.func @transform_13(%arg0: i32) -> (i32, i32, i32) {
    %c0_i32 = arith.constant 0 : i32
    %c0_i32_0 = arith.constant 0 : i32
    %c0_i32_1 = arith.constant 0 : i32
    return %arg0, %c0_i32, %c0_i32_0 : i32, i32, i32
  }
}

</mosaic_0001>

<bundles_post_ra>
// kernel: tpu_custom_call.1
= control target key start
LH: loop header
LB: loop body
LE: loop exit
PB: predicated region body
PF: predicated region fallthrough
CT: control target
= control target key end

     0   :  { %s4532_s0 = inlined_call_operand.hbm [shape: f32[2,64,128], index: 0, kind: input, shape index: {}]   ;;  %s4533_s1 = inlined_call_operand.vmem [shape: f32[1,128], index: 1, kind: input, shape index: {}]   ;;  %s4534_s2 = inlined_call_operand.vmem [shape: f32[1,128], index: 2, kind: input, shape index: {}]   ;;  %s4535_s3 = inlined_call_operand.vmem [shape: f32[1,128], index: 3, kind: input, shape index: {}]   ;;  %s4536_s4 = inlined_call_operand.vmem [shape: f32[1,128], index: 4, kind: input, shape index: {}]   ;;  %s4537_s5 = inlined_call_operand.vmem [shape: f32[1,128], index: 5, kind: input, shape index: {}]   ;;  %s4538_s6 = inlined_call_operand.vmem [shape: f32[1,128], index: 6, kind: input, shape index: {}]   ;;  %s4539_s7 = inlined_call_operand.hbm [shape: f32[256,384], index: 7, kind: input, shape index: {}]   ;;  %s4540_s8 = inlined_call_operand.vmem [shape: f32[1,128], index: 8, kind: input, shape index: {}]   ;;  %s4541_s9 = inlined_call_operand.vmem [shape: f32[1,128], index: 9, kind: input, shape index: {}]   ;;  %s4542_s10 = inlined_call_operand.hbm [shape: f32[128,128], index: 10, kind: input, shape index: {}]   ;;  %s4543_s11 = inlined_call_operand.hbm [shape: f32[256,256], index: 11, kind: input, shape index: {}]   ;;  %s4544_s12 = inlined_call_operand.hbm [shape: f32[128,128], index: 12, kind: input, shape index: {}]   ;;  %s4545_s13 = inlined_call_operand.hbm [shape: f32[2,64,128], index: 13, kind: output, shape index: {}]  }
   0x1   :  { %4572 = sst [smem:[#allocation35_spill]] %s4539_s7 }
   0x2   :  { %4573 = sst [smem:[#allocation36_spill]] %s4542_s10 }
   0x3   :  { %4574 = sst [smem:[#allocation37_spill]] %s4543_s11 }
   0x4   :  { %4575 = sst [smem:[#allocation38_spill]] %s4544_s12 }
   0x5   :  { %4576 = sst [smem:[#allocation39_spill]] %s4545_s13 }
   0x6   :  { %18 = vsyncpa [#allocation6], 0 }
   0x7   :  { %20 = vsyncpa [#allocation6 + $0x1], 0 }
   0x8   :  { %21 = vsyncpa [#allocation9], 0 }
   0x9   :  { %22 = vsyncpa [#allocation12], 0 }
   0xa   :  { %23 = vsyncpa [#allocation7], 0 }
   0xb   :  { %25 = vsyncpa [#allocation7 + $0x1], 0  ;;  %s3637_s25 = smov 0   ;;  %s3639_s26 = smov 0  }
   0xc   :  { %s3641_s27 = smov 0   ;;  %s3643_s28 = smov 0  }
   0xd LB: > { %4577 = sst [smem:[#allocation19_spill]] %s3521_s25  ;;  %s3658_s29 = sadd.s32 4294967295, %s3533_s28   ;;  %s3533_s28 = sphi %s3643_s28, %s4638_s28   ;;  %s3529_s27 = sphi %s3641_s27, %s4637_s27   ;;  %s3525_s26 = sphi %s3639_s26, %s4636_s26   ;;  %s3521_s25 = sphi %s3637_s25, %s4635_s25  }
   0xe   : > { %s2741_s30 = sadd.s32 4294967294, %s3533_s28   ;;  %p51_p0 = scmp.ne.s32.totalorder %s3525_s26, %s3521_s25 }
   0xf   : > { %p4546_p1 = scmp.eq.s32.totalorder %s3658_s29, 0  ;;  %p333_p3 = scmp.eq.s32.totalorder %s2741_s30, 1 }
  0x10   : > { %p2742_p5 = scmp.ge.s32.totalorder %s3533_s28, 1  ;;  %p340_p7 = scmp.lt.s32.totalorder %s3533_s28, 3 }
  0x11   : > { %p3667_p4 = por %p4546_p1, %p51_p0  ;;  %p3672_p6 = por %p333_p3, %p51_p0 }
  0x12   : > { %p3677_p8 = pnand %p2742_p5, %p340_p7  ;;  %s3551_s17 = smov [#allocation8]  }
  0x13   : > { %s4578_s14 = scalar_select %p3667_p4, 1, 0 }
  0x14   : > { %s4579_s15 = scalar_select %p3672_p6, 1, 0 }
  0x15   : > { %s4581_s16 = scalar_select %p3677_p8, 1, 0 }
  0x16   : > { %4580 = sst [smem:[#allocation20_spill]] %s4579_s15  ;;  %s370_s18 = sshll.u32 %s3551_s17, 4  ;;  %s371_s18 = int_to_ptr.vmem [resolvable:$true] %s370_s18 }
  0x17   : > { %p3008_p9 = pneg %p3677_p8  ;;  %s3552_s20 = smov [#allocation11]  }
  0x18   : > { %s402_s21 = sshll.u32 %s3552_s20, 4  ;;  %s3324_s22 = scalar_lea.vmem %s371_s18, 12288  ;;  %s403_s21 = int_to_ptr.vmem [resolvable:$true] %s402_s21 }
  0x19   : > { %p3686_p11 = pnand %p3008_p9, %p4546_p1  ;;  %p3325_p13 = scmp.ne.s32.totalorder %s371_s18, %s3324_s22 }
  0x1a   : > { %p3332_p5 = scmp.lt.s32.totalorder %s371_s18, %s371_s18  ;;  %p3333_p7 = scmp.lt.s32.totalorder %s3324_s22, %s3324_s22 }
  0x1b   : > { %p3315_p12 = pneg %p3686_p11 }
  0x1c   : > { %p3334_p10 = por %p3333_p7, %p3332_p5 }
  0x1d   : > { %p3327_p0 = pnand %p3325_p13, %p3315_p12 }
  0x1f   : > { %p3328_p3 = pneg %p3327_p0 }
  0x21   : > { %p3335_p9 = pnand %p3334_p10, %p3328_p3 }
  0x23   : > { %3338 = shalt.err (!%p3335_p9)
}
  0x24   : > { %s3553_s23 = smov 384   ;;  %s3554_s24 = smov 24  }
  0x25   : > { %s4583_s7 = sld [smem:[#allocation35_spill]]  ;;  %s3350_s20 = scalar_lea.vmem %s403_s21, 8192 }
  0x26   : > { %p3351_p1 = scmp.ne.s32.totalorder %s403_s21, %s3350_s20  ;;  %p3358_p2 = scmp.lt.s32.totalorder %s403_s21, %s403_s21 }
  0x27   : > { %p3359_p6 = scmp.lt.s32.totalorder %s3350_s20, %s3350_s20 }
  0x28   : > { %p3353_p13 = pnand %p3351_p1, %p3315_p12 }
  0x29   : > { %p3360_p5 = por %p3359_p6, %p3358_p2 }
  0x2a   : > { %p3354_p0 = pneg %p3353_p13 }
  0x2b   : > { %3011 = dma.hbm_to_vmem [thread:$0]  (!%p3686_p11), %s4583_s7, 12288, %s371_s18, [#allocation9], %s3553_s23, %s3553_s23, %s3554_s24  }
  0x2c   : > { %p3361_p10 = pnand %p3360_p5, %p3354_p0 }
  0x2e   : > { %3364 = shalt.err (!%p3361_p10)
}
  0x2f   : > { %s3555_s22 = smov 256   ;;  %s3556_s15 = smov 16  }
  0x30   : > { %s4584_s11 = sld [smem:[#allocation37_spill]]  ;;  %s3557_s18 = smov [#allocation10]  }
  0x31   : > { %s389_s23 = sshll.u32 %s3557_s18, 4  ;;  %s390_s23 = int_to_ptr.vmem [resolvable:$true] %s389_s23 }
  0x32   : > { %s3376_s24 = scalar_lea.vmem %s390_s23, 2048  ;;  %p3384_p6 = scmp.lt.s32.totalorder %s390_s23, %s390_s23 }
  0x33   : > { %p3377_p1 = scmp.ne.s32.totalorder %s390_s23, %s3376_s24  ;;  %p3385_p7 = scmp.lt.s32.totalorder %s3376_s24, %s3376_s24 }
  0x35   : > { %p3379_p3 = pnand %p3377_p1, %p3315_p12  ;;  %p3386_p9 = por %p3385_p7, %p3384_p6 }
  0x36   : > { %3017 = dma.hbm_to_vmem [thread:$0]  (!%p3686_p11), %s4584_s11, 8192, %s403_s21, [#allocation12], %s3555_s22, %s3555_s22, %s3556_s15  }
  0x37   : > { %p3380_p2 = pneg %p3379_p3 }
  0x39   : > { %p3387_p13 = pnand %p3386_p9, %p3380_p2 }
  0x3b   : > { %3390 = shalt.err (!%p3387_p13)
}
  0x3c   : > { %s4550_s30 = smov 128   ;;  %s4551_s17 = smov 8  }
  0x3d   : > { %s4585_s10 = sld [smem:[#allocation36_spill]]  ;;  %s3560_s15 = smov [#allocation13]  }
  0x3e   : > { %s415_s21 = sshll.u32 %s3560_s15, 4  ;;  %s416_s21 = int_to_ptr.vmem [resolvable:$true] %s415_s21 }
  0x3f   : > { %s3402_s20 = scalar_lea.vmem %s416_s21, 2048  ;;  %p3410_p1 = scmp.lt.s32.totalorder %s416_s21, %s416_s21 }
  0x40   : > { %p3403_p0 = scmp.ne.s32.totalorder %s416_s21, %s3402_s20  ;;  %p3411_p3 = scmp.lt.s32.totalorder %s3402_s20, %s3402_s20 }
  0x42   : > { %p3405_p5 = pnand %p3403_p0, %p3315_p12  ;;  %p3412_p2 = por %p3411_p3, %p3410_p1 }
  0x43   : > { %3014 = dma.hbm_to_vmem [thread:$0]  (!%p3686_p11), %s4585_s10, 2048, %s390_s23, [#allocation9], %s4550_s30, %s4550_s30, %s4551_s17  }
  0x44   : > { %p3406_p10 = pneg %p3405_p5 }
  0x46   : > { %p3413_p6 = pnand %p3412_p2, %p3406_p10 }
  0x48   : > { %3416 = shalt.err (!%p3413_p6)
}
  0x49   : > { %s4586_s12 = sld [smem:[#allocation38_spill]]  ;;  %s3731_s23 = sadd.s32 1, %s3533_s28  }
  0x4a   : > { %s38_s19 = sadd.s32 1, %s3529_s27  ;;  %s35_s24 = ssub.s32 %s3533_s28, %s3731_s23 }
  0x4b   : > { %p45_p12 = scmp.ne.s32.totalorder %s3529_s27, %s3525_s26  ;;  %p36_p7 = scmp.eq.s32.totalorder %s35_s24, 0 }
  0x4c   : > { %p46_p9 = scmp.eq.s32.totalorder %s3533_s28, 0  ;;  %p4587_p13 = scmp.eq.s32.totalorder %s3658_s29, 1 }
  0x4d   : > { %p3033_p5 = scmp.lt.s32.totalorder %s3533_s28, 2  ;;  %s429_s15 = sand.u32 1, %s3529_s27  }
  0x4e   : > { %p3741_p0 = por %p4587_p13, %p45_p12  ;;  %p47_p10 = por %p46_p9, %p45_p12 }
  0x4f   : > { %3020 = dma.hbm_to_vmem [thread:$0]  (!%p3686_p11), %s4586_s12, 2048, %s416_s21, [#allocation12], %s4550_s30, %s4550_s30, %s4551_s17  }
  0x50   : > { %s4588_s13 = scalar_select %p3741_p0, 1, 0 }
  0x51   : > { %s3747_s25 = scalar_select %p36_p7, %s3529_s27, %s38_s19  }
  0x52   : > { %s2748_s20 = sshll.u32 %s429_s15, 6  ;;  %s2793_s21 = sshll.u32 %s3533_s28, 10 }
  0x53   : > { %s3754_s30 = scalar_lea.hbm %s4532_s0, %s2793_s21  ;;  %s433_s24 = scalar_lea.vmem [#allocation5], %s2748_s20 }
  0x54   : > { %s440_s17 = sshll.u32 %s433_s24, 4  ;;  %p3758_p11 = pnand %p3033_p5, %p47_p10  ;;  %s3756_s17 = int_to_ptr.vmem [resolvable:$true] %s440_s17 }
  0x55   : > { %s3762_s19 = scalar_lea.sflag [#allocation6], %s429_s15  ;;  %s3417_s10 = scalar_lea.hbm %s3754_s30, 1024 }
  0x56   : > { %p3418_p1 = scmp.ne.s32.totalorder %s3754_s30, %s3417_s10  ;;  %p3419_p3 = pneg %p3758_p11 }
  0x57   : > { %s3422_s20 = scalar_lea.hbm %s4532_s0, 2048  ;;  %p3423_p12 = scmp.lt.s32.totalorder %s3754_s30, %s4532_s0 }
  0x58   : > { %p3420_p2 = pnand %p3419_p3, %p3418_p1  ;;  %p3424_p7 = scmp.lt.s32.totalorder %s3422_s20, %s3417_s10 }
  0x5a   : > { %p3421_p6 = pneg %p3420_p2  ;;  %p3425_p9 = por %p3424_p7, %p3423_p12 }
  0x5c   : > { %p3426_p13 = pnand %p3425_p9, %p3421_p6 }
  0x5e   : > { %3429 = shalt.err (!%p3426_p13)
}
  0x5f   : > { %s3430_s15 = scalar_lea.vmem %s3756_s17, 1024  ;;  %s3561_s11 = smov [#allocation5]  }
  0x60   : > { %p3431_p5 = scmp.ne.s32.totalorder %s3756_s17, %s3430_s15  ;;  %s3435_s12 = sshll.u32 %s3561_s11, 4  ;;  %s3436_s12 = int_to_ptr.vmem [resolvable:$false] %s3435_s12 }
  0x61   : > { %s3437_s21 = scalar_lea.vmem %s3436_s12, 2048  ;;  %p3438_p2 = scmp.lt.s32.totalorder %s3756_s17, %s3436_s12 }
  0x62   : > { %p3433_p10 = pnand %p3431_p5, %p3419_p3  ;;  %p3439_p0 = scmp.lt.s32.totalorder %s3437_s21, %s3430_s15 }
  0x64   : > { %p3434_p1 = pneg %p3433_p10  ;;  %p3440_p4 = por %p3439_p0, %p3438_p2 }
  0x66   : > { %p3441_p8 = pnand %p3440_p4, %p3434_p1 }
  0x68   : > { %3444 = shalt.err (!%p3441_p8)
}
  0x69   : > { %s4590_s10 = smov 8   ;;  %s4591_s22 = smov 128  }
  0x6a   : > { %3024 = dma.hbm_to_vmem [thread:$0]  (!%p3758_p11), %s3754_s30, 1024, %s3756_s17, %s3762_s19, %s4591_s22, %s4591_s22, %s4590_s10  }
  0x6b   : > { %p4592_p3 = scmp.ne.s32.totalorder %s4581_s16, 0 }
  0x6d   : > { %452 = sbr.rel (%p4592_p3) target bundleno = 2099 (0x833), region = 72 }
  0x72   : > { %s3789_s11 = sand.u32 1, %s3525_s26   ;;  %p4593_p4 = scmp.ne.s32.totalorder %s4578_s14, 0 }
  0x73   : > { %s2752_s12 = sshll.u32 %s3789_s11, 6  ;;  %s455_s20 = scalar_lea.sflag [#allocation6], %s3789_s11 }
  0x74   : > { %s458_s7 = scalar_lea.vmem [#allocation5], %s2752_s12 }
  0x75   : > { %3504 = dma.done.wait (%p4593_p4), %s455_s20, 1024  }
  0x76   : > { %3506 = vsyncadd (%p4593_p4), %s455_s20, 4294966272  ;;  %p4594_p8 = scmp.eq.s32.totalorder %s3658_s29, 0 }
  0x78   : > { %3508 = dma.done.wait (%p4594_p8), [#allocation9], 14336   ;;  %p4595_p0 = pmov %p4594_p8 }
  0x7a   : > { %3510 = vsyncadd (%p4595_p0), [#allocation9], 4294952960  ;;  %p4596_p11 = pmov %p4595_p0 }
  0x7b   : > { %p4597_p6 = pmov %p4595_p0 }
  0x7c   : > { %3512 = dma.done.wait (%p4596_p11), [#allocation12], 10240  }
  0x7d   : > { %3514 = vsyncadd (%p4597_p6), [#allocation12], 4294957056  ;;  %v1202_v0 = vld [vmem:[%s4540_s8] sm:$0x1]  ;;  %v3818_v4 = vld [vmem:[%s458_s7 + $0x8] sm:$0xff]  ;;  %v517_v13 = vlaneseq  ;;  %v3562_v19 = vmov 0.0  }
  0x7e   : > { %v3813_v1 = vld [vmem:[%s4541_s9] sm:$0x1]  ;;  %v1203_v3 = vmul.f32 1.442695, %v1202_v0  ;;  %4600 = vst [vmem:[#allocation23_spill] sm:$0xff] %v3818_v4  ;;  %551 = vadd.xlane.f32.xlu1 %v3818_v4  ;;  %v3821_v5 = vld [vmem:[%s458_s7 + $0x38] sm:$0xff] }
  0x7f   : > { %4598 = vst [vmem:[#allocation21_spill] sm:$0xff] %v3813_v1  ;;  %v3815_v2 = vld [vmem:[%s458_s7] sm:$0xff]  ;;  %4601 = vst [vmem:[#allocation24_spill] sm:$0xff] %v3821_v5  ;;  %v3823_v6 = vld [vmem:[%s458_s7 + $0x10] sm:$0xff]  ;;  %v518_v14 = vand.u32 127, %v517_v13  ;;  %s4048_s16 = smov 0  }
  0x80   : > { %4599 = vst [vmem:[#allocation22_spill] sm:$0xff] %v3815_v2  ;;  %549 = vadd.xlane.f32.xlu0 %v3815_v2  ;;  %3117 = vpow2.f32 %v1203_v3  ;;  %4602 = vst [vmem:[#allocation25_spill] sm:$0xff] %v3823_v6  ;;  %v3827_v7 = vld [vmem:[%s458_s7 + $0x18] sm:$0xff]  ;;  %v3829_v8 = vld [vmem:[%s458_s7 + $0x20] sm:$0xff] }
  0x81   : > { %4603 = vst [vmem:[#allocation26_spill] sm:$0xff] %v3827_v7  ;;  %4604 = vst [vmem:[#allocation27_spill] sm:$0xff] %v3829_v8  ;;  %v3833_v9 = vld [vmem:[%s458_s7 + $0x28] sm:$0xff]  ;;  %v3835_v10 = vld [vmem:[%s458_s7 + $0x30] sm:$0xff]  ;;  %vm519_vm0 = vcmp.lt.s32.totalorder %v518_v14, 32  ;;  %s4040_s7 = scalar_lea.vmem [#allocation14], %s2752_s12 }
  0x82   : > { %553 = vadd.xlane.f32.xlu1 %v3823_v6  ;;  %4605 = vst [vmem:[#allocation28_spill] sm:$0xff] %v3833_v9  ;;  %4606 = vst [vmem:[#allocation29_spill] sm:$0xff] %v3835_v10  ;;  %v3842_v20 = vsel %vm519_vm0, 1.0, %v3562_v19 }
  0x83   : > { %4608 = vst [vmem:[#allocation31_spill] sm:$0xff] %v3842_v20 }
  0x84   : > { %563 = vadd.xlane.f32.xlu0 %v3821_v5 }
  0x86   : > { %557 = vadd.xlane.f32.xlu1 %v3829_v8 }
  0x88   : > { %555 = vadd.xlane.f32.xlu0 %v3827_v7 }
  0x8a   : > { %561 = vadd.xlane.f32.xlu1 %v3835_v10 }
  0x8c   : > { %559 = vadd.xlane.f32.xlu0 %v3833_v9 }
  0x8d   : > { %v3118_v11 = vpop.eup %3117 }
  0x8e   : > { %v3839_v12 = vsub.f32 0.0, %v3118_v11 }
  0x90   : > { %4607 = vst [vmem:[#allocation30_spill] sm:$0xff] %v3839_v12 }
 0x107   : > { %v552_v17 = vpop.xlane.xlu1 %551 }
 0x108   : > { %v566_v18 = vmul.f32 0.03125, %v552_v17 }
 0x109   : > { %v550_v15 = vpop.xlane.xlu0 %549 }
 0x10a   : > { %v565_v16 = vmul.f32 0.03125, %v550_v15  ;;  %v574_v22 = vsub.f32 %v3818_v4, %v566_v18 }
 0x10b   : > { %v554_v25 = vpop.xlane.xlu1 %553 }
 0x10c   : > { %v573_v21 = vsub.f32 %v3815_v2, %v565_v16  ;;  %v567_v27 = vmul.f32 0.03125, %v554_v25  ;;  %v3850_v28 = vmul.f32 %v3842_v20, %v574_v22 }
 0x10d   : > { %v564_v23 = vpop.xlane.xlu0 %563 }
 0x10e   : > { %v572_v24 = vmul.f32 0.03125, %v564_v23  ;;  %v3847_v26 = vmul.f32 %v3842_v20, %v573_v21  ;;  %v575_v31 = vsub.f32 %v3823_v6, %v567_v27  ;;  %v590_v35 = vmul.f32 %v3850_v28, %v3850_v28 }
 0x10f   : > { %v558_v34 = vpop.xlane.xlu1 %557 }
 0x110   : > { %v580_v29 = vsub.f32 %v3821_v5, %v572_v24  ;;  %v589_v30 = vmul.f32 %v3847_v26, %v3847_v26  ;;  %v569_v37 = vmul.f32 0.03125, %v558_v34  ;;  %v3862_v38 = vmul.f32 %v3842_v20, %v575_v31  ;;  %v2759_v31 = vld [vmem:[%s4533_s1] ss:$0 sm:$0xff] }
 0x111   : > { %v556_v32 = vpop.xlane.xlu0 %555  ;;  %v2760_v34 = vld [vmem:[%s4534_s2] ss:$0 sm:$0xff] }
 0x112   : > { %v568_v33 = vmul.f32 0.03125, %v556_v32  ;;  %597 = vadd.xlane.f32.xlu0 %v589_v30  ;;  %v3859_v36 = vmul.f32 %v3842_v20, %v580_v29  ;;  %v577_v41 = vsub.f32 %v3829_v8, %v569_v37  ;;  %v591_v45 = vmul.f32 %v3862_v38, %v3862_v38 }
 0x113   : > { %v562_v44 = vpop.xlane.xlu1 %561 }
 0x114   : > { %v576_v39 = vsub.f32 %v3827_v7, %v568_v33  ;;  %v596_v40 = vmul.f32 %v3859_v36, %v3859_v36  ;;  %v571_v47 = vmul.f32 0.03125, %v562_v44  ;;  %v3874_v48 = vmul.f32 %v3842_v20, %v577_v41 }
 0x115   : > { %v560_v42 = vpop.xlane.xlu0 %559 }
 0x116   : > { %v570_v43 = vmul.f32 0.03125, %v560_v42  ;;  %599 = vadd.xlane.f32.xlu0 %v590_v35  ;;  %611 = vadd.xlane.f32.xlu1 %v596_v40  ;;  %v3871_v46 = vmul.f32 %v3842_v20, %v576_v39  ;;  %v579_v51 = vsub.f32 %v3835_v10, %v571_v47  ;;  %v593_v52 = vmul.f32 %v3874_v48, %v3874_v48 }
 0x118   : > { %v578_v49 = vsub.f32 %v3833_v9, %v570_v43  ;;  %v592_v50 = vmul.f32 %v3871_v46, %v3871_v46  ;;  %v3886_v54 = vmul.f32 %v3842_v20, %v579_v51 }
 0x11a   : > { %601 = vadd.xlane.f32.xlu1 %v591_v45  ;;  %603 = vadd.xlane.f32.xlu0 %v592_v50  ;;  %v3883_v53 = vmul.f32 %v3842_v20, %v578_v49  ;;  %v595_v56 = vmul.f32 %v3886_v54, %v3886_v54 }
 0x11c   : > { %v594_v55 = vmul.f32 %v3883_v53, %v3883_v53 }
 0x11e   : > { %605 = vadd.xlane.f32.xlu1 %v593_v52  ;;  %607 = vadd.xlane.f32.xlu0 %v594_v55 }
 0x122   : > { %609 = vadd.xlane.f32.xlu1 %v595_v56 }
 0x19b   : > { %v598_v57 = vpop.xlane.xlu0 %597 }
 0x19c   : > { %v613_v58 = vmul.f32 0.03125, %v598_v57 }
 0x19e   : > { %v621_v59 = vadd.f32 1e-05, %v613_v58 }
 0x19f   : > { %v612_v60 = vpop.xlane.xlu1 %611  ;;  %v600_v61 = vpop.xlane.xlu0 %599 }
 0x1a0   : > { %3119 = vrsqrt.f32 %v621_v59  ;;  %v620_v62 = vmul.f32 0.03125, %v612_v60  ;;  %v614_v63 = vmul.f32 0.03125, %v600_v61 }
 0x1a2   : > { %v628_v0 = vadd.f32 1e-05, %v620_v62  ;;  %v622_v3 = vadd.f32 1e-05, %v614_v63 }
 0x1a3   : > { %v602_v11 = vpop.xlane.xlu1 %601  ;;  %v604_v14 = vpop.xlane.xlu0 %603 }
 0x1a4   : > { %3121 = vrsqrt.f32 %v628_v0  ;;  %v615_v15 = vmul.f32 0.03125, %v602_v11  ;;  %v616_v16 = vmul.f32 0.03125, %v604_v14  ;;  %v867_v11 = vld [vmem:[#allocation8 + $0x158] sm:$0xff]  ;;  %v866_v14 = vld [vmem:[#allocation8 + $0x150] sm:$0xff] }
 0x1a5   : > { %3123 = vrsqrt.f32 %v622_v3  ;;  %v869_v3 = vld [vmem:[#allocation8 + $0x168] sm:$0xff] }
 0x1a6   : > { %v623_v17 = vadd.f32 1e-05, %v615_v15  ;;  %v624_v18 = vadd.f32 1e-05, %v616_v16  ;;  %v864_v15 = vld [vmem:[#allocation8 + $0x140] sm:$0xff]  ;;  %v861_v16 = vld [vmem:[#allocation8 + $0x128] sm:$0xff] }
 0x1a7   : > { %v606_v19 = vpop.xlane.xlu1 %605  ;;  %v608_v21 = vpop.xlane.xlu0 %607 }
 0x1a8   : > { %3125 = vrsqrt.f32 %v623_v17  ;;  %v617_v22 = vmul.f32 0.03125, %v606_v19  ;;  %v618_v23 = vmul.f32 0.03125, %v608_v21  ;;  %v860_v17 = vld [vmem:[#allocation8 + $0x120] sm:$0xff]  ;;  %v857_v19 = vld [vmem:[#allocation8 + $0x108] sm:$0xff]  ;;  %v855_v21 = vld [vmem:[#allocation8 + $0xf8] sm:$0xff] }
 0x1a9   : > { %3127 = vrsqrt.f32 %v624_v18  ;;  %v858_v18 = vld [vmem:[#allocation8 + $0x110] sm:$0xff] }
 0x1aa   : > { %v625_v24 = vadd.f32 1e-05, %v617_v22  ;;  %v626_v25 = vadd.f32 1e-05, %v618_v23  ;;  %v854_v22 = vld [vmem:[#allocation8 + $0xf0] sm:$0xff]  ;;  %v852_v23 = vld [vmem:[#allocation8 + $0xe0] sm:$0xff] }
 0x1ab   : > { %v610_v27 = vpop.xlane.xlu1 %609 }
 0x1ac   : > { %3129 = vrsqrt.f32 %v625_v24  ;;  %v619_v29 = vmul.f32 0.03125, %v610_v27  ;;  %v851_v24 = vld [vmem:[#allocation8 + $0xd8] sm:$0xff]  ;;  %v848_v27 = vld [vmem:[#allocation8 + $0xc0] sm:$0xff] }
 0x1ad   : > { %v3120_v30 = vpop.eup %3119  ;;  %3131 = vrsqrt.f32 %v626_v25  ;;  %v849_v25 = vld [vmem:[#allocation8 + $0xc8] sm:$0xff] }
 0x1ae   : > { %v627_v32 = vadd.f32 1e-05, %v619_v29  ;;  %v637_v33 = vmul.f32 %v3120_v30, %v3847_v26  ;;  %v846_v29 = vld [vmem:[#allocation8 + $0xb0] sm:$0xff]  ;;  %v845_v30 = vld [vmem:[#allocation8 + $0xa8] sm:$0xff] }
 0x1b0   : > { %3133 = vrsqrt.f32 %v627_v32  ;;  %v651_v35 = vmul.f32 %v2759_v31, %v637_v33  ;;  %v842_v32 = vld [vmem:[#allocation8 + $0x90] sm:$0xff]  ;;  %v840_v33 = vld [vmem:[#allocation8 + $0x80] sm:$0xff] }
 0x1b1   : > { %v3122_v37 = vpop.eup %3121 }
 0x1b2   : > { %v3124_v39 = vpop.eup %3123  ;;  %v3899_v40 = vadd.f32 %v2760_v34, %v651_v35  ;;  %v644_v41 = vmul.f32 %v3122_v37, %v3859_v36  ;;  %v837_v35 = vld [vmem:[#allocation8 + $0x68] sm:$0xff]  ;;  %v836_v37 = vld [vmem:[#allocation8 + $0x60] sm:$0xff] }
 0x1b3   : > { %v638_v42 = vmul.f32 %v3124_v39, %v3850_v28  ;;  %v834_v39 = vld [vmem:[#allocation8 + $0x50] sm:$0xff] }
 0x1b4   : > { %675 = vadd.xlane.f32.xlu0 %v3899_v40  ;;  %v658_v43 = vmul.f32 %v2759_v31, %v644_v41  ;;  %v833_v41 = vld [vmem:[#allocation8 + $0x48] sm:$0xff] }
 0x1b5   : > { %v3126_v44 = vpop.eup %3125  ;;  %v652_v45 = vmul.f32 %v2759_v31, %v638_v42  ;;  %v831_v42 = vld [vmem:[#allocation8 + $0x38] sm:$0xff] }
 0x1b6   : > { %v3128_v26 = vpop.eup %3127  ;;  %v3904_v47 = vadd.f32 %v2760_v34, %v658_v43  ;;  %v639_v49 = vmul.f32 %v3126_v44, %v3862_v38  ;;  %v830_v43 = vld [vmem:[#allocation8 + $0x30] sm:$0xff]  ;;  %v828_v44 = vld [vmem:[#allocation8 + $0x20] sm:$0xff] }
 0x1b7   : > { %v3907_v50 = vadd.f32 %v2760_v34, %v652_v45  ;;  %v640_v51 = vmul.f32 %v3128_v26, %v3871_v46  ;;  %v827_v45 = vld [vmem:[#allocation8 + $0x18] sm:$0xff]  ;;  %v825_v26 = vld [vmem:[#allocation8 + $0x8] sm:$0xff] }
 0x1b8   : > { %689 = vadd.xlane.f32.xlu1 %v3904_v47  ;;  %v653_v52 = vmul.f32 %v2759_v31, %v639_v49  ;;  %v824_v49 = vld [vmem:[#allocation8] sm:$0xff] }
 0x1b9   : > { %v3130_v36 = vpop.eup %3129  ;;  %677 = vadd.xlane.f32.xlu0 %v3907_v50  ;;  %v654_v28 = vmul.f32 %v2759_v31, %v640_v51 }
 0x1ba   : > { %v3132_v55 = vpop.eup %3131  ;;  %v3912_v56 = vadd.f32 %v2760_v34, %v653_v52  ;;  %v641_v57 = vmul.f32 %v3130_v36, %v3874_v48 }
 0x1bb   : > { %v3915_v58 = vadd.f32 %v2760_v34, %v654_v28  ;;  %v642_v38 = vmul.f32 %v3132_v55, %v3883_v53  ;;  %v870_v53 = vld [vmem:[#allocation8 + $0x170] sm:$0xff] }
 0x1bc   : > { %679 = vadd.xlane.f32.xlu1 %v3912_v56  ;;  %v655_v59 = vmul.f32 %v2759_v31, %v641_v57  ;;  %920 = vmatprep.subr.mxu0 %v870_v53 }
 0x1bd   : > { %4609 = vst [vmem:[#allocation32_spill] sm:$0xff] %v3915_v58  ;;  %v3134_v46 = vpop.eup %3133  ;;  %681 = vadd.xlane.f32.xlu0 %v3915_v58  ;;  %v656_v60 = vmul.f32 %v2759_v31, %v642_v38  ;;  %921 = vmatpush1.msra.mxu0 %v869_v3 }
 0x1be   : > { %v3920_v61 = vadd.f32 %v2760_v34, %v655_v59  ;;  %v643_v62 = vmul.f32 %v3134_v46, %v3886_v54  ;;  %922 = vmatprep.subr.mxu0 %v867_v11  ;;  %v863_v54 = vld [vmem:[#allocation8 + $0x138] sm:$0xff] }
 0x1bf   : > { %v3923_v63 = vadd.f32 %v2760_v34, %v656_v60  ;;  %923 = vmatpush1.msra.mxu0 %v866_v14 }
 0x1c0   : > { %683 = vadd.xlane.f32.xlu1 %v3920_v61  ;;  %v657_v48 = vmul.f32 %v2759_v31, %v643_v62  ;;  %924 = vmatprep.subr.mxu0 %v864_v15  ;;  %v843_v31 = vld [vmem:[#allocation8 + $0x98] sm:$0xff] }
 0x1c1   : > { %4610 = vst [vmem:[#allocation33_spill] sm:$0xff] %v3923_v63  ;;  %685 = vadd.xlane.f32.xlu0 %v3923_v63  ;;  %925 = vmatpush1.msra.mxu0 %v863_v54 }
 0x1c2   : > { %v3927_v0 = vadd.f32 %v2760_v34, %v657_v48  ;;  %926 = vmatprep.subr.mxu0 %v861_v16  ;;  %v839_v34 = vld [vmem:[#allocation8 + $0x78] sm:$0xff] }
 0x1c3   : > { %927 = vmatpush1.msra.mxu0 %v860_v17 }
 0x1c4   : > { %687 = vadd.xlane.f32.xlu1 %v3927_v0  ;;  %928 = vmatprep.subr.mxu0 %v858_v18 }
 0x1c5   : > { %929 = vmatpush1.msra.mxu0 %v857_v19 }
 0x1c6   : > { %930 = vmatprep.subr.mxu0 %v855_v21 }
 0x1c7   : > { %931 = vmatpush1.msra.mxu0 %v854_v22 }
 0x1c8   : > { %932 = vmatprep.subr.mxu0 %v852_v23 }
 0x1c9   : > { %933 = vmatpush1.msra.mxu0 %v851_v24 }
 0x1ca   : > { %934 = vmatprep.subr.mxu0 %v849_v25 }
 0x1cb   : > { %935 = vmatpush1.msra.mxu0 %v848_v27 }
 0x1cc   : > { %936 = vmatprep.subr.mxu0 %v846_v29 }
 0x1cd   : > { %937 = vmatpush1.msra.mxu0 %v845_v30 }
 0x1ce   : > { %938 = vmatprep.subr.mxu0 %v843_v31 }
 0x1cf   : > { %939 = vmatpush1.msra.mxu0 %v842_v32 }
 0x1d0   : > { %940 = vmatprep.subr.mxu0 %v840_v33 }
 0x1d1   : > { %941 = vmatpush1.msra.mxu0 %v839_v34 }
 0x1d2   : > { %942 = vmatprep.subr.mxu0 %v837_v35 }
 0x1d3   : > { %943 = vmatpush1.msra.mxu0 %v836_v37 }
 0x1d4   : > { %944 = vmatprep.subr.mxu0 %v834_v39 }
 0x1d5   : > { %945 = vmatpush1.msra.mxu0 %v833_v41  ;;  %v918_v41 = vld [vmem:[#allocation8 + $0x2f0] sm:$0xff] }
 0x1d6   : > { %946 = vmatprep.subr.mxu0 %v831_v42  ;;  %v919_v42 = vld [vmem:[#allocation8 + $0x2f8] sm:$0xff] }
 0x1d7   : > { %947 = vmatpush1.msra.mxu0 %v830_v43  ;;  %2796 = vmatprep.subr.mxu1 %v919_v42  ;;  %v847_v42 = vld [vmem:[#allocation8 + $0xb8] sm:$0xff] }
 0x1d8   : > { %948 = vmatprep.subr.mxu0 %v828_v44  ;;  %v917_v44 = vld [vmem:[#allocation8 + $0x2e8] sm:$0xff] }
 0x1d9   : > { %949 = vmatpush1.msra.mxu0 %v827_v45  ;;  %v871_v45 = vld [vmem:[#allocation8 + $0x178] sm:$0xff] }
 0x1da   : > { %950 = vmatprep.subr.mxu0 %v825_v26  ;;  %2797 = vmatpush3.msra.mxu1 %v871_v45  ;;  %v890_v45 = vld [vmem:[#allocation8 + $0x210] sm:$0xff] }
 0x1db   : > { %951 = vmatpush1.msra.mxu0 %v824_v49  ;;  %v915_v49 = vld [vmem:[#allocation8 + $0x2d8] sm:$0xff] }
 0x1dc   : > { %952 = vmatprep.subr.mxu0 %v918_v41  ;;  %v893_v41 = vld [vmem:[#allocation8 + $0x228] sm:$0xff] }
 0x1dd   : > { %953 = vmatpush2.msra.mxu0 %v917_v44  ;;  %v892_v44 = vld [vmem:[#allocation8 + $0x220] sm:$0xff] }
 0x1de   : > { %954 = vmatprep.subr.mxu0 %v915_v49  ;;  %v844_v49 = vld [vmem:[#allocation8 + $0xa0] sm:$0xff] }
 0x23d   : > { %v676_v51 = vpop.xlane.xlu0 %675 }
 0x23e   : > { %v691_v52 = vmul.f32 0.03125, %v676_v51  ;;  %v916_v51 = vld [vmem:[#allocation8 + $0x2e0] sm:$0xff] }
 0x23f   : > { %2798 = vmatprep.subr.mxu1 %v916_v51  ;;  %v888_v51 = vld [vmem:[#allocation8 + $0x200] sm:$0xff] }
 0x240   : > { %v699_v36 = vsub.f32 %v3899_v40, %v691_v52  ;;  %v914_v52 = vld [vmem:[#allocation8 + $0x2d0] sm:$0xff] }
 0x241   : > { %v690_v28 = vpop.xlane.xlu1 %689  ;;  %955 = vmatpush2.msra.mxu0 %v914_v52  ;;  %v889_v52 = vld [vmem:[#allocation8 + $0x208] sm:$0xff] }
 0x242   : > { %v698_v55 = vmul.f32 0.03125, %v690_v28  ;;  %v678_v57 = vpop.xlane.xlu0 %677  ;;  %v3932_v38 = vmul.f32 %v3842_v20, %v699_v36  ;;  %v868_v36 = vld [vmem:[#allocation8 + $0x160] sm:$0xff] }
 0x243   : > { %v692_v59 = vmul.f32 0.03125, %v678_v57  ;;  %v913_v57 = vld [vmem:[#allocation8 + $0x2c8] sm:$0xff]  ;;  %2799 = vmatpush3.msra.mxu1 %v868_v36  ;;  %v887_v36 = vld [vmem:[#allocation8 + $0x1f8] sm:$0xff] }
 0x244   : > { %v706_v46 = vsub.f32 %v3904_v47, %v698_v55  ;;  %v715_v60 = vmul.f32 %v3932_v38, %v3932_v38  ;;  %v912_v55 = vld [vmem:[#allocation8 + $0x2c0] sm:$0xff]  ;;  %2800 = vmatprep.subr.mxu1 %v913_v57  ;;  %v886_v57 = vld [vmem:[#allocation8 + $0x1f0] sm:$0xff] }
 0x245   : > { %v700_v62 = vsub.f32 %v3907_v50, %v692_v59  ;;  %v680_v48 = vpop.xlane.xlu1 %679  ;;  %v911_v59 = vld [vmem:[#allocation8 + $0x2b8] sm:$0xff]  ;;  %956 = vmatprep.subr.mxu0 %v912_v55  ;;  %v885_v55 = vld [vmem:[#allocation8 + $0x1e8] sm:$0xff] }
 0x246   : > { %v693_v53 = vmul.f32 0.03125, %v680_v48  ;;  %v682_v3 = vpop.xlane.xlu0 %681  ;;  %723 = vadd.xlane.f32.xlu0 %v715_v60  ;;  %v3939_v11 = vmul.f32 %v3842_v20, %v706_v46  ;;  %v865_v46 = vld [vmem:[#allocation8 + $0x148] sm:$0xff]  ;;  %957 = vmatpush2.msra.mxu0 %v911_v59  ;;  %v908_v48 = vld [vmem:[#allocation8 + $0x2a0] sm:$0xff] }
 0x247   : > { %v694_v14 = vmul.f32 0.03125, %v682_v3  ;;  %v3942_v15 = vmul.f32 %v3842_v20, %v700_v62  ;;  %v909_v60 = vld [vmem:[#allocation8 + $0x2a8] sm:$0xff]  ;;  %v910_v62 = vld [vmem:[#allocation8 + $0x2b0] sm:$0xff]  ;;  %2801 = vmatpush3.msra.mxu1 %v865_v46  ;;  %v884_v59 = vld [vmem:[#allocation8 + $0x1e0] sm:$0xff] }
 0x248   : > { %v701_v54 = vsub.f32 %v3912_v56, %v693_v53  ;;  %v722_v16 = vmul.f32 %v3939_v11, %v3939_v11  ;;  %v862_v53 = vld [vmem:[#allocation8 + $0x130] sm:$0xff]  ;;  %958 = vmatprep.subr.mxu0 %v909_v60  ;;  %2802 = vmatprep.subr.mxu1 %v910_v62  ;;  %v883_v62 = vld [vmem:[#allocation8 + $0x1d8] sm:$0xff] }
 0x249   : > { %v702_v17 = vsub.f32 %v3915_v58, %v694_v14  ;;  %v684_v18 = vpop.xlane.xlu1 %683  ;;  %v716_v19 = vmul.f32 %v3942_v15, %v3942_v15  ;;  %v906_v3 = vld [vmem:[#allocation8 + $0x290] sm:$0xff]  ;;  %v907_v14 = vld [vmem:[#allocation8 + $0x298] sm:$0xff]  ;;  %959 = vmatpush2.msra.mxu0 %v908_v48  ;;  %2803 = vmatpush3.msra.mxu1 %v862_v53  ;;  %v881_v48 = vld [vmem:[#allocation8 + $0x1c8] sm:$0xff] }
 0x24a   : > { %v695_v21 = vmul.f32 0.03125, %v684_v18  ;;  %v686_v22 = vpop.xlane.xlu0 %685  ;;  %737 = vadd.xlane.f32.xlu1 %v722_v16  ;;  %v3951_v23 = vmul.f32 %v3842_v20, %v701_v54  ;;  %v905_v54 = vld [vmem:[#allocation8 + $0x288] sm:$0xff]  ;;  %v859_v16 = vld [vmem:[#allocation8 + $0x118] sm:$0xff]  ;;  %960 = vmatprep.subr.mxu0 %v906_v3  ;;  %v904_v18 = vld [vmem:[#allocation8 + $0x280] sm:$0xff] }
 0x24b   : > { %v696_v24 = vmul.f32 0.03125, %v686_v22  ;;  %725 = vadd.xlane.f32.xlu0 %v716_v19  ;;  %v3954_v25 = vmul.f32 %v3842_v20, %v702_v17  ;;  %v903_v17 = vld [vmem:[#allocation8 + $0x278] sm:$0xff]  ;;  %2804 = vmatprep.subr.mxu1 %v907_v14  ;;  %v902_v19 = vld [vmem:[#allocation8 + $0x270] sm:$0xff]  ;;  %v900_v22 = vld [vmem:[#allocation8 + $0x260] sm:$0xff] }
 0x24c   : > { %v703_v27 = vsub.f32 %v3920_v61, %v695_v21  ;;  %v717_v29 = vmul.f32 %v3951_v23, %v3951_v23  ;;  %961 = vmatpush2.msra.mxu0 %v905_v54  ;;  %v856_v21 = vld [vmem:[#allocation8 + $0x100] sm:$0xff]  ;;  %2805 = vmatpush3.msra.mxu1 %v859_v16  ;;  %v838_v46 = vld [vmem:[#allocation8 + $0x70] sm:$0xff]  ;;  %v835_v53 = vld [vmem:[#allocation8 + $0x58] sm:$0xff] }
 0x24d   : > { %v704_v30 = vsub.f32 %v3923_v63, %v696_v24  ;;  %v688_v31 = vpop.xlane.xlu1 %687  ;;  %v718_v32 = vmul.f32 %v3954_v25, %v3954_v25  ;;  %962 = vmatprep.subr.mxu0 %v903_v17  ;;  %v901_v24 = vld [vmem:[#allocation8 + $0x268] sm:$0xff]  ;;  %2806 = vmatprep.subr.mxu1 %v904_v18  ;;  %v882_v60 = vld [vmem:[#allocation8 + $0x1d0] sm:$0xff]  ;;  %v879_v3 = vld [vmem:[#allocation8 + $0x1b8] sm:$0xff] }
 0x24e   : > { %v697_v33 = vmul.f32 0.03125, %v688_v31  ;;  %727 = vadd.xlane.f32.xlu1 %v717_v29  ;;  %v3963_v34 = vmul.f32 %v3842_v20, %v703_v27  ;;  %963 = vmatpush2.msra.mxu0 %v902_v19  ;;  %v899_v27 = vld [vmem:[#allocation8 + $0x258] sm:$0xff]  ;;  %v853_v29 = vld [vmem:[#allocation8 + $0xe8] sm:$0xff]  ;;  %v898_v31 = vld [vmem:[#allocation8 + $0x250] sm:$0xff] }
 0x24f   : > { %729 = vadd.xlane.f32.xlu0 %v718_v32  ;;  %v3966_v35 = vmul.f32 %v3842_v20, %v704_v30  ;;  %2807 = vmatpush3.msra.mxu1 %v856_v21  ;;  %v897_v30 = vld [vmem:[#allocation8 + $0x248] sm:$0xff]  ;;  %v896_v32 = vld [vmem:[#allocation8 + $0x240] sm:$0xff]  ;;  %v878_v54 = vld [vmem:[#allocation8 + $0x1b0] sm:$0xff] }
 0x250   : > { %v705_v37 = vsub.f32 %v3927_v0, %v697_v33  ;;  %v719_v39 = vmul.f32 %v3963_v34, %v3963_v34  ;;  %964 = vmatprep.subr.mxu0 %v900_v22  ;;  %2808 = vmatprep.subr.mxu1 %v901_v24  ;;  %v850_v33 = vld [vmem:[#allocation8 + $0xd0] sm:$0xff]  ;;  %v880_v14 = vld [vmem:[#allocation8 + $0x1c0] sm:$0xff]  ;;  %v877_v18 = vld [vmem:[#allocation8 + $0x1a8] sm:$0xff] }
 0x251   : > { %v720_v43 = vmul.f32 %v3966_v35, %v3966_v35  ;;  %965 = vmatpush2.msra.mxu0 %v899_v27  ;;  %2809 = vmatpush3.msra.mxu1 %v853_v29  ;;  %v832_v16 = vld [vmem:[#allocation8 + $0x40] sm:$0xff]  ;;  %v875_v19 = vld [vmem:[#allocation8 + $0x198] sm:$0xff]  ;;  %v829_v21 = vld [vmem:[#allocation8 + $0x28] sm:$0xff] }
 0x252   : > { %731 = vadd.xlane.f32.xlu1 %v719_v39  ;;  %v3974_v26 = vmul.f32 %v3842_v20, %v705_v37  ;;  %966 = vmatprep.subr.mxu0 %v897_v30  ;;  %v894_v37 = vld [vmem:[#allocation8 + $0x230] sm:$0xff]  ;;  %v895_v39 = vld [vmem:[#allocation8 + $0x238] sm:$0xff]  ;;  %v876_v17 = vld [vmem:[#allocation8 + $0x1a0] sm:$0xff] }
 0x253   : > { %733 = vadd.xlane.f32.xlu0 %v720_v43  ;;  %2810 = vmatprep.subr.mxu1 %v898_v31  ;;  %v891_v43 = vld [vmem:[#allocation8 + $0x218] sm:$0xff]  ;;  %v873_v22 = vld [vmem:[#allocation8 + $0x188] sm:$0xff]  ;;  %v874_v24 = vld [vmem:[#allocation8 + $0x190] sm:$0xff] }
 0x254   : > { %v721_v28 = vmul.f32 %v3974_v26, %v3974_v26  ;;  %967 = vmatpush2.msra.mxu0 %v896_v32  ;;  %2811 = vmatpush3.msra.mxu1 %v850_v33  ;;  %v872_v27 = vld [vmem:[#allocation8 + $0x180] sm:$0xff]  ;;  %v826_v29 = vld [vmem:[#allocation8 + $0x10] sm:$0xff] }
 0x255   : > { %968 = vmatprep.subr.mxu0 %v894_v37  ;;  %2812 = vmatprep.subr.mxu1 %v895_v39 }
 0x256   : > { %735 = vadd.xlane.f32.xlu1 %v721_v28  ;;  %969 = vmatpush2.msra.mxu0 %v893_v41  ;;  %v841_v28 = vld [vmem:[#allocation8 + $0x88] sm:$0xff] }
 0x257   : > { %2813 = vmatpush3.msra.mxu1 %v847_v42  ;;  %970 = vmatprep.subr.mxu0 %v891_v43 }
 0x258   : > { %2814 = vmatprep.subr.mxu1 %v892_v44  ;;  %971 = vmatpush2.msra.mxu0 %v890_v45 }
 0x259   : > { %2815 = vmatpush3.msra.mxu1 %v844_v49  ;;  %972 = vmatprep.subr.mxu0 %v888_v51 }
 0x25a   : > { %2816 = vmatprep.subr.mxu1 %v889_v52  ;;  %973 = vmatpush2.msra.mxu0 %v887_v36 }
 0x25b   : > { %2817 = vmatpush3.msra.mxu1 %v841_v28  ;;  %974 = vmatprep.subr.mxu0 %v885_v55 }
 0x25c   : > { %2818 = vmatprep.subr.mxu1 %v886_v57  ;;  %975 = vmatpush2.msra.mxu0 %v884_v59 }
 0x25d   : > { %2819 = vmatpush3.msra.mxu1 %v838_v46  ;;  %976 = vmatprep.subr.mxu0 %v882_v60 }
 0x25e   : > { %2820 = vmatprep.subr.mxu1 %v883_v62  ;;  %977 = vmatpush2.msra.mxu0 %v881_v48 }
 0x25f   : > { %2821 = vmatpush3.msra.mxu1 %v835_v53  ;;  %978 = vmatprep.subr.mxu0 %v879_v3  ;;  %v2761_v3 = vld [vmem:[%s4535_s3] ss:$0 sm:$0xff] }
 0x260   : > { %2822 = vmatprep.subr.mxu1 %v880_v14  ;;  %979 = vmatpush2.msra.mxu0 %v878_v54 }
 0x261   : > { %2823 = vmatpush3.msra.mxu1 %v832_v16  ;;  %980 = vmatprep.subr.mxu0 %v876_v17 }
 0x262   : > { %2824 = vmatprep.subr.mxu1 %v877_v18  ;;  %981 = vmatpush2.msra.mxu0 %v875_v19  ;;  %v2762_v18 = vld [vmem:[%s4536_s4] ss:$0 sm:$0xff] }
 0x263   : > { %2825 = vmatpush3.msra.mxu1 %v829_v21  ;;  %982 = vmatprep.subr.mxu0 %v873_v22  ;;  %v3987_v22 = vshrl.u32 %v517_v13, 7 }
 0x264   : > { %2826 = vmatprep.subr.mxu1 %v874_v24  ;;  %983 = vmatpush2.msra.mxu0 %v872_v27 }
 0x265   : > { %2827 = vmatpush3.msra.mxu1 %v826_v29  ;;  %4611 = vst [vmem:[#allocation34_spill] sm:$0xff] %v3987_v22  ;;  %vm807_vm1 = vcmp.lt.s32.totalorder %v3987_v22, 1  ;;  %vm2795_vm2 = vcmp.ne.s32.totalorder %v3987_v22, 0 }
 0x2cf   : > { %v724_v30 = vpop.xlane.xlu0 %723 }
 0x2d0   : > { %v739_v31 = vmul.f32 0.03125, %v724_v30 }
 0x2d2   : > { %v747_v32 = vadd.f32 1e-05, %v739_v31 }
 0x2d3   : > { %v738_v33 = vpop.xlane.xlu1 %737 }
 0x2d4   : > { %3135 = vrsqrt.f32 %v747_v32  ;;  %v746_v37 = vmul.f32 0.03125, %v738_v33  ;;  %v726_v39 = vpop.xlane.xlu0 %725 }
 0x2d5   : > { %v740_v41 = vmul.f32 0.03125, %v726_v39 }
 0x2d6   : > { %v754_v42 = vadd.f32 1e-05, %v746_v37 }
 0x2d7   : > { %v748_v43 = vadd.f32 1e-05, %v740_v41  ;;  %v728_v44 = vpop.xlane.xlu1 %727 }
 0x2d8   : > { %3137 = vrsqrt.f32 %v754_v42  ;;  %v741_v45 = vmul.f32 0.03125, %v728_v44  ;;  %v730_v49 = vpop.xlane.xlu0 %729 }
 0x2d9   : > { %3139 = vrsqrt.f32 %v748_v43  ;;  %v742_v51 = vmul.f32 0.03125, %v730_v49 }
 0x2da   : > { %v749_v52 = vadd.f32 1e-05, %v741_v45 }
 0x2db   : > { %v750_v36 = vadd.f32 1e-05, %v742_v51  ;;  %v732_v28 = vpop.xlane.xlu1 %731 }
 0x2dc   : > { %3141 = vrsqrt.f32 %v749_v52  ;;  %v743_v55 = vmul.f32 0.03125, %v732_v28  ;;  %v734_v57 = vpop.xlane.xlu0 %733 }
 0x2dd   : > { %3143 = vrsqrt.f32 %v750_v36  ;;  %v744_v59 = vmul.f32 0.03125, %v734_v57 }
 0x2de   : > { %v751_v46 = vadd.f32 1e-05, %v743_v55 }
 0x2df   : > { %v752_v60 = vadd.f32 1e-05, %v744_v59  ;;  %v736_v62 = vpop.xlane.xlu1 %735 }
 0x2e0   : > { %3145 = vrsqrt.f32 %v751_v46  ;;  %v745_v48 = vmul.f32 0.03125, %v736_v62 }
 0x2e1   : > { %v3136_v53 = vpop.eup %3135  ;;  %3147 = vrsqrt.f32 %v752_v60 }
 0x2e2   : > { %v753_v14 = vadd.f32 1e-05, %v745_v48  ;;  %v763_v54 = vmul.f32 %v3136_v53, %v3932_v38 }
 0x2e4   : > { %3149 = vrsqrt.f32 %v753_v14  ;;  %v777_v16 = vmul.f32 %v2761_v3, %v763_v54 }
 0x2e5   : > { %v3138_v17 = vpop.eup %3137 }
 0x2e6   : > { %v3140_v19 = vpop.eup %3139  ;;  %v770_v21 = vmul.f32 %v3138_v17, %v3939_v11  ;;  %v791_v29 = vadd.f32 %v2762_v18, %v777_v16 }
 0x2e7   : > { %v764_v24 = vmul.f32 %v3140_v19, %v3942_v15 }
 0x2e8   : > { %v784_v27 = vmul.f32 %v2761_v3, %v770_v21  ;;  %v799_v11 = vrot.slane %v791_v29, 7 }
 0x2e9   : > { %v3142_v30 = vpop.eup %3141  ;;  %v778_v31 = vmul.f32 %v2761_v3, %v764_v24 }
 0x2ea   : > { %v3144_v38 = vpop.eup %3143  ;;  %v3990_v32 = vadd.f32 %v2762_v18, %v784_v27  ;;  %v765_v33 = vmul.f32 %v3142_v30, %v3951_v23 }
 0x2eb   : > { %v792_v37 = vadd.f32 %v2762_v18, %v778_v31  ;;  %v766_v39 = vmul.f32 %v3144_v38, %v3954_v25 }
 0x2ec   : > { %v806_v13 = vrot.slane %v3990_v32, 7  ;;  %v779_v15 = vmul.f32 %v2761_v3, %v765_v33 }
 0x2ed   : > { %v3146_v41 = vpop.eup %3145  ;;  %v800_v42 = vrot.slane %v792_v37, 7  ;;  %v780_v43 = vmul.f32 %v2761_v3, %v766_v39 }
 0x2ee   : > { %v3148_v44 = vpop.eup %3147  ;;  %v815_v45 = vsel %vm807_vm1, %v806_v13, %v799_v11  ;;  %v793_v49 = vadd.f32 %v2762_v18, %v779_v15  ;;  %v767_v23 = vmul.f32 %v3146_v41, %v3963_v34 }
 0x2ef   : > { %2764 = vmatprep.mubr.msk.f32.mxu0 %vm2795_vm2, %v815_v45  ;;  %2766 = vmatprep.mubr.msk.f32.mxu1 %vm2795_vm2, %v815_v45  ;;  %v768_v25 = vmul.f32 %v3148_v44, %v3966_v35  ;;  %v814_v51 = vsel %vm807_vm1, %v799_v11, %v800_v42  ;;  %v794_v36 = vadd.f32 %v2762_v18, %v780_v43 }
 0x2f0   : > { %985 = vmatmul.mubr.f32.vlgmr.msra.gmra.mxu0 %v791_v29  ;;  %1098 = vmatmul.mubr.f32.vlgmr.msra.gmra.mxu1 %v791_v29  ;;  %v801_v52 = vrot.slane %v793_v49, 7  ;;  %v781_v28 = vmul.f32 %v2761_v3, %v767_v23 }
 0x2f1   : > { %v3150_v55 = vpop.eup %3149  ;;  %990 = vmatprep.mubr.f32.mxu0 %v814_v51  ;;  %1102 = vmatprep.mubr.f32.mxu1 %v814_v51  ;;  %v782_v34 = vmul.f32 %v2761_v3, %v768_v25  ;;  %v802_v59 = vrot.slane %v794_v36, 7 }
 0x2f2   : > { %v813_v57 = vsel %vm807_vm1, %v800_v42, %v801_v52  ;;  %v795_v46 = vadd.f32 %v2762_v18, %v781_v28  ;;  %v769_v35 = vmul.f32 %v3150_v55, %v3974_v26 }
 0x2f3   : > { %v812_v60 = vsel %vm807_vm1, %v801_v52, %v802_v59  ;;  %v796_v48 = vadd.f32 %v2762_v18, %v782_v34 }
 0x2f4   : > { %991 = vmatmul.mubr.f32.gmra.mxu0 %v792_v37  ;;  %1103 = vmatmul.mubr.f32.gmra.mxu1 %v792_v37  ;;  %v803_v62 = vrot.slane %v795_v46, 7  ;;  %v783_v53 = vmul.f32 %v2761_v3, %v769_v35 }
 0x2f5   : > { %996 = vmatprep.mubr.f32.mxu0 %v813_v57  ;;  %1107 = vmatprep.mubr.f32.mxu1 %v813_v57  ;;  %v804_v54 = vrot.slane %v796_v48, 7 }
 0x2f6   : > { %v811_v14 = vsel %vm807_vm1, %v802_v59, %v803_v62  ;;  %v797_v16 = vadd.f32 %v2762_v18, %v783_v53 }
 0x2f7   : > { %v810_v26 = vsel %vm807_vm1, %v803_v62, %v804_v54 }
 0x2f8   : > { %997 = vmatmul.mubr.f32.gmra.mxu0 %v793_v49  ;;  %1108 = vmatmul.mubr.f32.gmra.mxu1 %v793_v49  ;;  %v805_v17 = vrot.slane %v797_v16, 7 }
 0x2f9   : > { %1002 = vmatprep.mubr.f32.mxu0 %v812_v60  ;;  %1112 = vmatprep.mubr.f32.mxu1 %v812_v60 }
 0x2fa   : > { %v809_v3 = vsel %vm807_vm1, %v804_v54, %v805_v17  ;;  %v808_v18 = vsel %vm807_vm1, %v805_v17, %v806_v13 }
 0x2fc   : > { %1003 = vmatmul.mubr.f32.gmra.mxu0 %v794_v36  ;;  %1113 = vmatmul.mubr.f32.gmra.mxu1 %v794_v36 }
 0x2fd   : > { %1008 = vmatprep.mubr.f32.mxu0 %v811_v14  ;;  %1117 = vmatprep.mubr.f32.mxu1 %v811_v14 }
 0x300   : > { %1009 = vmatmul.mubr.f32.gmra.mxu0 %v795_v46  ;;  %1118 = vmatmul.mubr.f32.gmra.mxu1 %v795_v46 }
 0x301   : > { %1014 = vmatprep.mubr.f32.mxu0 %v810_v26  ;;  %1122 = vmatprep.mubr.f32.mxu1 %v810_v26 }
 0x304   : > { %1015 = vmatmul.mubr.f32.gmra.mxu0 %v796_v48  ;;  %1123 = vmatmul.mubr.f32.gmra.mxu1 %v796_v48 }
 0x305   : > { %1020 = vmatprep.mubr.f32.mxu0 %v809_v3  ;;  %1127 = vmatprep.mubr.f32.mxu1 %v809_v3 }
 0x308   : > { %1021 = vmatmul.mubr.f32.gmra.mxu0 %v797_v16  ;;  %1128 = vmatmul.mubr.f32.gmra.mxu1 %v797_v16 }
 0x309   : > { %1026 = vmatprep.mubr.f32.mxu0 %v808_v18  ;;  %1132 = vmatprep.mubr.f32.mxu1 %v808_v18 }
 0x30c   : > { %1027 = vmatmul.mubr.f32.gmra.mxu0 %v3990_v32  ;;  %1133 = vmatmul.mubr.f32.gmra.mxu1 %v3990_v32 }
 0x3b0   : > { %v986_v19 = vpop.f32.mrf.mxu0  ;;  %v2828_v21 = vpop.f32.mrf.mxu1 }
 0x3b1   : > { %1138 = vst [vmem:[#allocation2] sm:$0xff] %v986_v19 }
 0x3b2   : > { %v988_v24 = vpop.f32.mrf.mxu0  ;;  %v2829_v27 = vpop.f32.mrf.mxu1 }
 0x3b3   : > { %1146 = vst [vmem:[#allocation3] sm:$0xff] %v988_v24  ;;  %v2830_v29 = vadd.f32 %v2829_v27, %v2828_v21 }
 0x3b4   : > { %v992_v30 = vpop.f32.mrf.mxu0  ;;  %v2831_v31 = vpop.f32.mrf.mxu1 }
 0x3b5   : > { %v2767_v38 = vmul.f32 -1.442695, %v2830_v29  ;;  %1139 = vst [vmem:[#allocation2 + $0x8] sm:$0xff] %v992_v30 }
 0x3b6   : > { %v994_v33 = vpop.f32.mrf.mxu0  ;;  %v2832_v37 = vpop.f32.mrf.mxu1 }
 0x3b7   : > { %3151 = vpow2.f32 %v2767_v38  ;;  %1147 = vst [vmem:[#allocation3 + $0x8] sm:$0xff] %v994_v33  ;;  %v2833_v39 = vadd.f32 %v2832_v37, %v2831_v31 }
 0x3b8   : > { %v998_v11 = vpop.f32.mrf.mxu0  ;;  %v2834_v13 = vpop.f32.mrf.mxu1 }
 0x3b9   : > { %v2768_v15 = vmul.f32 -1.442695, %v2833_v39  ;;  %1140 = vst [vmem:[#allocation2 + $0x10] sm:$0xff] %v998_v11 }
 0x3ba   : > { %v1000_v32 = vpop.f32.mrf.mxu0  ;;  %v2835_v41 = vpop.f32.mrf.mxu1 }
 0x3bb   : > { %3153 = vpow2.f32 %v2768_v15  ;;  %1148 = vst [vmem:[#allocation3 + $0x10] sm:$0xff] %v1000_v32  ;;  %v2836_v42 = vadd.f32 %v2835_v41, %v2834_v13 }
 0x3bc   : > { %v1004_v43 = vpop.f32.mrf.mxu0  ;;  %v2837_v44 = vpop.f32.mrf.mxu1 }
 0x3bd   : > { %v2769_v45 = vmul.f32 -1.442695, %v2836_v42  ;;  %1141 = vst [vmem:[#allocation2 + $0x18] sm:$0xff] %v1004_v43 }
 0x3be   : > { %v1006_v49 = vpop.f32.mrf.mxu0  ;;  %v2838_v23 = vpop.f32.mrf.mxu1 }
 0x3bf   : > { %3155 = vpow2.f32 %v2769_v45  ;;  %1149 = vst [vmem:[#allocation3 + $0x18] sm:$0xff] %v1006_v49  ;;  %v2839_v25 = vadd.f32 %v2838_v23, %v2837_v44 }
 0x3c0   : > { %v1010_v51 = vpop.f32.mrf.mxu0  ;;  %v2840_v52 = vpop.f32.mrf.mxu1 }
 0x3c1   : > { %v2770_v36 = vmul.f32 -1.442695, %v2839_v25  ;;  %1142 = vst [vmem:[#allocation2 + $0x20] sm:$0xff] %v1010_v51 }
 0x3c2   : > { %v1012_v28 = vpop.f32.mrf.mxu0  ;;  %v2841_v55 = vpop.f32.mrf.mxu1 }
 0x3c3   : > { %3157 = vpow2.f32 %v2770_v36  ;;  %1150 = vst [vmem:[#allocation3 + $0x20] sm:$0xff] %v1012_v28  ;;  %v2842_v34 = vadd.f32 %v2841_v55, %v2840_v52 }
 0x3c4   : > { %v3152_v57 = vpop.eup %3151  ;;  %v1016_v59 = vpop.f32.mrf.mxu0 }
 0x3c5   : > { %v2843_v46 = vpop.f32.mrf.mxu1  ;;  %v1178_v35 = vadd.f32 1.0, %v3152_v57  ;;  %v2771_v60 = vmul.f32 -1.442695, %v2842_v34  ;;  %1143 = vst [vmem:[#allocation2 + $0x28] sm:$0xff] %v1016_v59  ;;  %v4042_v34 = vmov -1e+38  }
 0x3c6   : > { %v1018_v62 = vpop.f32.mrf.mxu0  ;;  %v4044_v57 = vmov 0.0   ;;  %v4046_v59 = vmov 0.0  }
 0x3c7   : > { %v2844_v48 = vpop.f32.mrf.mxu1  ;;  %3159 = vrcp.f32 %v1178_v35  ;;  %1151 = vst [vmem:[#allocation3 + $0x28] sm:$0xff] %v1018_v62 }
 0x3c8   : > { %v2845_v53 = vadd.f32 %v2844_v48, %v2843_v46  ;;  %v3154_v14 = vpop.eup %3153  ;;  %3161 = vpow2.f32 %v2771_v60  ;;  %v1022_v54 = vpop.f32.mrf.mxu0 }
 0x3c9   : > { %v2846_v16 = vpop.f32.mrf.mxu1  ;;  %v1179_v26 = vadd.f32 1.0, %v3154_v14  ;;  %1144 = vst [vmem:[#allocation2 + $0x30] sm:$0xff] %v1022_v54 }
 0x3ca   : > { %v2772_v17 = vmul.f32 -1.442695, %v2845_v53  ;;  %v1024_v3 = vpop.f32.mrf.mxu0 }
 0x3cb   : > { %v2847_v18 = vpop.f32.mrf.mxu1  ;;  %3163 = vrcp.f32 %v1179_v26  ;;  %1152 = vst [vmem:[#allocation3 + $0x30] sm:$0xff] %v1024_v3 }
 0x3cc   : > { %v2848_v19 = vadd.f32 %v2847_v18, %v2846_v16  ;;  %v3156_v21 = vpop.eup %3155  ;;  %3165 = vpow2.f32 %v2772_v17  ;;  %v1028_v24 = vpop.f32.mrf.mxu0 }
 0x3cd   : > { %v2849_v27 = vpop.f32.mrf.mxu1  ;;  %v1180_v29 = vadd.f32 1.0, %v3156_v21  ;;  %1145 = vst [vmem:[#allocation2 + $0x38] sm:$0xff] %v1028_v24 }
 0x3ce   : > { %v2773_v30 = vmul.f32 -1.442695, %v2848_v19  ;;  %v1030_v31 = vpop.f32.mrf.mxu0 }
 0x3cf   : > { %v2850_v38 = vpop.f32.mrf.mxu1  ;;  %3167 = vrcp.f32 %v1180_v29  ;;  %1153 = vst [vmem:[#allocation3 + $0x38] sm:$0xff] %v1030_v31 }
 0x3d0   : > { %v2851_v33 = vadd.f32 %v2850_v38, %v2849_v27  ;;  %v3158_v37 = vpop.eup %3157  ;;  %3169 = vpow2.f32 %v2773_v30 }
 0x3d1   : > { %v1181_v39 = vadd.f32 1.0, %v3158_v37 }
 0x3d2   : > { %v2774_v11 = vmul.f32 -1.442695, %v2851_v33 }
 0x3d3   : > { %3171 = vrcp.f32 %v1181_v39 }
 0x3d4   : > { %v4022_v13 = vpop.eup %3159  ;;  %3173 = vpow2.f32 %v2774_v11 }
 0x3d5   : > { %v3162_v15 = vpop.eup %3161 }
 0x3d6   : > { %v1182_v32 = vadd.f32 1.0, %v3162_v15 }
 0x3d8   : > { %v4024_v41 = vpop.eup %3163  ;;  %3175 = vrcp.f32 %v1182_v32 }
 0x3d9   : > { %v3166_v42 = vpop.eup %3165 }
 0x3da   : > { %v1183_v43 = vadd.f32 1.0, %v3166_v42 }
 0x3dc   : > { %v4026_v44 = vpop.eup %3167  ;;  %3177 = vrcp.f32 %v1183_v43 }
 0x3dd   : > { %v3170_v45 = vpop.eup %3169 }
 0x3de   : > { %v1184_v49 = vadd.f32 1.0, %v3170_v45 }
 0x3e0   : > { %v4028_v23 = vpop.eup %3171  ;;  %3179 = vrcp.f32 %v1184_v49 }
 0x3e1   : > { %v3174_v25 = vpop.eup %3173 }
 0x3e2   : > { %v1185_v51 = vadd.f32 1.0, %v3174_v25 }
 0x3e4   : > { %3181 = vrcp.f32 %v1185_v51 }
 0x3e5   : > { %v4030_v52 = vpop.eup %3175 }
 0x3e9   : > { %v4032_v36 = vpop.eup %3177 }
 0x3ed   : > { %v4034_v28 = vpop.eup %3179 }
 0x3f1   : > { %v4036_v55 = vpop.eup %3181 }
 0x3f2 LB: >> { %v4612_v12 = vld [vmem:[#allocation30_spill] sm:$0xff]  ;;  %v4613_v1 = vld [vmem:[#allocation21_spill] sm:$0xff]  ;;  %v3563_v46 = vmov 1966171168   ;;  %s4061_s12 = sshll.u32 %s3549_s16, 3  ;;  %vm1891_vm3 = vcmask 1040384   ;;  %v3545_v59 = vphi %v4046_v59, %v1827_v59   ;;  %v3541_v57 = vphi %v4044_v57, %v1848_v57   ;;  %v3537_v34 = vphi %v4042_v34, %v4615_v34   ;;  %s3549_s16 = sphi %s4048_s16, %s1212_s16  }
 0x3f3   : >> { %v4614_v22 = vld [vmem:[#allocation34_spill] sm:$0xff]  ;;  %v1251_v35 = vunpack.c.l.s4 %v3563_v46  ;;  %v1236_v60 = vadd.f32 %v3537_v34, %v4612_v12  ;;  %s1217_s30 = scalar_lea.vmem [#allocation2], %s4061_s12  ;;  %s1219_s17 = scalar_lea.vmem [#allocation3], %s4061_s12  ;;  %vm1893_vm4 = vcmask 1041408   ;;  %vm1895_vm5 = vcmask 1042432  }
 0x3f4   : >> { %v4065_v48 = vld [vmem:[%s1217_s30] sm:$0xff]  ;;  %v4080_v30 = vsub.s32 0, %v4614_v22  ;;  %vm1897_vm6 = vcmask 1043456   ;;  %vm1899_vm7 = vcmask 1044480   ;;  %vm1901_vm8 = vcmask 1045504   ;;  %s1905_s19 = scalar_lea.vmem [#allocation4], %s4061_s12 }
 0x3f5   : >> { %v1252_v62 = vunpack.c.0.s8 %v1251_v35  ;;  %v1221_v53 = vadd.f32 %v4065_v48, %v4613_v1  ;;  %v1237_v54 = vmax.f32 %v1236_v60, %v4065_v48  ;;  %v1511_v51 = vcombine.high %v4065_v48, %v4065_v48  ;;  %s1212_s16 = sadd.s32 1, %s3549_s16  }
 0x3f6   : >> { %vm1903_vm9 = vcmask 1046528   ;;  %p1209_p12 = scmp.ge.s32.totalorder %s1212_s16, 8  }
 0x3f7   : >> { %v4070_v14 = vsub.s32 %v1252_v62, %v4614_v22  ;;  %v1222_v26 = vmax.f32 %v3537_v34, %v1221_v53  ;;  %v1238_v17 = vsub.f32 %v1236_v60, %v1237_v54  ;;  %v1312_v18 = vadd.f32 %v1237_v54, %v4612_v12  ;;  %s2794_s21 = sshll.u32 (%p1209_p12), %s3658_s29, 10  ;;  %s2610_s10 = sshll.u32 (%p1209_p12), %s4040_s7, 4  ;;  %s4486_s10 = int_to_ptr.vmem [resolvable:$true] %s2610_s10 }
 0x3f8   : >> { %v1241_v19 = vsub.f32 %v4065_v48, %v1237_v54  ;;  %s4627_s16 = sld [smem:[#allocation39_spill]] (%p1209_p12)  ;;  %s2597_s29 = scalar_lea.sflag (%p1209_p12), [#allocation7], %s3789_s11 }
 0x3f9   : >> { %v1256_v16 = vrot.slane %v4065_v48, %v4070_v14  ;;  %v1223_v24 = vsub.f32 %v3537_v34, %v1222_v26  ;;  %v1239_v27 = vmul.f32 1.442695, %v1238_v17  ;;  %v1226_v15 = vsub.f32 %v1221_v53, %v1222_v26  ;;  %s3445_s30 = scalar_lea.vmem (%p1209_p12), %s4486_s10, 1024  ;;  %p4629_p9 = scmp.ne.s32.totalorder (%p1209_p12), %s4588_s13, 0 }
 0x3fa   : >> { %v1242_v38 = vmul.f32 1.442695, %v1241_v19  ;;  %p3446_p7 = scmp.ne.s32.totalorder (%p1209_p12), %s4486_s10, %s3445_s30 }
 0x3fb   : >> { %v1257_v3 = vcombine.high %v1256_v16, %v1256_v16  ;;  %v1264_v21 = vrot.slane %v1256_v16, %v4070_v14  ;;  %v1224_v37 = vmul.f32 1.442695, %v1223_v24  ;;  %3185 = vpow2.f32 %v1239_v27 }
 0x3fc   : >> { %3187 = vpow2.f32 %v1242_v38  ;;  %v1227_v34 = vmul.f32 1.442695, %v1226_v15  ;;  %p3447_p13 = pnand (%p1209_p12), %p3446_p7, %p4629_p9 }
 0x3fd   : >> { %v1271_v29 = vrot.slane %v1257_v3, %v4070_v14  ;;  %v1365_v33 = vcombine.high %v1264_v21, %v1264_v21  ;;  %3189 = vpow2.f32 %v1224_v37  ;;  %v1518_v3 = vrot.slane %v1511_v51, %v4070_v14 }
 0x3fe   : > { %s4484_s12 = scalar_lea.hbm (%p1209_p12), %s4627_s16, %s2794_s21  ;;  %p3448_p5 = pneg (%p1209_p12), %p3447_p13 }
 0x3ff   : >> { %v1313_v31 = vmax.f32 %v1312_v18, %v1271_v29  ;;  %v1273_v42 = vadd.f32 %v1271_v29, %v4613_v1  ;;  %v1367_v46 = vadd.f32 %v1365_v33, %v4613_v1  ;;  %v1437_v60 = vcombine.high %v1271_v29, %v1271_v29 }
 0x400   : >> { %v1611_v29 = vcombine.high %v1518_v3, %v1518_v3  ;;  %v1525_v37 = vrot.slane %v1518_v3, %v4070_v14 }
 0x401   : >> { %v1314_v39 = vsub.f32 %v1312_v18, %v1313_v31  ;;  %v1321_v11 = vrot.slane %v1313_v31, %v4080_v30  ;;  %v1384_v32 = vadd.f32 %v1313_v31, %v4612_v12  ;;  %v1274_v62 = vmax.f32 %v1237_v54, %v1273_v42 }
 0x402   : >> { %v1439_v17 = vadd.f32 %v1437_v60, %v4613_v1  ;;  %v1368_v18 = vmax.f32 %v1313_v31, %v1367_v46  ;;  %v4107_v51 = vrot.slane %v1611_v29, %v4070_v14 }
 0x403   : >> { %v1323_v43 = vsub.f32 %v4065_v48, %v1321_v11  ;;  %v1315_v45 = vmul.f32 1.442695, %v1314_v39  ;;  %v1385_v49 = vmax.f32 %v1384_v32, %v1365_v33  ;;  %v1275_v24 = vsub.f32 %v1237_v54, %v1274_v62 }
 0x404   : >> { %v1278_v38 = vsub.f32 %v1273_v42, %v1274_v62  ;;  %v1369_v11 = vsub.f32 %v1313_v31, %v1368_v18  ;;  %v4116_v3 = vadd.f32 %v4107_v51, %v4613_v1 }
 0x405   : >> { %v1324_v25 = vmul.f32 1.442695, %v1323_v43  ;;  %v1393_v35 = vrot.slane %v1385_v49, %v4080_v30  ;;  %v1386_v53 = vsub.f32 %v1384_v32, %v1385_v49  ;;  %v1456_v16 = vadd.f32 %v1385_v49, %v4612_v12 }
 0x406   : >> { %3191 = vpow2.f32 %v1315_v45  ;;  %v1440_v33 = vmax.f32 %v1385_v49, %v1439_v17  ;;  %v1276_v43 = vmul.f32 1.442695, %v1275_v24  ;;  %v1372_v45 = vsub.f32 %v1367_v46, %v1368_v18  ;;  %v4119_v18 = vld [vmem:[%s1219_s17] sm:$0xff]  ;;  %s3564_s17 = smov (%p1209_p12), [#allocation14]  }
 0x407   : >> { %v1395_v26 = vsub.f32 %v4065_v48, %v1393_v35  ;;  %3193 = vpow2.f32 %v1324_v25  ;;  %v4094_v21 = vmax.f32 %v1456_v16, %v1437_v60  ;;  %v1387_v27 = vmul.f32 1.442695, %v1386_v53 }
 0x408   : >> { %3195 = vpow2.f32 %v1227_v34  ;;  %v3186_v39 = vpop.eup %3185  ;;  %v4104_v25 = vadd.f32 %v1525_v37, %v4613_v1  ;;  %v1279_v35 = vmul.f32 1.442695, %v1278_v38  ;;  %v1441_v60 = vsub.f32 %v1385_v49, %v1440_v33 }
 0x409   : >> { %v1396_v19 = vmul.f32 1.442695, %v1395_v26  ;;  %v1458_v15 = vsub.f32 %v1456_v16, %v4094_v21  ;;  %v1465_v32 = vrot.slane %v4094_v21, %v4080_v30  ;;  %v1558_v54 = vadd.f32 %v4094_v21, %v4612_v12  ;;  %v3188_v31 = vpop.eup %3187 }
 0x40a   : >> { %v1247_v34 = vmul.f32 %v3541_v57, %v3186_v39  ;;  %v4112_v46 = vpop.eup %3189  ;;  %v1370_v53 = vmul.f32 1.442695, %v1369_v11  ;;  %v4123_v49 = vcombine.high %v1525_v37, %v1525_v37  ;;  %v1245_v29 = vmul.f32 %v3188_v31, %v4119_v18 }
 0x40b   : >> { %3197 = vpow2.f32 %v1396_v19  ;;  %v1467_v42 = vsub.f32 %v4065_v48, %v1465_v32  ;;  %v4110_v62 = vmax.f32 %v1558_v54, %v1525_v37  ;;  %v1459_v16 = vmul.f32 1.442695, %v1458_v15 }
 0x40c   : >> { %3199 = vpow2.f32 %v1387_v27  ;;  %v1373_v19 = vmul.f32 1.442695, %v1372_v45  ;;  %v1244_v27 = vmul.f32 %v3545_v59, %v3186_v39  ;;  %v1444_v38 = vsub.f32 %v1439_v17, %v1440_v33 }
 0x40d   : >> { %v1468_v26 = vmul.f32 1.442695, %v1467_v42  ;;  %3201 = vpow2.f32 %v1276_v43  ;;  %v1567_v24 = vrot.slane %v4110_v62, %v4080_v30  ;;  %v1232_v15 = vmul.f32 %v3541_v57, %v4112_v46 }
 0x40e   : >> { %v4129_v32 = vadd.f32 %v3188_v31, %v1247_v34  ;;  %v1442_v43 = vmul.f32 1.442695, %v1441_v60  ;;  %v1560_v42 = vsub.f32 %v1558_v54, %v4110_v62  ;;  %v1644_v39 = vadd.f32 %v4110_v62, %v4612_v12 }
 0x40f   : >> { %3203 = vpow2.f32 %v1468_v26  ;;  %v1569_v37 = vsub.f32 %v4065_v48, %v1567_v24  ;;  %v1528_v57 = vmax.f32 %v4094_v21, %v4104_v25  ;;  %v4141_v31 = vadd.f32 %v1245_v29, %v1244_v27 }
 0x410   : >> { %3205 = vpow2.f32 %v1279_v35  ;;  %v1445_v34 = vmul.f32 1.442695, %v1444_v38  ;;  %v1561_v5 = vmul.f32 1.442695, %v1560_v42 }
 0x411   : >> { %3207 = vpow2.f32 %v1459_v16  ;;  %v1570_v54 = vmul.f32 1.442695, %v1569_v37  ;;  %v1529_v29 = vsub.f32 %v4094_v21, %v1528_v57  ;;  %v1532_v38 = vsub.f32 %v4104_v25, %v1528_v57 }
 0x412   : >> { %3209 = vpow2.f32 %v1370_v53  ;;  %v4147_v53 = vmax.f32 %v1644_v39, %v4107_v51  ;;  %v1621_v21 = vmax.f32 %v4110_v62, %v4116_v3 }
 0x413   : >> { %v3192_v11 = vpop.eup %3191  ;;  %3211 = vpow2.f32 %v1373_v19  ;;  %v1530_v57 = vmul.f32 1.442695, %v1529_v29 }
 0x414   : >> { %v3194_v45 = vpop.eup %3193  ;;  %v1346_v60 = vmul.f32 %v3192_v11, %v4129_v32  ;;  %3213 = vpow2.f32 %v1442_v43  ;;  %v1653_v43 = vrot.slane %v4147_v53, %v4080_v30  ;;  %v1625_v6 = vsub.f32 %v4116_v3, %v1621_v21 }
 0x415   : >> { %v4135_v10 = vpop.eup %3195  ;;  %v1327_v17 = vmul.f32 %v3194_v45, %v4119_v18  ;;  %v1354_v33 = vrot.slane %v3194_v45, %v4070_v14  ;;  %3215 = vpow2.f32 %v1570_v54  ;;  %v1646_v54 = vsub.f32 %v1644_v39, %v4147_v53 }
 0x416   : >> { %v1233_v24 = vadd.f32 %v4135_v10, %v1232_v15  ;;  %3217 = vpow2.f32 %v1445_v34  ;;  %v4157_v15 = vadd.f32 %v4123_v49, %v4613_v1  ;;  %v1533_v34 = vmul.f32 1.442695, %v1532_v38 }
 0x417   : >> { %v1335_v35 = vrot.slane %v1327_v17, %v4070_v14  ;;  %v1355_v16 = vcombine.high %v1354_v33, %v1354_v33  ;;  %3219 = vpow2.f32 %v1561_v5  ;;  %v1622_v5 = vsub.f32 %v4110_v62, %v1621_v21 }
 0x418   : >> { %v3198_v26 = vpop.eup %3197  ;;  %3221 = vrcp.f32 %v1233_v24  ;;  %v1702_v29 = vmax.f32 %v4147_v53, %v4157_v15  ;;  %v1647_v24 = vmul.f32 1.442695, %v1646_v54  ;;  %v1773_v21 = vcombine.high %v4107_v51, %v4107_v51 }
 0x419   : >> { %v1362_v27 = vrot.slane %v1355_v16, %v4070_v14  ;;  %v1426_v19 = vrot.slane %v3198_v26, %v4070_v14  ;;  %v3200_v45 = vpop.eup %3199  ;;  %v1336_v37 = vcombine.high %v1335_v35, %v1335_v35  ;;  %v1399_v17 = vmul.f32 %v3198_v26, %v4119_v18 }
 0x41a   : >> { %v4167_v35 = vpop.eup %3201  ;;  %v1326_v16 = vmul.f32 %v3192_v11, %v4141_v31  ;;  %v1655_v26 = vsub.f32 %v4065_v48, %v1653_v43  ;;  %3223 = vpow2.f32 %v1530_v57 }
 0x41b   : >> { %v4159_v42 = vadd.f32 %v1362_v27, %v1346_v60  ;;  %v1433_v33 = vrot.slane %v1426_v19, %v4070_v14  ;;  %v1343_v60 = vrot.slane %v1336_v37, %v4070_v14  ;;  %v1407_v8 = vrot.slane %v1399_v17, %v4070_v14 }
 0x41c   : >> { %v3204_v19 = vpop.eup %3203  ;;  %3225 = vpow2.f32 %v1533_v34  ;;  %v1308_v3 = vmul.f32 %v4167_v35, %v4129_v32 }
 0x41d   : >> { %v1418_v25 = vmul.f32 %v3200_v45, %v4159_v42  ;;  %v1434_v27 = vcombine.high %v1433_v33, %v1433_v33  ;;  %v4176_v38 = vpop.eup %3205  ;;  %v1471_v11 = vmul.f32 %v3204_v19, %v4119_v18  ;;  %v1499_v37 = vrot.slane %v3204_v19, %v4070_v14 }
 0x41e   : >> { %v1656_v33 = vmul.f32 1.442695, %v1655_v26  ;;  %v4182_v9 = vpop.eup %3207  ;;  %v4186_v17 = vadd.f32 %v1343_v60, %v1326_v16  ;;  %v1623_v60 = vmul.f32 1.442695, %v1622_v5  ;;  %v1309_v51 = vadd.f32 %v4176_v38, %v1308_v3 }
 0x41f   : >> { %v4178_v39 = vadd.f32 %v1434_v27, %v1418_v25  ;;  %v4184_v43 = vpop.eup %3209  ;;  %v1500_v62 = vcombine.high %v1499_v37, %v1499_v37  ;;  %v1414_v25 = vrot.slane %v1407_v8, %v4070_v14  ;;  %v1703_v27 = vsub.f32 %v4147_v53, %v1702_v29 }
 0x420   : >> { %v4189_v7 = vpop.eup %3211  ;;  %3227 = vpow2.f32 %v1656_v33  ;;  %v1479_v57 = vrot.slane %v1471_v11, %v4070_v14  ;;  %v1718_v8 = vadd.f32 %v4147_v53, %v4612_v12  ;;  %v1398_v19 = vmul.f32 %v3200_v45, %v4186_v17 }
 0x421   : >> { %v4193_v26 = vpop.eup %3213  ;;  %v1491_v54 = vmul.f32 %v4182_v9, %v4178_v39  ;;  %v1507_v16 = vrot.slane %v1500_v62, %v4070_v14  ;;  %3229 = vpow2.f32 %v1647_v24  ;;  %v1626_v37 = vmul.f32 1.442695, %v1625_v6 }
 0x422   : >> { %v3216_v34 = vpop.eup %3215  ;;  %v1706_v33 = vsub.f32 %v4157_v15, %v1702_v29  ;;  %v1415_v5 = vcombine.high %v1414_v25, %v1414_v25  ;;  %v1704_v4 = vmul.f32 1.442695, %v1703_v27  ;;  %v1719_v32 = vmax.f32 %v1718_v8, %v4123_v49 }
 0x423   : >> { %v1508_v11 = vcombine.high %v1507_v16, %v1507_v16  ;;  %v4207_v2 = vpop.eup %3217  ;;  %v1594_v62 = vcombine.high %v3216_v34, %v3216_v34  ;;  %v1480_v24 = vcombine.high %v1479_v57, %v1479_v57  ;;  %3231 = vpow2.f32 %v1623_v60 }
 0x424   : >> { %v4210_v53 = vpop.eup %3219  ;;  %v1727_v6 = vrot.slane %v1719_v32, %v4080_v30  ;;  %v1775_v15 = vadd.f32 %v1773_v21, %v4613_v1  ;;  %v1289_v29 = vrot.slane %v4119_v18, %v4070_v14  ;;  %3233 = vpow2.f32 %v1626_v37 }
 0x425   : >> { %v1510_v22 = vadd.f32 %v1508_v11, %v1491_v54  ;;  %v1601_v45 = vrot.slane %v1594_v62, %v4070_v14  ;;  %v1707_v25 = vmul.f32 1.442695, %v1706_v33  ;;  %v1720_v27 = vsub.f32 %v1718_v8, %v1719_v32  ;;  %v4223_v16 = vpop.eup %3221 }
 0x426   : >> { %v1380_v49 = vmul.f32 %v4184_v43, %v4159_v42  ;;  %v4220_v57 = vadd.f32 %v1415_v5, %v1398_v19  ;;  %3235 = vpow2.f32 %v1704_v4  ;;  %v1729_v54 = vsub.f32 %v4065_v48, %v1727_v6 }
 0x427   : >> { %v1487_v60 = vrot.slane %v1480_v24, %v4070_v14  ;;  %v1573_v3 = vmul.f32 %v3216_v34, %v4119_v18  ;;  %v1592_v11 = vmul.f32 %v4210_v53, %v1510_v22  ;;  %v1608_v37 = vrot.slane %v1601_v45, %v4070_v14  ;;  %v4229_v62 = vpop.eup %3223 }
 0x428   : >> { %3237 = vrcp.f32 %v1309_v51  ;;  %v1730_v8 = vmul.f32 1.442695, %v1729_v54  ;;  %v1776_v33 = vmax.f32 %v1719_v32, %v1775_v15  ;;  %v1290_v42 = vcombine.high %v1289_v29, %v1289_v29 }
 0x429   : >> { %3239 = vpow2.f32 %v1707_v25  ;;  %v1721_v4 = vmul.f32 1.442695, %v1720_v27  ;;  %v1792_v19 = vadd.f32 %v1719_v32, %v4612_v12  ;;  %v4232_v5 = vpop.eup %3225  ;;  %v1381_v24 = vadd.f32 %v4189_v7, %v1380_v49 }
 0x42a   : >> { %v1452_v34 = vmul.f32 %v4193_v26, %v4178_v39  ;;  %v1470_v45 = vmul.f32 %v4182_v9, %v4220_v57  ;;  %3241 = vpow2.f32 %v1730_v8  ;;  %v1488_v6 = vcombine.high %v1487_v60, %v1487_v60 }
 0x42b   : >> { %v1575_v54 = vcombine.high %v1573_v3, %v1573_v3  ;;  %v1610_v1 = vadd.f32 %v1608_v37, %v1592_v11  ;;  %v1777_v20 = vsub.f32 %v1719_v32, %v1776_v33  ;;  %v1780_v12 = vsub.f32 %v1775_v15, %v1776_v33 }
 0x42c   : >> { %v4240_v63 = vmax.f32 %v1792_v19, %v1773_v21   ;;  %v1297_v49 = vrot.slane %v1289_v29, %v4070_v14  ;;  %v4246_v39 = vrot.slane %v1290_v42, %v4070_v14  ;;  %v1536_v9 = vcombine.high %v4119_v18, %v4119_v18 }
 0x42d   : >> { %v3228_v51 = vpop.eup %3227  ;;  %3243 = vpow2.f32 %v1721_v4  ;;  %v1453_v32 = vadd.f32 %v4207_v2, %v1452_v34  ;;  %v1554_v60 = vmul.f32 %v4229_v62, %v1510_v22  ;;  %v4253_v21 = vadd.f32 %v1488_v6, %v1470_v45 }
 0x42e   : >> { %v1659_v25 = vmul.f32 %v3228_v51, %v4119_v18  ;;  %v1681_v27 = vcombine.high %v3228_v51, %v3228_v51  ;;  %v4242_v58 = vpop.eup %3229  ;;  %3245 = vrcp.f32 %v1381_v24  ;;  %v1582_v3 = vrot.slane %v1575_v54, %v4070_v14 }
 0x42f   : >> { %v1778_v11 = vmul.f32 1.442695, %v1777_v20  ;;  %v1801_v29 = vrot.slane %v4240_v63, %v4080_v30  ;;  %v1679_v33 = vmul.f32 %v4242_v58, %v1610_v1  ;;  %v1781_v4 = vmul.f32 1.442695, %v1780_v12 }
 0x430   : >> { %v1688_v15 = vrot.slane %v1681_v27, %v4070_v14  ;;  %v4258_v37 = vpop.eup %3231  ;;  %v1661_v8 = vcombine.high %v1659_v25, %v1659_v25  ;;  %v1281_v22 = vmul.f32 %v4167_v35, %v4141_v31  ;;  %v1376_v24 = vcombine.high %v1297_v49, %v1297_v49 }
 0x431   : >> { %v1794_v34 = vsub.f32 %v1792_v19, %v4240_v63  ;;  %v1803_v45 = vsub.f32 %v4065_v48, %v1801_v29  ;;  %v4265_v51 = vpop.eup %3233  ;;  %v1306_v20 = vmul.f32 %v4176_v38, %v4246_v39  ;;  %3247 = vrcp.f32 %v1453_v32 }
 0x432   : >> { %v1689_v42 = vcombine.high %v1688_v15, %v1688_v15  ;;  %v1555_v6 = vadd.f32 %v4232_v5, %v1554_v60  ;;  %v1572_v12 = vmul.f32 %v4210_v53, %v4253_v21  ;;  %v1640_v31 = vmul.f32 %v4258_v37, %v1610_v1 }
 0x433   : >> { %v4271_v25 = vpop.eup %3235  ;;  %3249 = vpow2.f32 %v1778_v11  ;;  %v1804_v35 = vmul.f32 1.442695, %v1803_v45  ;;  %v1589_v48 = vrot.slane %v1582_v3, %v4070_v14  ;;  %v1668_v19 = vrot.slane %v1661_v8, %v4070_v14 }
 0x434   : >> { %v1696_v54 = vrot.slane %v1689_v42, %v4070_v14  ;;  %3251 = vpow2.f32 %v1781_v4  ;;  %v1543_v49 = vrot.slane %v1536_v9, %v4070_v14  ;;  %v1795_v32 = vmul.f32 1.442695, %v1794_v34 }
 0x435   : >> { %v3238_v38 = vpop.eup %3237  ;;  %3253 = vpow2.f32 %v1804_v35  ;;  %v1229_v53 = vmul.f32 %v3545_v59, %v4112_v46  ;;  %v1230_v1 = vmul.f32 %v4135_v10, %v4119_v18  ;;  %v1448_v15 = vcombine.high %v4246_v39, %v4246_v39 }
 0x436   : >> { %v1698_v27 = vadd.f32 %v1696_v54, %v1679_v33  ;;  %v4279_v60 = vpop.eup %3239  ;;  %v1307_v29 = vadd.f32 %v1306_v20, %v1281_v22  ;;  %v1375_v9 = vmul.f32 %v4184_v43, %v4186_v17  ;;  %v1378_v8 = vmul.f32 %v4189_v7, %v1376_v24 }
 0x437   : >> { %v3242_v11 = vpop.eup %3241  ;;  %v1641_v33 = vadd.f32 %v4265_v51, %v1640_v31  ;;  %3255 = vrcp.f32 %v1555_v6  ;;  %v1591_v42 = vadd.f32 %v1589_v48, %v1572_v12  ;;  %v1669_v59 = vcombine.high %v1668_v19, %v1668_v19 }
 0x438   : >> { %v1714_v3 = vmul.f32 %v4271_v25, %v1698_v27  ;;  %v1733_v46 = vmul.f32 %v3242_v11, %v4119_v18  ;;  %v1550_v10 = vrot.slane %v1543_v49, %v4070_v14  ;;  %v1755_v4 = vcombine.high %v3242_v11, %v3242_v11 }
 0x439   : >> { %3257 = vpow2.f32 %v1795_v32  ;;  %v1231_v34 = vadd.f32 %v1230_v1, %v1229_v53  ;;  %v1629_v45 = vcombine.high %v1543_v49, %v1543_v49  ;;  %v1379_v17 = vadd.f32 %v1378_v8, %v1375_v9 }
 0x43a   : >> { %v3244_v39 = vpop.eup %3243  ;;  %v1715_v22 = vadd.f32 %v4279_v60, %v1714_v3  ;;  %v1735_v20 = vcombine.high %v1733_v46, %v1733_v46  ;;  %v1450_v7 = vmul.f32 %v4207_v2, %v1448_v15  ;;  %3259 = vrcp.f32 %v1641_v33 }
 0x43b   : >> { %v3246_v43 = vpop.eup %3245  ;;  %v1762_v24 = vrot.slane %v1755_v4, %v4070_v14  ;;  %v1311_v6 = vmul.f32 %v3238_v38, %v1307_v29  ;;  %v1447_v54 = vmul.f32 %v4193_v26, %v4220_v57  ;;  %v1658_v12 = vmul.f32 %v4242_v58, %v1591_v42 }
 0x43c   : >> { %v1676_v31 = vrot.slane %v1669_v59, %v4070_v14  ;;  %v1742_v35 = vrot.slane %v1735_v20, %v4070_v14  ;;  %v1753_v48 = vmul.f32 %v3244_v39, %v1698_v27  ;;  %v1535_v49 = vmul.f32 %v4229_v62, %v4253_v21 }
 0x43d   : >> { %v1769_v19 = vrot.slane %v1762_v24, %v4070_v14  ;;  %v1552_v2 = vmul.f32 %v4232_v5, %v1550_v10  ;;  %v1636_v32 = vrot.slane %v1629_v45, %v4070_v14  ;;  %3261 = vrcp.f32 %v1715_v22 }
 0x43e   : >> { %v3248_v38 = vpop.eup %3247  ;;  %v1235_v26 = vmul.f32 %v4223_v16, %v1231_v34  ;;  %v1383_v53 = vmul.f32 %v3246_v43, %v1379_v17  ;;  %v1451_v1 = vadd.f32 %v1450_v7, %v1447_v54  ;;  %v1678_v15 = vadd.f32 %v1676_v31, %v1658_v12 }
 0x43f   : >> { %v1770_v57 = vcombine.high %v1769_v19, %v1769_v19  ;;  %v1853_v27 = vrot.slane %v1311_v6, %v4080_v30  ;;  %v1749_v11 = vrot.slane %v1742_v35, %v4070_v14  ;;  %v1553_v5 = vadd.f32 %v1552_v2, %v1535_v49 }
 0x440   : >> { %v3250_v58 = vpop.eup %3249  ;;  %v1638_v21 = vmul.f32 %v4265_v51, %v1636_v32  ;;  %v1710_v9 = vcombine.high %v1550_v10, %v1550_v10  ;;  %v1628_v16 = vmul.f32 %v4258_v37, %v1591_v42  ;;  %v1455_v46 = vmul.f32 %v3248_v38, %v1451_v1 }
 0x441   : >> { %v3252_v3 = vpop.eup %3251  ;;  %v1772_v29 = vadd.f32 %v1770_v57, %v1753_v48  ;;  %v1732_v4 = vmul.f32 %v3244_v39, %v1678_v15  ;;  %v1859_v34 = vrot.slane %v1383_v53, %v4080_v30  ;;  %v1892_v45 = vsel %vm1891_vm3, %v1235_v26, %v1853_v27 }
 0x442   : >> { %v3254_v62 = vpop.eup %3253  ;;  %v1750_v20 = vcombine.high %v1749_v11, %v1749_v11  ;;  %v1709_v10 = vmul.f32 %v4271_v25, %v1678_v15  ;;  %v1712_v37 = vmul.f32 %v4279_v60, %v1710_v9  ;;  %v1639_v42 = vadd.f32 %v1638_v21, %v1628_v16 }
 0x443   : >> { %v1788_v8 = vmul.f32 %v3250_v58, %v1772_v29  ;;  %v1807_v33 = vmul.f32 %v3254_v62, %v4119_v18  ;;  %v1830_v59 = vcombine.high %v3254_v62, %v3254_v62  ;;  %v1784_v54 = vcombine.high %v1636_v32, %v1636_v32 }
 0x444   : >> { %v3256_v22 = vpop.eup %3255  ;;  %v1865_v12 = vrot.slane %v1455_v46, %v4080_v30  ;;  %v1894_v31 = vsel %vm1893_vm4, %v1892_v45, %v1859_v34  ;;  %v1752_v35 = vadd.f32 %v1750_v20, %v1732_v4  ;;  %v1713_v49 = vadd.f32 %v1712_v37, %v1709_v10  ;;  %v1937_v46 = vld [vmem:[#allocation10 + $0x70] sm:$0xff] (%p1209_p12)  ;;  %v1935_v4 = vld [vmem:[#allocation10 + $0x60] sm:$0xff] (%p1209_p12)  ;;  %v1924_v37 = vld [vmem:[#allocation10 + $0x8] sm:$0xff] (%p1209_p12) }
 0x445   : >> { %v1789_v43 = vadd.f32 %v3252_v3, %v1788_v8  ;;  %v1809_v17 = vcombine.high %v1807_v33, %v1807_v33  ;;  %v1837_v7 = vrot.slane %v1830_v59, %v4070_v14  ;;  %v1557_v6 = vmul.f32 %v3256_v22, %v1553_v5  ;;  %v1938_v33 = vld [vmem:[#allocation10 + $0x78] sm:$0xff] (%p1209_p12)  ;;  %v1931_v20 = vld [vmem:[#allocation10 + $0x40] sm:$0xff] (%p1209_p12)  ;;  %v1925_v10 = vld [vmem:[#allocation10 + $0x10] sm:$0xff] (%p1209_p12) }
 0x446   : >> { %v3258_v51 = vpop.eup %3257  ;;  %v1896_v32 = vsel %vm1895_vm5, %v1894_v31, %v1865_v12  ;;  %v1783_v1 = vmul.f32 %v3250_v58, %v1752_v35  ;;  %v1786_v15 = vmul.f32 %v3252_v3, %v1784_v54  ;;  %v4615_v34 = vmov %v4240_v63  ;;  %2900 = vmatprep.subr.mxu1 (%p1209_p12), %v1938_v33  ;;  %v1934_v22 = vld [vmem:[#allocation10 + $0x58] sm:$0xff] (%p1209_p12) }
 0x447   : >> { %3263 = vrcp.f32 %v1789_v43  ;;  %v1816_v18 = vrot.slane %v1809_v17, %v4070_v14  ;;  %v1838_v39 = vcombine.high %v1837_v7, %v1837_v7  ;;  %v3260_v24 = vpop.eup %3259  ;;  %v1828_v19 = vmul.f32 %v3258_v51, %v1772_v29  ;;  %2901 = vmatpush3.msra.mxu1 (%p1209_p12), %v1938_v33  ;;  %v1932_v34 = vld [vmem:[#allocation10 + $0x48] sm:$0xff] (%p1209_p12)  ;;  %v1930_v43 = vld [vmem:[#allocation10 + $0x38] sm:$0xff] (%p1209_p12)  ;;  %v1929_v17 = vld [vmem:[#allocation10 + $0x30] sm:$0xff] (%p1209_p12) }
 0x448   : >> { %v1643_v2 = vmul.f32 %v3260_v24, %v1639_v42  ;;  %v1806_v38 = vmul.f32 %v3258_v51, %v1752_v35  ;;  %v1871_v53 = vrot.slane %v1557_v6, %v4080_v30  ;;  %v1787_v5 = vadd.f32 %v1786_v15, %v1783_v1  ;;  %2902 = vmatprep.subr.mxu1 (%p1209_p12), %v1937_v46  ;;  %v1928_v7 = vld [vmem:[#allocation10 + $0x28] sm:$0xff] (%p1209_p12)  ;;  %v1926_v51 = vld [vmem:[#allocation10 + $0x18] sm:$0xff] (%p1209_p12) }
 0x449   : >> { %v1817_v48 = vcombine.high %v1816_v18, %v1816_v18  ;;  %v1845_v25 = vrot.slane %v1838_v39, %v4070_v14  ;;  %2903 = vmatpush3.msra.mxu1 (%p1209_p12), %v1937_v46  ;;  %v1923_v39 = vld [vmem:[#allocation10] sm:$0xff] (%p1209_p12)  ;;  %v2219_v33 = vld [vmem:[#allocation11 + $0x88] sm:$0xff] (%p1209_p12) }
 0x44a   : >> { %v3262_v60 = vpop.eup %3261  ;;  %v1877_v29 = vrot.slane %v1643_v2, %v4080_v30  ;;  %v1898_v62 = vsel %vm1897_vm6, %v1896_v32, %v1871_v53  ;;  %v2218_v46 = vld [vmem:[#allocation11 + $0x80] sm:$0xff] (%p1209_p12) }
 0x44b   : >> { %v1824_v26 = vrot.slane %v1817_v48, %v4070_v14  ;;  %v1846_v57 = vcombine.high %v1845_v25, %v1845_v25  ;;  %v1717_v11 = vmul.f32 %v3262_v60, %v1713_v49 }
 0x44c   : >> { %v1900_v21 = vsel %vm1899_vm7, %v1898_v62, %v1877_v29  ;;  %v2229_v29 = vld [vmem:[#allocation11 + $0xd8] sm:$0xff] (%p1209_p12)  ;;  %v2228_v62 = vld [vmem:[#allocation11 + $0xd0] sm:$0xff] (%p1209_p12) }
 0x44d   : >> { %v1825_v27 = vcombine.high %v1824_v26, %v1824_v26  ;;  %v1848_v57 = vadd.f32 %v1846_v57, %v1828_v19   ;;  %v1883_v14 = vrot.slane %v1717_v11, %v4080_v30  ;;  %v2231_v11 = vld [vmem:[#allocation11 + $0xe8] sm:$0xff] (%p1209_p12) }
 0x44f   : >> { %v1827_v59 = vadd.f32 %v1825_v27, %v1806_v38   ;;  %v1902_v8 = vsel %vm1901_vm8, %v1900_v21, %v1883_v14  ;;  %v2232_v27 = vld [vmem:[#allocation11 + $0xf0] sm:$0xff] (%p1209_p12)  ;;  %v2226_v14 = vld [vmem:[#allocation11 + $0xc0] sm:$0xff] (%p1209_p12)  ;;  %v2225_v21 = vld [vmem:[#allocation11 + $0xb8] sm:$0xff] (%p1209_p12) }
 0x450   : > { %v1933_v59 = vld [vmem:[#allocation10 + $0x50] sm:$0xff] (%p1209_p12) }
 0x454   : >> { %v3264_v9 = vpop.eup %3263 }
 0x455   : >> { %v1791_v16 = vmul.f32 %v3264_v9, %v1787_v5  ;;  %v2227_v5 = vld [vmem:[#allocation11 + $0xc8] sm:$0xff] (%p1209_p12)  ;;  %v2224_v9 = vld [vmem:[#allocation11 + $0xb0] sm:$0xff] (%p1209_p12) }
 0x456   : > { %1211 = sbr.rel (!%p1209_p12) target bundleno = 1010 (0x3f2), region = 143 }
 0x457   : >> { %v1889_v58 = vrot.slane %v1791_v16, %v4080_v30  ;;  %v1936_v30 = vld [vmem:[#allocation10 + $0x68] sm:$0xff] (%p1209_p12) }
 0x458   : > { %2904 = vmatprep.subr.mxu1 (%p1209_p12), %v1936_v30  ;;  %v2223_v16 = vld [vmem:[#allocation11 + $0xa8] sm:$0xff] (%p1209_p12) }
 0x459   : >> { %v1904_v3 = vsel %vm1903_vm9, %v1902_v8, %v1889_v58  ;;  %2905 = vmatpush3.msra.mxu1 (%p1209_p12), %v1936_v30  ;;  %v2222_v8 = vld [vmem:[#allocation11 + $0xa0] sm:$0xff] (%p1209_p12)  ;;  %v2221_v58 = vld [vmem:[#allocation11 + $0x98] sm:$0xff] (%p1209_p12) }
 0x45a   : >> { %1906 = vst [vmem:[%s1905_s19] sm:$0xff] %v1904_v3  ;;  %2906 = vmatprep.subr.mxu1 (%p1209_p12), %v1935_v4  ;;  %v2220_v3 = vld [vmem:[#allocation11 + $0x90] sm:$0xff] (%p1209_p12)  ;;  %v2217_v30 = vld [vmem:[#allocation11 + $0x78] sm:$0xff] (%p1209_p12)  ;;  %s3449_s19 = sshll.u32 (%p1209_p12), %s3564_s17, 4  ;;  %s3450_s19 = int_to_ptr.vmem [resolvable:$false] %s3449_s19 }
 0x45b   : > { %2907 = vmatpush3.msra.mxu1 %v1935_v4  ;;  %v2216_v4 = vld [vmem:[#allocation11 + $0x70] sm:$0xff]  ;;  %s3451_s14 = scalar_lea.vmem %s3450_s19, 2048  ;;  %p3452_p10 = scmp.lt.s32.totalorder %s4486_s10, %s3450_s19 }
 0x45c   : > { %2908 = vmatprep.subr.mxu1 %v1934_v22  ;;  %p3453_p1 = scmp.lt.s32.totalorder %s3451_s14, %s3445_s30 }
 0x45d   : > { %2909 = vmatpush3.msra.mxu1 %v1934_v22  ;;  %v2214_v22 = vld [vmem:[#allocation11 + $0x60] sm:$0xff] }
 0x45e   : > { %2910 = vmatprep.subr.mxu1 %v1933_v59  ;;  %p3454_p2 = por %p3453_p1, %p3452_p10 }
 0x45f   : > { %2911 = vmatpush3.msra.mxu1 %v1933_v59  ;;  %v2212_v59 = vld [vmem:[#allocation11 + $0x50] sm:$0xff] }
 0x460   : > { %2912 = vmatprep.subr.mxu1 %v1932_v34  ;;  %p3455_p3 = pnand %p3454_p2, %p3448_p5 }
 0x461   : > { %v1907_v45 = vld [vmem:[#allocation4] sm:$0xff]  ;;  %2913 = vmatpush3.msra.mxu1 %v1932_v34  ;;  %v1908_v42 = vld [vmem:[#allocation4 + $0x8] sm:$0xff]  ;;  %v1909_v18 = vld [vmem:[#allocation4 + $0x10] sm:$0xff] }
 0x462   : > { %v1915_v63 = vmul.f32 %v4022_v13, %v1907_v45  ;;  %2914 = vmatprep.subr.mxu1 %v1931_v20  ;;  %v1927_v13 = vld [vmem:[#allocation10 + $0x20] sm:$0xff]  ;;  %v1916_v24 = vmul.f32 %v4024_v41, %v1908_v42  ;;  %v1917_v6 = vmul.f32 %v4026_v44, %v1909_v18  ;;  %v1910_v54 = vld [vmem:[#allocation4 + $0x18] sm:$0xff]  ;;  %v1912_v48 = vld [vmem:[#allocation4 + $0x28] sm:$0xff] }
 0x463   : > { %2915 = vmatpush3.msra.mxu1 %v1931_v20  ;;  %v1911_v12 = vld [vmem:[#allocation4 + $0x20] sm:$0xff]  ;;  %v1918_v31 = vmul.f32 %v4028_v23, %v1910_v54  ;;  %v1913_v19 = vld [vmem:[#allocation4 + $0x30] sm:$0xff]  ;;  %v1920_v25 = vmul.f32 %v4032_v36, %v1912_v48  ;;  %v1914_v49 = vld [vmem:[#allocation4 + $0x38] sm:$0xff] }
 0x464   : > { %2932 = vmatprep.mubr.f32.mxu1 %v1915_v63  ;;  %2916 = vmatprep.subr.mxu1 %v1930_v43  ;;  %v1919_v35 = vmul.f32 %v4030_v52, %v1911_v12  ;;  %v1921_v41 = vmul.f32 %v4034_v28, %v1913_v19  ;;  %v1922_v44 = vmul.f32 %v4036_v55, %v1914_v49  ;;  %v2215_v45 = vld [vmem:[#allocation11 + $0x68] sm:$0xff]  ;;  %v2213_v63 = vld [vmem:[#allocation11 + $0x58] sm:$0xff]  ;;  %v2210_v20 = vld [vmem:[#allocation11 + $0x40] sm:$0xff] }
 0x465   : > { %2917 = vmatpush3.msra.mxu1 %v1930_v43  ;;  %v2211_v34 = vld [vmem:[#allocation11 + $0x48] sm:$0xff]  ;;  %v2209_v43 = vld [vmem:[#allocation11 + $0x38] sm:$0xff] }
 0x466   : > { %2918 = vmatprep.subr.mxu1 %v1929_v17 }
 0x467   : > { %2919 = vmatpush3.msra.mxu1 %v1929_v17  ;;  %v2208_v17 = vld [vmem:[#allocation11 + $0x30] sm:$0xff] }
 0x468   : > { %2920 = vmatprep.subr.mxu1 %v1928_v7 }
 0x469   : > { %2921 = vmatpush3.msra.mxu1 %v1928_v7 }
 0x46a   : > { %2922 = vmatprep.subr.mxu1 %v1927_v13 }
 0x46b   : > { %2923 = vmatpush3.msra.mxu1 %v1927_v13 }
 0x46c   : > { %2924 = vmatprep.subr.mxu1 %v1926_v51 }
 0x46d   : > { %2925 = vmatpush3.msra.mxu1 %v1926_v51 }
 0x46e   : > { %2926 = vmatprep.subr.mxu1 %v1925_v10 }
 0x46f   : > { %2927 = vmatpush3.msra.mxu1 %v1925_v10 }
 0x470   : > { %2928 = vmatprep.subr.mxu1 %v1924_v37 }
 0x471   : > { %2929 = vmatpush3.msra.mxu1 %v1924_v37 }
 0x472   : > { %2930 = vmatprep.subr.mxu1 %v1923_v39 }
 0x473   : > { %2931 = vmatpush3.msra.mxu1 %v1923_v39  ;;  %v4618_v39 = vld [vmem:[#allocation31_spill] sm:$0xff] }
 0x474   : > { %2933 = vmatmul.mubr.f32.vlgmr.msra.gmra.mxu1 %v1916_v24 }
 0x475   : > { %2935 = vmatprep.mubr.f32.mxu1 %v1917_v6 }
 0x478   : > { %2936 = vmatmul.mubr.f32.gmra.mxu1 %v1918_v31 }
 0x479   : > { %2938 = vmatprep.mubr.f32.mxu1 %v1919_v35 }
 0x47c   : > { %2939 = vmatmul.mubr.f32.gmra.mxu1 %v1920_v25 }
 0x47d   : > { %2941 = vmatprep.mubr.f32.mxu1 %v1921_v41 }
 0x480   : > { %2942 = vmatmul.mubr.f32.gmra.mxu1 %v1922_v44 }
 0x534   : > { %v2934_v60 = vpop.f32.mrf.mxu1 }
 0x535   : > { %v4347_v23 = vadd.f32 %v2934_v60, %v3907_v50 }
 0x536   : > { %v2005_v2 = vpop.f32.mrf.mxu1 }
 0x537   : > { %v4350_v52 = vadd.f32 %v2005_v2, %v3899_v40  ;;  %2056 = vadd.xlane.f32.xlu1 %v4347_v23 }
 0x538   : > { %v2937_v36 = vpop.f32.mrf.mxu1 }
 0x539   : > { %2054 = vadd.xlane.f32.xlu0 %v4350_v52 }
 0x53a   : > { %v2015_v28 = vpop.f32.mrf.mxu1 }
 0x53b   : > { %v4355_v38 = vadd.f32 %v2015_v28, %v3912_v56  ;;  %v4616_v56 = vld [vmem:[#allocation32_spill] sm:$0xff] }
 0x53c   : > { %v2940_v55 = vpop.f32.mrf.mxu1  ;;  %v4370_v1 = vadd.f32 %v2937_v36, %v4616_v56 }
 0x53d   : > { %2058 = vadd.xlane.f32.xlu1 %v4355_v38 }
 0x53e   : > { %v2025_v26 = vpop.f32.mrf.mxu1 }
 0x53f   : > { %v4359_v50 = vadd.f32 %v2025_v26, %v3920_v61  ;;  %v4617_v61 = vld [vmem:[#allocation33_spill] sm:$0xff] }
 0x540   : > { %v2943_v57 = vpop.f32.mrf.mxu1  ;;  %v4375_v15 = vadd.f32 %v2940_v55, %v4617_v61  ;;  %v2207_v61 = vld [vmem:[#allocation11 + $0x28] sm:$0xff] }
 0x541   : > { %v4362_v40 = vadd.f32 %v2943_v57, %v3904_v47  ;;  %2062 = vadd.xlane.f32.xlu1 %v4359_v50  ;;  %v2233_v47 = vld [vmem:[#allocation11 + $0xf8] sm:$0xff] }
 0x542   : > { %v2035_v53 = vpop.f32.mrf.mxu1  ;;  %2266 = vmatprep.subr.mxu0 %v2233_v47 }
 0x543   : > { %v4366_v32 = vadd.f32 %v2035_v53, %v3927_v0  ;;  %2068 = vadd.xlane.f32.xlu0 %v4362_v40  ;;  %v2230_v0 = vld [vmem:[#allocation11 + $0xe0] sm:$0xff]  ;;  %2267 = vmatpush1.msra.mxu0 %v2232_v27 }
 0x544   : > { %2268 = vmatprep.subr.mxu0 %v2231_v11  ;;  %v2206_v11 = vld [vmem:[#allocation11 + $0x20] sm:$0xff] }
 0x545   : > { %2066 = vadd.xlane.f32.xlu1 %v4366_v32  ;;  %2269 = vmatpush1.msra.mxu0 %v2230_v0 }
 0x546   : > { %2270 = vmatprep.subr.mxu0 %v2229_v29  ;;  %v2205_v29 = vld [vmem:[#allocation11 + $0x18] sm:$0xff] }
 0x547   : > { %2060 = vadd.xlane.f32.xlu0 %v4370_v1  ;;  %2271 = vmatpush1.msra.mxu0 %v2228_v62 }
 0x548   : > { %2272 = vmatprep.subr.mxu0 %v2227_v5 }
 0x549   : > { %2273 = vmatpush1.msra.mxu0 %v2226_v14 }
 0x54a   : > { %2274 = vmatprep.subr.mxu0 %v2225_v21 }
 0x54b   : > { %2064 = vadd.xlane.f32.xlu0 %v4375_v15  ;;  %2275 = vmatpush1.msra.mxu0 %v2224_v9  ;;  %v2204_v9 = vld [vmem:[#allocation11 + $0x10] sm:$0xff] }
 0x54c   : > { %2276 = vmatprep.subr.mxu0 %v2223_v16  ;;  %v2203_v16 = vld [vmem:[#allocation11 + $0x8] sm:$0xff] }
 0x54d   : > { %2277 = vmatpush1.msra.mxu0 %v2222_v8 }
 0x54e   : > { %2278 = vmatprep.subr.mxu0 %v2221_v58  ;;  %v2202_v58 = vld [vmem:[#allocation11] sm:$0xff] }
 0x54f   : > { %2279 = vmatpush1.msra.mxu0 %v2220_v3  ;;  %v2265_v3 = vld [vmem:[#allocation11 + $0x1f8] sm:$0xff] }
 0x550   : > { %2280 = vmatprep.subr.mxu0 %v2219_v33 }
 0x551   : > { %2281 = vmatpush1.msra.mxu0 %v2218_v46 }
 0x552   : > { %2282 = vmatprep.subr.mxu0 %v2217_v30 }
 0x553   : > { %2283 = vmatpush1.msra.mxu0 %v2216_v4  ;;  %v2264_v4 = vld [vmem:[#allocation11 + $0x1f0] sm:$0xff] }
 0x554   : > { %2284 = vmatprep.subr.mxu0 %v2215_v45  ;;  %v2263_v45 = vld [vmem:[#allocation11 + $0x1e8] sm:$0xff] }
 0x555   : > { %2285 = vmatpush1.msra.mxu0 %v2214_v22  ;;  %v2262_v22 = vld [vmem:[#allocation11 + $0x1e0] sm:$0xff] }
 0x556   : > { %2286 = vmatprep.subr.mxu0 %v2213_v63  ;;  %v2261_v63 = vld [vmem:[#allocation11 + $0x1d8] sm:$0xff] }
 0x557   : > { %2287 = vmatpush1.msra.mxu0 %v2212_v59 }
 0x558   : > { %2288 = vmatprep.subr.mxu0 %v2211_v34  ;;  %v2260_v34 = vld [vmem:[#allocation11 + $0x1d0] sm:$0xff] }
 0x559   : > { %2289 = vmatpush1.msra.mxu0 %v2210_v20  ;;  %v2259_v20 = vld [vmem:[#allocation11 + $0x1c8] sm:$0xff] }
 0x55a   : > { %2290 = vmatprep.subr.mxu0 %v2209_v43  ;;  %v2258_v43 = vld [vmem:[#allocation11 + $0x1c0] sm:$0xff] }
 0x55b   : > { %2291 = vmatpush1.msra.mxu0 %v2208_v17  ;;  %v2257_v17 = vld [vmem:[#allocation11 + $0x1b8] sm:$0xff] }
 0x55c   : > { %2292 = vmatprep.subr.mxu0 %v2207_v61  ;;  %v2456_v61 = vld [vmem:[#allocation13 + $0x68] sm:$0xff] }
 0x55d   : > { %2293 = vmatpush1.msra.mxu0 %v2206_v11  ;;  %v2454_v11 = vld [vmem:[#allocation13 + $0x58] sm:$0xff] }
 0x55e   : > { %2294 = vmatprep.subr.mxu0 %v2205_v29  ;;  %v2452_v29 = vld [vmem:[#allocation13 + $0x48] sm:$0xff] }
 0x55f   : > { %2295 = vmatpush1.msra.mxu0 %v2204_v9  ;;  %v2448_v9 = vld [vmem:[#allocation13 + $0x28] sm:$0xff] }
 0x560   : > { %2296 = vmatprep.subr.mxu0 %v2203_v16  ;;  %v2447_v16 = vld [vmem:[#allocation13 + $0x20] sm:$0xff] }
 0x561   : > { %2297 = vmatpush1.msra.mxu0 %v2202_v58 }
 0x562   : > { %2298 = vmatprep.subr.mxu0 %v2265_v3 }
 0x563   : > { %2299 = vmatpush2.msra.mxu0 %v2264_v4 }
 0x564   : > { %2300 = vmatprep.subr.mxu0 %v2263_v45 }
 0x565   : > { %2301 = vmatpush2.msra.mxu0 %v2262_v22 }
 0x566   : > { %2302 = vmatprep.subr.mxu0 %v2261_v63 }
 0x567   : > { %2303 = vmatpush2.msra.mxu0 %v2260_v34 }
 0x568   : > { %2304 = vmatprep.subr.mxu0 %v2259_v20 }
 0x569   : > { %2305 = vmatpush2.msra.mxu0 %v2258_v43 }
 0x56a   : > { %2306 = vmatprep.subr.mxu0 %v2257_v17 }
 0x5c0   : > { %v2057_v7 = vpop.xlane.xlu1 %2056 }
 0x5c1   : > { %v2071_v13 = vmul.f32 0.03125, %v2057_v7  ;;  %v2256_v7 = vld [vmem:[#allocation11 + $0x1b0] sm:$0xff] }
 0x5c2   : > { %v2055_v51 = vpop.xlane.xlu0 %2054  ;;  %2307 = vmatpush2.msra.mxu0 %v2256_v7 }
 0x5c3   : > { %v2070_v10 = vmul.f32 0.03125, %v2055_v51  ;;  %v2079_v37 = vsub.f32 %v4347_v23, %v2071_v13  ;;  %v2255_v13 = vld [vmem:[#allocation11 + $0x1a8] sm:$0xff]  ;;  %v2254_v51 = vld [vmem:[#allocation11 + $0x1a0] sm:$0xff] }
 0x5c4   : > { %2308 = vmatprep.subr.mxu0 %v2255_v13 }
 0x5c5   : > { %v2078_v42 = vsub.f32 %v4350_v52, %v2070_v10  ;;  %v4384_v6 = vmul.f32 %v4618_v39, %v2079_v37  ;;  %v2253_v10 = vld [vmem:[#allocation11 + $0x198] sm:$0xff]  ;;  %2309 = vmatpush2.msra.mxu0 %v2254_v51  ;;  %v2252_v37 = vld [vmem:[#allocation11 + $0x190] sm:$0xff] }
 0x5c6   : > { %v2059_v18 = vpop.xlane.xlu1 %2058  ;;  %2310 = vmatprep.subr.mxu0 %v2253_v10 }
 0x5c7   : > { %v4381_v24 = vmul.f32 %v4618_v39, %v2078_v42  ;;  %v2072_v12 = vmul.f32 0.03125, %v2059_v18  ;;  %v2095_v19 = vmul.f32 %v4384_v6, %v4384_v6  ;;  %v2251_v42 = vld [vmem:[#allocation11 + $0x188] sm:$0xff]  ;;  %2311 = vmatpush2.msra.mxu0 %v2252_v37  ;;  %v2250_v18 = vld [vmem:[#allocation11 + $0x180] sm:$0xff] }
 0x5c8   : > { %2312 = vmatprep.subr.mxu0 %v2251_v42 }
 0x5c9   : > { %v2094_v54 = vmul.f32 %v4381_v24, %v4381_v24  ;;  %v2080_v25 = vsub.f32 %v4355_v38, %v2072_v12  ;;  %2313 = vmatpush2.msra.mxu0 %v2250_v18  ;;  %v2247_v12 = vld [vmem:[#allocation11 + $0x168] sm:$0xff] }
 0x5ca   : > { %v2063_v31 = vpop.xlane.xlu1 %2062 }
 0x5cb   : > { %2102 = vadd.xlane.f32.xlu0 %v2094_v54  ;;  %v2074_v41 = vmul.f32 0.03125, %v2063_v31  ;;  %v4396_v28 = vmul.f32 %v4618_v39, %v2080_v25  ;;  %v2248_v54 = vld [vmem:[#allocation11 + $0x170] sm:$0xff]  ;;  %v2246_v31 = vld [vmem:[#allocation11 + $0x160] sm:$0xff] }
 0x5cc   : > { %v2069_v35 = vpop.xlane.xlu0 %2068  ;;  %v2242_v25 = vld [vmem:[#allocation11 + $0x140] sm:$0xff] }
 0x5cd   : > { %v2077_v48 = vmul.f32 0.03125, %v2069_v35  ;;  %v2082_v55 = vsub.f32 %v4359_v50, %v2074_v41  ;;  %v2096_v0 = vmul.f32 %v4396_v28, %v4396_v28  ;;  %v2245_v35 = vld [vmem:[#allocation11 + $0x158] sm:$0xff] }
 0x5ce   : > { %v2067_v44 = vpop.xlane.xlu1 %2066  ;;  %v2241_v41 = vld [vmem:[#allocation11 + $0x138] sm:$0xff] }
 0x5cf   : > { %v2085_v49 = vsub.f32 %v4362_v40, %v2077_v48  ;;  %2104 = vadd.xlane.f32.xlu0 %v2095_v19  ;;  %v2076_v26 = vmul.f32 0.03125, %v2067_v44  ;;  %v4408_v62 = vmul.f32 %v4618_v39, %v2082_v55  ;;  %v2244_v48 = vld [vmem:[#allocation11 + $0x150] sm:$0xff]  ;;  %v2243_v19 = vld [vmem:[#allocation11 + $0x148] sm:$0xff] }
 0x5d0   : > { %v2061_v60 = vpop.xlane.xlu0 %2060  ;;  %v2239_v44 = vld [vmem:[#allocation11 + $0x128] sm:$0xff]  ;;  %v2236_v55 = vld [vmem:[#allocation11 + $0x110] sm:$0xff] }
 0x5d1   : > { %v4393_v2 = vmul.f32 %v4618_v39, %v2085_v49  ;;  %v2073_v36 = vmul.f32 0.03125, %v2061_v60  ;;  %v2084_v5 = vsub.f32 %v4366_v32, %v2076_v26  ;;  %v2098_v30 = vmul.f32 %v4408_v62, %v4408_v62  ;;  %v2240_v49 = vld [vmem:[#allocation11 + $0x130] sm:$0xff]  ;;  %v2238_v60 = vld [vmem:[#allocation11 + $0x120] sm:$0xff]  ;;  %v2235_v26 = vld [vmem:[#allocation11 + $0x108] sm:$0xff] }
 0x5d3   : > { %v2081_v57 = vsub.f32 %v4370_v1, %v2073_v36  ;;  %v2101_v53 = vmul.f32 %v4393_v2, %v4393_v2  ;;  %v4418_v33 = vmul.f32 %v4618_v39, %v2084_v5  ;;  %v2237_v36 = vld [vmem:[#allocation11 + $0x118] sm:$0xff]  ;;  %v2451_v5 = vld [vmem:[#allocation13 + $0x40] sm:$0xff] }
 0x5d4   : > { %v2065_v56 = vpop.xlane.xlu0 %2064 }
 0x5d5   : > { %v4403_v47 = vmul.f32 %v4618_v39, %v2081_v57  ;;  %v2075_v27 = vmul.f32 0.03125, %v2065_v56  ;;  %2116 = vadd.xlane.f32.xlu1 %v2101_v53  ;;  %v2100_v59 = vmul.f32 %v4418_v33, %v4418_v33  ;;  %v2234_v57 = vld [vmem:[#allocation11 + $0x100] sm:$0xff]  ;;  %v2458_v53 = vld [vmem:[#allocation13 + $0x78] sm:$0xff]  ;;  %v2457_v56 = vld [vmem:[#allocation13 + $0x70] sm:$0xff] }
 0x5d6   : > { %2944 = vmatprep.subr.mxu1 %v2458_v53 }
 0x5d7   : > { %v2083_v14 = vsub.f32 %v4375_v15, %v2075_v27  ;;  %v2097_v21 = vmul.f32 %v4403_v47, %v4403_v47  ;;  %2945 = vmatpush3.msra.mxu1 %v2458_v53  ;;  %v2455_v27 = vld [vmem:[#allocation13 + $0x60] sm:$0xff] }
 0x5d8   : > { %2946 = vmatprep.subr.mxu1 %v2457_v56 }
 0x5d9   : > { %v4415_v8 = vmul.f32 %v4618_v39, %v2083_v14  ;;  %2108 = vadd.xlane.f32.xlu0 %v2097_v21  ;;  %2106 = vadd.xlane.f32.xlu1 %v2096_v0  ;;  %v2249_v39 = vld [vmem:[#allocation11 + $0x178] sm:$0xff]  ;;  %v2453_v0 = vld [vmem:[#allocation13 + $0x50] sm:$0xff] }
 0x5da   : > { %2314 = vmatprep.subr.mxu0 %v2249_v39  ;;  %2947 = vmatpush3.msra.mxu1 %v2457_v56  ;;  %v2450_v14 = vld [vmem:[#allocation13 + $0x38] sm:$0xff]  ;;  %v2449_v21 = vld [vmem:[#allocation13 + $0x30] sm:$0xff] }
 0x5db   : > { %v2099_v46 = vmul.f32 %v4415_v8, %v4415_v8  ;;  %2315 = vmatpush2.msra.mxu0 %v2248_v54  ;;  %2948 = vmatprep.subr.mxu1 %v2456_v61 }
 0x5dc   : > { %2316 = vmatprep.subr.mxu0 %v2247_v12  ;;  %2949 = vmatpush3.msra.mxu1 %v2456_v61 }
 0x5dd   : > { %2112 = vadd.xlane.f32.xlu0 %v2099_v46  ;;  %2110 = vadd.xlane.f32.xlu1 %v2098_v30 }
 0x5de   : > { %2317 = vmatpush2.msra.mxu0 %v2246_v31  ;;  %2950 = vmatprep.subr.mxu1 %v2455_v27 }
 0x5df   : > { %2318 = vmatprep.subr.mxu0 %v2245_v35  ;;  %2951 = vmatpush3.msra.mxu1 %v2455_v27 }
 0x5e0   : > { %2319 = vmatpush2.msra.mxu0 %v2244_v48  ;;  %2952 = vmatprep.subr.mxu1 %v2454_v11 }
 0x5e1   : > { %2114 = vadd.xlane.f32.xlu1 %v2100_v59  ;;  %2320 = vmatprep.subr.mxu0 %v2243_v19 }
 0x5e2   : > { %2321 = vmatpush2.msra.mxu0 %v2242_v25  ;;  %2953 = vmatpush3.msra.mxu1 %v2454_v11  ;;  %v2776_v25 = vld [vmem:[%s4537_s5] ss:$0 sm:$0xff] }
 0x5e3   : > { %2322 = vmatprep.subr.mxu0 %v2241_v41  ;;  %2954 = vmatprep.subr.mxu1 %v2453_v0 }
 0x5e4   : > { %2323 = vmatpush2.msra.mxu0 %v2240_v49  ;;  %2955 = vmatpush3.msra.mxu1 %v2453_v0 }
 0x5e5   : > { %2324 = vmatprep.subr.mxu0 %v2239_v44  ;;  %2956 = vmatprep.subr.mxu1 %v2452_v29 }
 0x5e6   : > { %2325 = vmatpush2.msra.mxu0 %v2238_v60  ;;  %2957 = vmatpush3.msra.mxu1 %v2452_v29 }
 0x5e7   : > { %2326 = vmatprep.subr.mxu0 %v2237_v36  ;;  %2958 = vmatprep.subr.mxu1 %v2451_v5  ;;  %v2777_v36 = vld [vmem:[%s4538_s6] ss:$0 sm:$0xff] }
 0x5e8   : > { %2327 = vmatpush2.msra.mxu0 %v2236_v55  ;;  %2959 = vmatpush3.msra.mxu1 %v2451_v5 }
 0x5e9   : > { %2328 = vmatprep.subr.mxu0 %v2235_v26  ;;  %2960 = vmatprep.subr.mxu1 %v2450_v14 }
 0x5ea   : > { %2329 = vmatpush2.msra.mxu0 %v2234_v57  ;;  %2961 = vmatpush3.msra.mxu1 %v2450_v14 }
 0x5eb   : > { %2962 = vmatprep.subr.mxu1 %v2449_v21 }
 0x5ec   : > { %2963 = vmatpush3.msra.mxu1 %v2449_v21 }
 0x5ed   : > { %2964 = vmatprep.subr.mxu1 %v2448_v9 }
 0x5ee   : > { %2965 = vmatpush3.msra.mxu1 %v2448_v9 }
 0x5ef   : > { %2966 = vmatprep.subr.mxu1 %v2447_v16 }
 0x5f0   : > { %2967 = vmatpush3.msra.mxu1 %v2447_v16 }
 0x654   : > { %v2103_v58 = vpop.xlane.xlu0 %2102 }
 0x655   : > { %v2118_v3 = vmul.f32 0.03125, %v2103_v58 }
 0x657   : > { %v2126_v46 = vadd.f32 1e-05, %v2118_v3 }
 0x658   : > { %v2105_v30 = vpop.xlane.xlu0 %2104 }
 0x659   : > { %v2119_v4 = vmul.f32 0.03125, %v2105_v30  ;;  %3265 = vrsqrt.f32 %v2126_v46 }
 0x65b   : > { %v2127_v45 = vadd.f32 1e-05, %v2119_v4 }
 0x65d   : > { %3267 = vrsqrt.f32 %v2127_v45 }
 0x65e   : > { %v2117_v22 = vpop.xlane.xlu1 %2116 }
 0x65f   : > { %v2125_v63 = vmul.f32 0.03125, %v2117_v22 }
 0x661   : > { %v2133_v59 = vadd.f32 1e-05, %v2125_v63 }
 0x662   : > { %v2109_v34 = vpop.xlane.xlu0 %2108  ;;  %v2107_v20 = vpop.xlane.xlu1 %2106 }
 0x663   : > { %3269 = vrsqrt.f32 %v2133_v59  ;;  %v2121_v43 = vmul.f32 0.03125, %v2109_v34  ;;  %v2120_v17 = vmul.f32 0.03125, %v2107_v20 }
 0x665   : > { %v2129_v7 = vadd.f32 1e-05, %v2121_v43  ;;  %v2128_v13 = vadd.f32 1e-05, %v2120_v17 }
 0x666   : > { %v2113_v51 = vpop.xlane.xlu0 %2112  ;;  %v2111_v10 = vpop.xlane.xlu1 %2110 }
 0x667   : > { %3271 = vrsqrt.f32 %v2129_v7  ;;  %v2123_v37 = vmul.f32 0.03125, %v2113_v51  ;;  %v2122_v42 = vmul.f32 0.03125, %v2111_v10  ;;  %v3266_v18 = vpop.eup %3265 }
 0x668   : > { %3273 = vrsqrt.f32 %v2128_v13  ;;  %v2142_v48 = vmul.f32 %v3266_v18, %v4381_v24  ;;  %v2446_v18 = vld [vmem:[#allocation13 + $0x18] sm:$0xff] }
 0x669   : > { %v2131_v39 = vadd.f32 1e-05, %v2123_v37  ;;  %v2130_v54 = vadd.f32 1e-05, %v2122_v42  ;;  %2968 = vmatprep.subr.mxu1 %v2446_v18 }
 0x66a   : > { %v3268_v12 = vpop.eup %3267  ;;  %v2115_v31 = vpop.xlane.xlu1 %2114  ;;  %v2156_v49 = vmul.f32 %v2776_v25, %v2142_v48  ;;  %2969 = vmatpush3.msra.mxu1 %v2446_v18 }
 0x66b   : > { %3275 = vrsqrt.f32 %v2131_v39  ;;  %v2124_v35 = vmul.f32 0.03125, %v2115_v31  ;;  %v2143_v19 = vmul.f32 %v3268_v12, %v4384_v6  ;;  %v2445_v39 = vld [vmem:[#allocation13 + $0x10] sm:$0xff]  ;;  %v2443_v12 = vld [vmem:[#allocation13] sm:$0xff] }
 0x66c   : > { %3277 = vrsqrt.f32 %v2130_v54  ;;  %v2170_v24 = vadd.f32 %v2777_v36, %v2156_v49  ;;  %2970 = vmatprep.subr.mxu1 %v2445_v39  ;;  %v2444_v54 = vld [vmem:[#allocation13 + $0x8] sm:$0xff] }
 0x66d   : > { %v2132_v41 = vadd.f32 1e-05, %v2124_v35  ;;  %v2157_v44 = vmul.f32 %v2776_v25, %v2143_v19  ;;  %2971 = vmatpush3.msra.mxu1 %v2445_v39 }
 0x66e   : > { %v2178_v11 = vrot.slane %v2170_v24, 7  ;;  %2972 = vmatprep.subr.mxu1 %v2444_v54 }
 0x66f   : > { %3279 = vrsqrt.f32 %v2132_v41  ;;  %v2171_v57 = vadd.f32 %v2777_v36, %v2157_v44  ;;  %2973 = vmatpush3.msra.mxu1 %v2444_v54 }
 0x670   : > { %v3270_v60 = vpop.eup %3269  ;;  %2974 = vmatprep.subr.mxu1 %v2443_v12 }
 0x671   : > { %v2149_v55 = vmul.f32 %v3270_v60, %v4393_v2  ;;  %v2179_v29 = vrot.slane %v2171_v57, 7  ;;  %2975 = vmatpush3.msra.mxu1 %v2443_v12 }
 0x673   : > { %v2163_v26 = vmul.f32 %v2776_v25, %v2149_v55 }
 0x674   : > { %v3272_v6 = vpop.eup %3271 }
 0x675   : > { %v3274_v53 = vpop.eup %3273  ;;  %v2177_v56 = vadd.f32 %v2777_v36, %v2163_v26  ;;  %v2145_v61 = vmul.f32 %v3272_v6, %v4403_v47 }
 0x676   : > { %v2144_v27 = vmul.f32 %v3274_v53, %v4396_v28  ;;  %v2192_v28 = vsel %vm807_vm1, %v2178_v11, %v2179_v29 }
 0x677   : > { %v2185_v0 = vrot.slane %v2177_v56, 7  ;;  %v2159_v5 = vmul.f32 %v2776_v25, %v2145_v61 }
 0x678   : > { %v3276_v14 = vpop.eup %3275  ;;  %v2158_v21 = vmul.f32 %v2776_v25, %v2144_v27 }
 0x679   : > { %v3278_v9 = vpop.eup %3277  ;;  %v2193_v2 = vsel %vm807_vm1, %v2185_v0, %v2178_v11  ;;  %v2173_v3 = vadd.f32 %v2777_v36, %v2159_v5  ;;  %v2147_v47 = vmul.f32 %v3276_v14, %v4415_v8 }
 0x67a   : > { %2779 = vmatprep.mubr.msk.f32.mxu0 %vm2795_vm2, %v2193_v2  ;;  %v2172_v58 = vadd.f32 %v2777_v36, %v2158_v21  ;;  %v2146_v46 = vmul.f32 %v3278_v9, %v4408_v62 }
 0x67b   : > { %2331 = vmatmul.mubr.f32.vlgmr.msra.gmra.mxu0 %v2170_v24  ;;  %v2181_v22 = vrot.slane %v2173_v3, 7  ;;  %v2161_v34 = vmul.f32 %v2776_v25, %v2147_v47 }
 0x67c   : > { %v3280_v30 = vpop.eup %3279  ;;  %2336 = vmatprep.mubr.f32.mxu0 %v2192_v28  ;;  %v2180_v4 = vrot.slane %v2172_v58, 7  ;;  %v2160_v45 = vmul.f32 %v2776_v25, %v2146_v46 }
 0x67d   : > { %v2148_v20 = vmul.f32 %v3280_v30, %v4418_v33  ;;  %v2175_v8 = vadd.f32 %v2777_v36, %v2161_v34 }
 0x67e   : > { %v2191_v63 = vsel %vm807_vm1, %v2179_v29, %v2180_v4  ;;  %v2174_v59 = vadd.f32 %v2777_v36, %v2160_v45  ;;  %v2190_v62 = vsel %vm807_vm1, %v2180_v4, %v2181_v22 }
 0x67f   : > { %2337 = vmatmul.mubr.f32.gmra.mxu0 %v2171_v57  ;;  %v2162_v17 = vmul.f32 %v2776_v25, %v2148_v20  ;;  %v2183_v13 = vrot.slane %v2175_v8, 7 }
 0x680   : > { %2342 = vmatprep.mubr.f32.mxu0 %v2191_v63  ;;  %v2182_v43 = vrot.slane %v2174_v59, 7 }
 0x681   : > { %v2176_v51 = vadd.f32 %v2777_v36, %v2162_v17 }
 0x682   : > { %v2189_v7 = vsel %vm807_vm1, %v2181_v22, %v2182_v43  ;;  %v2188_v33 = vsel %vm807_vm1, %v2182_v43, %v2183_v13 }
 0x683   : > { %2343 = vmatmul.mubr.f32.gmra.mxu0 %v2172_v58  ;;  %v2184_v10 = vrot.slane %v2176_v51, 7 }
 0x684   : > { %2348 = vmatprep.mubr.f32.mxu0 %v2190_v62 }
 0x685   : > { %v2187_v37 = vsel %vm807_vm1, %v2183_v13, %v2184_v10  ;;  %v2186_v42 = vsel %vm807_vm1, %v2184_v10, %v2185_v0 }
 0x687   : > { %2349 = vmatmul.mubr.f32.gmra.mxu0 %v2173_v3 }
 0x688   : > { %2354 = vmatprep.mubr.f32.mxu0 %v2189_v7 }
 0x68b   : > { %2355 = vmatmul.mubr.f32.gmra.mxu0 %v2174_v59 }
 0x68c   : > { %2360 = vmatprep.mubr.f32.mxu0 %v2188_v33 }
 0x68f   : > { %2361 = vmatmul.mubr.f32.gmra.mxu0 %v2175_v8 }
 0x690   : > { %2366 = vmatprep.mubr.f32.mxu0 %v2187_v37 }
 0x693   : > { %2367 = vmatmul.mubr.f32.gmra.mxu0 %v2176_v51 }
 0x694   : > { %2372 = vmatprep.mubr.f32.mxu0 %v2186_v42 }
 0x697   : > { %2373 = vmatmul.mubr.f32.gmra.mxu0 %v2177_v56 }
 0x73b   : > { %v2332_v31 = vpop.f32.mrf.mxu0 }
 0x73c   : > { %v2379_v35 = vmax.f32 %v2332_v31, 0.0 }
 0x73d   : > { %v2334_v48 = vpop.f32.mrf.mxu0 }
 0x73e   : > { %v2387_v19 = vmul.f32 %v2379_v35, %v2379_v35  ;;  %v2780_v47 = vmul.f32 -1.442695, %v2334_v48 }
 0x73f   : > { %v2338_v25 = vpop.f32.mrf.mxu0 }
 0x740   : > { %v2380_v41 = vmax.f32 %v2338_v25, 0.0  ;;  %2976 = vmatprep.mubr.f32.mxu1 %v2387_v19  ;;  %v4620_v25 = vld [vmem:[#allocation23_spill] sm:$0xff] }
 0x741   : > { %v2340_v49 = vpop.f32.mrf.mxu0 }
 0x742   : > { %v2388_v44 = vmul.f32 %v2380_v41, %v2380_v41  ;;  %v2781_v28 = vmul.f32 -1.442695, %v2340_v49 }
 0x743   : > { %v2344_v60 = vpop.f32.mrf.mxu0 }
 0x744   : > { %v2381_v36 = vmax.f32 %v2344_v60, 0.0  ;;  %2977 = vmatmul.mubr.f32.vlgmr.msra.gmra.mxu1 %v2388_v44  ;;  %3281 = vpow2.f32 %v2781_v28 }
 0x745   : > { %v2346_v55 = vpop.f32.mrf.mxu0  ;;  %3283 = vpow2.f32 %v2780_v47 }
 0x746   : > { %v2389_v26 = vmul.f32 %v2381_v36, %v2381_v36  ;;  %v2782_v4 = vmul.f32 -1.442695, %v2346_v55  ;;  %v4621_v36 = vld [vmem:[#allocation22_spill] sm:$0xff] }
 0x747   : > { %v2350_v24 = vpop.f32.mrf.mxu0 }
 0x748   : > { %v2382_v57 = vmax.f32 %v2350_v24, 0.0  ;;  %2979 = vmatprep.mubr.f32.mxu1 %v2389_v26 }
 0x749   : > { %v2352_v6 = vpop.f32.mrf.mxu0 }
 0x74a   : > { %v2390_v53 = vmul.f32 %v2382_v57, %v2382_v57  ;;  %v2783_v30 = vmul.f32 -1.442695, %v2352_v6 }
 0x74b   : > { %v2356_v56 = vpop.f32.mrf.mxu0 }
 0x74c   : > { %v2383_v61 = vmax.f32 %v2356_v56, 0.0  ;;  %2980 = vmatmul.mubr.f32.gmra.mxu1 %v2390_v53  ;;  %3285 = vpow2.f32 %v2783_v30 }
 0x74d   : > { %v2358_v27 = vpop.f32.mrf.mxu0  ;;  %3287 = vpow2.f32 %v2782_v4 }
 0x74e   : > { %v2391_v11 = vmul.f32 %v2383_v61, %v2383_v61  ;;  %v2784_v63 = vmul.f32 -1.442695, %v2358_v27 }
 0x74f   : > { %v2362_v0 = vpop.f32.mrf.mxu0 }
 0x750   : > { %v2384_v29 = vmax.f32 %v2362_v0, 0.0  ;;  %2982 = vmatprep.mubr.f32.mxu1 %v2391_v11  ;;  %v4623_v0 = vld [vmem:[#allocation25_spill] sm:$0xff] }
 0x751   : > { %v2364_v5 = vpop.f32.mrf.mxu0  ;;  %v3282_v22 = vpop.eup %3281 }
 0x752   : > { %v2392_v14 = vmul.f32 %v2384_v29, %v2384_v29  ;;  %v2785_v45 = vmul.f32 -1.442695, %v2364_v5  ;;  %v3284_v59 = vpop.eup %3283  ;;  %v2420_v34 = vadd.f32 1.0, %v3282_v22 }
 0x753   : > { %v2368_v21 = vpop.f32.mrf.mxu0  ;;  %v2419_v62 = vadd.f32 1.0, %v3284_v59  ;;  %v4626_v59 = vld [vmem:[#allocation24_spill] sm:$0xff] }
 0x754   : > { %v2385_v9 = vmax.f32 %v2368_v21, 0.0  ;;  %2983 = vmatmul.mubr.f32.gmra.mxu1 %v2392_v14  ;;  %3289 = vpow2.f32 %v2785_v45 }
 0x755   : > { %v2370_v16 = vpop.f32.mrf.mxu0  ;;  %3291 = vpow2.f32 %v2784_v63 }
 0x756   : > { %v2393_v2 = vmul.f32 %v2385_v9, %v2385_v9  ;;  %3293 = vrcp.f32 %v2420_v34  ;;  %v2786_v17 = vmul.f32 -1.442695, %v2370_v16 }
 0x757   : > { %v2374_v58 = vpop.f32.mrf.mxu0  ;;  %3295 = vrcp.f32 %v2419_v62 }
 0x758   : > { %v2386_v3 = vmax.f32 %v2374_v58, 0.0  ;;  %2985 = vmatprep.mubr.f32.mxu1 %v2393_v2  ;;  %v4624_v58 = vld [vmem:[#allocation28_spill] sm:$0xff] }
 0x759   : > { %v2376_v20 = vpop.f32.mrf.mxu0  ;;  %v3286_v8 = vpop.eup %3285 }
 0x75a   : > { %v2394_v46 = vmul.f32 %v2386_v3, %v2386_v3  ;;  %v2787_v43 = vmul.f32 -1.442695, %v2376_v20  ;;  %v3288_v7 = vpop.eup %3287  ;;  %v2422_v13 = vadd.f32 1.0, %v3286_v8  ;;  %v4628_v20 = vld [vmem:[#allocation29_spill] sm:$0xff] }
 0x75b   : > { %v2421_v51 = vadd.f32 1.0, %v3288_v7 }
 0x75c   : > { %2986 = vmatmul.mubr.f32.gmra.mxu1 %v2394_v46  ;;  %3297 = vpow2.f32 %v2787_v43 }
 0x75d   : > { %3299 = vpow2.f32 %v2786_v17 }
 0x75e   : > { %3301 = vrcp.f32 %v2422_v13 }
 0x75f   : > { %3303 = vrcp.f32 %v2421_v51 }
 0x761   : > { %v3290_v33 = vpop.eup %3289 }
 0x762   : > { %v3292_v10 = vpop.eup %3291  ;;  %v2424_v37 = vadd.f32 1.0, %v3290_v33 }
 0x763   : > { %v3294_v42 = vpop.eup %3293  ;;  %v2423_v39 = vadd.f32 1.0, %v3292_v10 }
 0x764   : > { %v3296_v12 = vpop.eup %3295  ;;  %3305 = vrcp.f32 %v2424_v37 }
 0x765   : > { %3307 = vrcp.f32 %v2423_v39 }
 0x769   : > { %v3298_v19 = vpop.eup %3297 }
 0x76a   : > { %v3300_v44 = vpop.eup %3299  ;;  %v2426_v60 = vadd.f32 1.0, %v3298_v19 }
 0x76b   : > { %v3302_v26 = vpop.eup %3301  ;;  %v2425_v57 = vadd.f32 1.0, %v3300_v44 }
 0x76c   : > { %3309 = vrcp.f32 %v2426_v60 }
 0x76d   : > { %3311 = vrcp.f32 %v2425_v57 }
 0x804   : > { %v2978_v18 = vpop.f32.mrf.mxu1 }
 0x805   : > { %v2565_v54 = vmul.f32 %v3294_v42, %v2978_v18 }
 0x806   : > { %v2525_v31 = vpop.f32.mrf.mxu1 }
 0x807   : > { %v2573_v35 = vadd.f32 %v2565_v54, %v4347_v23  ;;  %v2564_v48 = vmul.f32 %v3296_v12, %v2525_v31  ;;  %v3304_v23 = vpop.eup %3303 }
 0x808   : > { %v3306_v5 = vpop.eup %3305 }
 0x809   : > { %v2581_v41 = vadd.f32 %v2573_v35, %v4620_v25  ;;  %v2572_v49 = vadd.f32 %v2564_v48, %v4350_v52  ;;  %v4622_v52 = vld [vmem:[#allocation26_spill] sm:$0xff]  ;;  %v3308_v9 = vpop.eup %3307 }
 0x80a   : > { %v3310_v47 = vpop.eup %3309 }
 0x80b   : > { %2589 = vst [vmem:[%s4040_s7 + $0x8] sm:$0xff] %v2581_v41  ;;  %v2580_v55 = vadd.f32 %v2572_v49, %v4621_v36  ;;  %v3312_v45 = vpop.eup %3311 }
 0x80c   : > { %v2981_v24 = vpop.f32.mrf.mxu1 }
 0x80d   : > { %2588 = vst [vmem:[%s4040_s7] sm:$0xff] %v2580_v55  ;;  %v2567_v6 = vmul.f32 %v3302_v26, %v2981_v24 }
 0x80e   : > { %v2535_v53 = vpop.f32.mrf.mxu1 }
 0x80f   : > { %v2575_v56 = vadd.f32 %v2567_v6, %v4370_v1  ;;  %v2566_v61 = vmul.f32 %v3304_v23, %v2535_v53 }
 0x811   : > { %v2583_v27 = vadd.f32 %v2575_v56, %v4622_v52  ;;  %v2574_v11 = vadd.f32 %v2566_v61, %v4355_v38  ;;  %v4625_v38 = vld [vmem:[#allocation27_spill] sm:$0xff] }
 0x813   : > { %2591 = vst [vmem:[%s4040_s7 + $0x18] sm:$0xff] %v2583_v27  ;;  %v2582_v29 = vadd.f32 %v2574_v11, %v4623_v0 }
 0x814   : > { %v2984_v14 = vpop.f32.mrf.mxu1 }
 0x815   : > { %2590 = vst [vmem:[%s4040_s7 + $0x10] sm:$0xff] %v2582_v29  ;;  %v2569_v21 = vmul.f32 %v3306_v5, %v2984_v14 }
 0x816   : > { %v2545_v16 = vpop.f32.mrf.mxu1 }
 0x817   : > { %v2577_v1 = vadd.f32 %v2569_v21, %v4375_v15  ;;  %v2568_v2 = vmul.f32 %v3308_v9, %v2545_v16 }
 0x819   : > { %v2585_v3 = vadd.f32 %v2577_v1, %v4624_v58  ;;  %v2576_v46 = vadd.f32 %v2568_v2, %v4359_v50 }
 0x81b   : > { %2593 = vst [vmem:[%s4040_s7 + $0x28] sm:$0xff] %v2585_v3  ;;  %v2584_v28 = vadd.f32 %v2576_v46, %v4625_v38 }
 0x81c   : > { %v2987_v30 = vpop.f32.mrf.mxu1 }
 0x81d   : > { %2592 = vst [vmem:[%s4040_s7 + $0x20] sm:$0xff] %v2584_v28  ;;  %v2571_v4 = vmul.f32 %v3310_v47, %v2987_v30 }
 0x81e   : > { %v2555_v22 = vpop.f32.mrf.mxu1 }
 0x81f   : > { %v2579_v15 = vadd.f32 %v2571_v4, %v4362_v40  ;;  %v2570_v63 = vmul.f32 %v3312_v45, %v2555_v22 }
 0x821   : > { %v2587_v50 = vadd.f32 %v2579_v15, %v4626_v59  ;;  %v2578_v34 = vadd.f32 %v2570_v63, %v4366_v32 }
 0x823   : > { %2595 = vst [vmem:[%s4040_s7 + $0x38] sm:$0xff] %v2587_v50  ;;  %v2586_v40 = vadd.f32 %v2578_v34, %v4628_v20 }
 0x825   : > { %2594 = vst [vmem:[%s4040_s7 + $0x30] sm:$0xff] %v2586_v40 }
 0x826   : > { %3458 = shalt.err (!%p3455_p3)
}
 0x827   : > { %s3459_s7 = scalar_lea.hbm %s4484_s12, 1024  ;;  %s3463_s15 = scalar_lea.hbm %s4627_s16, 2048 }
 0x828   : > { %p3460_p4 = scmp.ne.s32.totalorder %s4484_s12, %s3459_s7  ;;  %p3464_p11 = scmp.lt.s32.totalorder %s4484_s12, %s4627_s16 }
 0x829   : > { %p3465_p6 = scmp.lt.s32.totalorder %s3463_s15, %s3459_s7 }
 0x82a   : > { %p3461_p8 = pnand %p3460_p4, %p4629_p9 }
 0x82b   : > { %p3466_p12 = por %p3465_p6, %p3464_p11 }
 0x82c   : > { %p3462_p0 = pneg %p3461_p8 }
 0x82e   : > { %p3467_p7 = pnand %p3466_p12, %p3462_p0 }
 0x830   : > { %3470 = shalt.err (!%p3467_p7)
}
 0x831   : > { %s3565_s20 = smov 128   ;;  %s3566_s30 = smov 8  }
 0x832   : > { %3006 = dma.vmem_to_hbm [thread:$0]  (%p4629_p9), %s4486_s10, 1024, %s4484_s12, %s2597_s29, %s3565_s20, %s3565_s20, %s3566_s30  }
 0x833 PF: > { %s4630_s17 = sld [smem:[#allocation19_spill]]  ;;  %p4633_p5 = scmp.ge.s32.totalorder %s3533_s28, 2 }
 0x834   : > { %s4631_s19 = sld [smem:[#allocation20_spill]] }
 0x839   : > { %s2625_s14 = sand.u32 1, %s4630_s17  }
 0x83a   : > { %p4632_p13 = scmp.ne.s32.totalorder %s4631_s19, 0  ;;  %s2626_s7 = scalar_lea.sflag [#allocation7], %s2625_s14 }
 0x83c   : > { %p3026_p10 = pnand %p4633_p5, %p4632_p13 }
 0x83e   : > { %p3027_p1 = pneg %p3026_p10 }
 0x840   : > { %3516 = dma.done.wait (%p3027_p1), %s2626_s7, 1024  }
 0x841   : > { %3518 = vsyncadd (%p3027_p1), %s2626_s7, 4294966272  ;;  %s4634_s18 = smov %s3747_s25  ;;  %p28_p2 = scmp.ge.s32.totalorder %s3731_s23, 4  }
 0x842   : > { %s4635_s25 = smov %s3525_s26  ;;  %s4636_s26 = smov %s3529_s27 }
 0x843   : > { %s4637_s27 = smov %s4634_s18  ;;  %s4638_s28 = smov %s3731_s23 }
 0x844   :  { %30 = sbr.rel (!%p28_p2) target bundleno = 13 (0xd), region = 154 }
 0x849   :  { %2631 = vsyncpa [#allocation6], 1 }
 0x84a   :  { %2633 = vsyncpa [#allocation6 + $0x1], 1 }
 0x84b   :  { %2634 = vsyncpa [#allocation9], 1 }
 0x84c   :  { %2635 = vsyncpa [#allocation12], 1 }
 0x84d   :  { %2636 = vsyncpa [#allocation7], 1 }
 0x84e   :  { %2638 = vsyncpa [#allocation7 + $0x1], 1 }

</bundles_post_ra>
